<compile_context>
chip_gen: v7x
topology: tpu7x:2x2x1
jax: 0.10.0
libtpu: 0.0.40
codegen_flags: <defaults>
</compile_context>

<pallas_src>
import math

import jax
import jax.numpy as jnp
from jax.experimental import pallas as pl
from jax.experimental.pallas import tpu as pltpu

D_MODEL = 32
NHEAD = 4
DIM_FF = 64
EPS = 1e-5  # layer_norm_eps from the module


# ---------------------------------------------------------------------------
# shared math helpers (plain jnp; used inside the kernel and by the reference)
# ---------------------------------------------------------------------------
def _ln(x, gamma, beta, eps=EPS):
    mu = jnp.mean(x, axis=-1, keepdims=True)
    xc = x - mu
    var = jnp.mean(xc * xc, axis=-1, keepdims=True)
    return xc * jax.lax.rsqrt(var + eps) * gamma + beta


def _gelu(x):
    # exact (erf) gelu, matching torch.nn.functional.gelu default
    return 0.5 * x * (1.0 + jax.lax.erf(x * (1.0 / math.sqrt(2.0))))


# ---------------------------------------------------------------------------
# kernel-side attention (fused QKV done by caller; out-proj folded per head,
# no lane concat)
# ---------------------------------------------------------------------------
def _attend(q, k, v, out_wT, out_b, need_weights):
    """q: (T, D), k/v: (S, D), out_wT: (D, D) = out_w.T, out_b: (1, D)."""
    T, D = q.shape
    S = k.shape[0]
    hd = D // NHEAD
    scale = 1.0 / math.sqrt(hd)

    out = jnp.zeros((T, D), jnp.float32)
    w_sum = jnp.zeros((T, S), jnp.float32) if need_weights else None
    for h in range(NHEAD):                      # static loop (NHEAD small)
        sl = slice(h * hd, (h + 1) * hd)
        s = jnp.einsum('td,sd->ts', q[:, sl] * scale, k[:, sl],
                       preferred_element_type=jnp.float32)
        a = jax.nn.softmax(s, axis=-1)
        if need_weights:
            w_sum = w_sum + a
        ctx_h = jnp.einsum('ts,sd->td', a, v[:, sl],
                           preferred_element_type=jnp.float32)
        # fold the output projection into the head loop (no concat needed)
        out = out + jnp.einsum('tk,kd->td', ctx_h, out_wT[sl, :],
                               preferred_element_type=jnp.float32)
    out = out + out_b
    if need_weights:
        w_sum = w_sum * (1.0 / NHEAD)
    return out, w_sum


def _mha_self(x, in_w, in_b, out_wT, out_b, need_weights):
    """Self-attention: q_in == k_in == v_in == x -> single fused QKV matmul."""
    D = x.shape[-1]
    qkv = jnp.einsum('td,ed->te', x, in_w,
                     preferred_element_type=jnp.float32) + in_b
    return _attend(qkv[:, 0:D], qkv[:, D:2 * D], qkv[:, 2 * D:3 * D],
                   out_wT, out_b, need_weights)


def _mha_cross(xq, mem, wq, wkv, in_b, out_wT, out_b, need_weights):
    """Cross-attention: q from xq, packed K/V from memory (one KV matmul)."""
    D = xq.shape[-1]
    q = jnp.einsum('td,ed->te', xq, wq,
                   preferred_element_type=jnp.float32) + in_b[:, 0:D]
    kv = jnp.einsum('sd,ed->se', mem, wkv,
                    preferred_element_type=jnp.float32) + in_b[:, D:3 * D]
    return _attend(q, kv[:, 0:D], kv[:, D:2 * D], out_wT, out_b, need_weights)


# ---------------------------------------------------------------------------
# Pallas kernel
# ---------------------------------------------------------------------------
def _make_kernel(bb, need_weights):
    """bb = number of batch samples handled per grid step (static unroll)."""
    D, F = D_MODEL, DIM_FF

    def kernel(q_ref, m_ref, w_ref, vec_ref, out_ref, *aw_refs):
        # ---- packed weight slab: static, 8-aligned sublane slices ----
        sa_in_w = w_ref[0:3 * D, :]                       # (3D, D)  [Wq;Wk;Wv]
        sa_out_wT = w_ref[3 * D:4 * D, :]                 # (D, D)   out_w.T
        ca_wq = w_ref[4 * D:5 * D, :]                     # (D, D)
        ca_wkv = w_ref[5 * D:7 * D, :]                    # (2D, D)  [Wk;Wv]
        ca_out_wT = w_ref[7 * D:8 * D, :]                 # (D, D)   out_w.T
        l1_w = w_ref[8 * D:8 * D + F, :]                  # (F, D)
        l2_wT = w_ref[8 * D + F:8 * D + 2 * F, :]         # (F, D)   l2_w.T

        # ---- packed bias / LayerNorm vector slab (loaded once) ----
        vecs = vec_ref[...]                               # (16, 128)

        def vrow(r, w):
            return vecs[r:r + 1, 0:w]                     # (1, w)

        nq_g, nq_b = vrow(0, D), vrow(1, D)
        sa_in_b, sa_out_b = vrow(2, 3 * D), vrow(3, D)
        n1_g, n1_b = vrow(4, D), vrow(5, D)
        ca_in_b, ca_out_b = vrow(6, 3 * D), vrow(7, D)
        n2_g, n2_b = vrow(8, D), vrow(9, D)
        l1_b, l2_b = vrow(10, F), vrow(11, D)

        for b in range(bb):                               # static unroll over batch block
            q = q_ref[b]                                  # (T, D)
            mem = m_ref[b]                                # (S, D)

            # norm_q + self-attention (fused QKV) + residual (dropout1 = id)
            q_norm = _ln(q, nq_g, nq_b)
            sa_out, sa_w = _mha_self(q_norm, sa_in_w, sa_in_b,
                                     sa_out_wT, sa_out_b, need_weights)
            tgt = q + sa_out

            # norm1 + cross-attention + residual (dropout2 = id)
            ca_out, ca_w = _mha_cross(_ln(tgt, n1_g, n1_b), mem,
                                      ca_wq, ca_wkv, ca_in_b,
                                      ca_out_wT, ca_out_b, need_weights)
            tgt = tgt + ca_out

            # norm2 + FFN (linear1 -> gelu -> linear2) + residual (dropout3 = id)
            x2 = _ln(tgt, n2_g, n2_b)
            hid = _gelu(jnp.einsum('td,fd->tf', x2, l1_w,
                                   preferred_element_type=jnp.float32) + l1_b)
            ff = jnp.einsum('tf,fd->td', hid, l2_wT,
                            preferred_element_type=jnp.float32) + l2_b
            tgt = tgt + ff

            out_ref[b] = tgt.astype(out_ref.dtype)
            if need_weights:
                aw_refs[0][b] = sa_w
                aw_refs[1][b] = ca_w

    return kernel


# ---------------------------------------------------------------------------
# host-side parameter packing: 18 tiny tensors -> 2 slabs (2 DMAs)
# ---------------------------------------------------------------------------
def pack_params(params):
    (nq_g, nq_b, sa_w, sa_b, sa_ow, sa_ob,
     n1_g, n1_b, ca_w, ca_b, ca_ow, ca_ob,
     n2_g, n2_b, l1_w, l1_b, l2_w, l2_b) = params

    # weight slab: width D_MODEL, all row offsets are multiples of 8
    wslab = jnp.concatenate([
        sa_w.astype(jnp.float32),            # rows [0, 3D)
        sa_ow.T.astype(jnp.float32),         # rows [3D, 4D)
        ca_w.astype(jnp.float32),            # rows [4D, 7D)
        ca_ow.T.astype(jnp.float32),         # rows [7D, 8D)
        l1_w.astype(jnp.float32),            # rows [8D, 8D+F)
        l2_w.T.astype(jnp.float32),          # rows [8D+F, 8D+2F)
    ], axis=0)

    def row(v, width=128):
        v = jnp.reshape(v, (1, -1)).astype(jnp.float32)
        return jnp.pad(v, ((0, 0), (0, width - v.shape[1])))

    vslab = jnp.concatenate([
        row(nq_g), row(nq_b), row(sa_b), row(sa_ob),
        row(n1_g), row(n1_b), row(ca_b), row(ca_ob),
        row(n2_g), row(n2_b), row(l1_b), row(l2_b),
    ], axis=0)
    pad_rows = (-vslab.shape[0]) % 8
    if pad_rows:
        vslab = jnp.pad(vslab, ((0, pad_rows), (0, 0)))
    return wslab, vslab


def _grid_blocks(batch):
    """2-way parallel grid on 2-TensorCore chips (v7x); fold batch otherwise."""
    try:
        kind = jax.devices()[0].device_kind.lower()
    except Exception:
        kind = ""
    if "v7" in kind and batch % 2 == 0 and batch >= 2:
        return 2
    return 1


# ---------------------------------------------------------------------------
# wrapper
# ---------------------------------------------------------------------------
def decoder_layer(query, memory, params, need_weights=True):
    """query: (B, T, D), memory: (B, S, D). Returns (out, sa_weights, ca_weights)."""
    B, T, D = query.shape
    S = memory.shape[1]
    wslab, vslab = pack_params(params)

    G = _grid_blocks(B)
    BB = B // G

    in_specs = [
        pl.BlockSpec((BB, T, D), lambda g: (g, 0, 0)),     # query
        pl.BlockSpec((BB, S, D), lambda g: (g, 0, 0)),     # memory
        pl.BlockSpec(wslab.shape, lambda g: (0, 0)),       # weight slab (resident)
        pl.BlockSpec(vslab.shape, lambda g: (0, 0)),       # bias slab (resident)
    ]
    out_specs = [pl.BlockSpec((BB, T, D), lambda g: (g, 0, 0))]
    out_shape = [jax.ShapeDtypeStruct((B, T, D), query.dtype)]
    if need_weights:
        out_specs += [pl.BlockSpec((BB, T, T), lambda g: (g, 0, 0)),
                      pl.BlockSpec((BB, T, S), lambda g: (g, 0, 0))]
        out_shape += [jax.ShapeDtypeStruct((B, T, T), jnp.float32),
                      jax.ShapeDtypeStruct((B, T, S), jnp.float32)]

    outs = pl.pallas_call(
        _make_kernel(BB, need_weights),
        grid=(G,),
        in_specs=in_specs,
        out_specs=out_specs,
        out_shape=out_shape,
        compiler_params=pltpu.CompilerParams(
            dimension_semantics=("parallel",)),
    )(query, memory, wslab, vslab)

    if need_weights:
        return outs[0], outs[1], outs[2]
    return outs[0], None, None


# ---------------------------------------------------------------------------
# pure-JAX reference (independent formulation: separate q/k/v matmuls + concat,
# exactly mirroring PyTorch MultiheadAttention eval semantics)
# ---------------------------------------------------------------------------
def _ref_mha(q_in, k_in, v_in, in_w, in_b, out_w, out_b):
    d = q_in.shape[-1]
    hd = d // NHEAD
    scale = 1.0 / math.sqrt(hd)
    q = jnp.einsum('td,ed->te', q_in, in_w[0:d, :]) + in_b[:, 0:d]
    k = jnp.einsum('sd,ed->se', k_in, in_w[d:2 * d, :]) + in_b[:, d:2 * d]
    v = jnp.einsum('sd,ed->se', v_in, in_w[2 * d:3 * d, :]) + in_b[:, 2 * d:3 * d]
    ctx_parts, w_sum = [], None
    for h in range(NHEAD):
        sl = slice(h * hd, (h + 1) * hd)
        s = jnp.einsum('td,sd->ts', q[:, sl] * scale, k[:, sl])
        a = jax.nn.softmax(s, axis=-1)
        ctx_parts.append(jnp.einsum('ts,sd->td', a, v[:, sl]))
        w_sum = a if w_sum is None else w_sum + a
    ctx = jnp.concatenate(ctx_parts, axis=-1)
    out = jnp.einsum('td,ed->te', ctx, out_w) + out_b
    return out, w_sum * (1.0 / NHEAD)


def _ref_forward_single(q, mem,
                        nq_g, nq_b, sa_w, sa_b, sa_ow, sa_ob,
                        n1_g, n1_b, ca_w, ca_b, ca_ow, ca_ob,
                        n2_g, n2_b, l1_w, l1_b, l2_w, l2_b):
    q_norm = _ln(q, nq_g, nq_b)
    sa_out, sa_wts = _ref_mha(q_norm, q_norm, q_norm, sa_w, sa_b, sa_ow, sa_ob)
    tgt = q + sa_out
    ca_out, ca_wts = _ref_mha(_ln(tgt, n1_g, n1_b), mem, mem,
                              ca_w, ca_b, ca_ow, ca_ob)
    tgt = tgt + ca_out
    x = _ln(tgt, n2_g, n2_b)
    h = _gelu(jnp.einsum('td,fd->tf', x, l1_w) + l1_b)
    ff = jnp.einsum('tf,df->td', h, l2_w) + l2_b
    tgt = tgt + ff
    return tgt, sa_wts, ca_wts


# ---------------------------------------------------------------------------
# main
# ---------------------------------------------------------------------------
if __name__ == "__main__":
    B, T, S = 2, 8, 16
    D, F = D_MODEL, DIM_FF

    key = jax.random.PRNGKey(0)
    ks = list(jax.random.split(key, 20))

    def nrm(k, shape, scale=0.1):
        return (scale * jax.random.normal(k, shape)).astype(jnp.float32)

    query = nrm(ks[0], (B, T, D), 1.0)
    memory = nrm(ks[1], (B, S, D), 1.0)

    # deterministic synthetic parameters (shapes follow the nn.Module __init__)
    params = [
        1.0 + nrm(ks[2], (1, D)), nrm(ks[3], (1, D)),        # norm_q (gamma, beta)
        nrm(ks[4], (3 * D, D)), nrm(ks[5], (1, 3 * D)),       # self_attn in_proj (W, b)
        nrm(ks[6], (D, D)), nrm(ks[7], (1, D)),               # self_attn out_proj (W, b)
        1.0 + nrm(ks[8], (1, D)), nrm(ks[9], (1, D)),         # norm1
        nrm(ks[10], (3 * D, D)), nrm(ks[11], (1, 3 * D)),     # cross_attn in_proj
        nrm(ks[12], (D, D)), nrm(ks[13], (1, D)),             # cross_attn out_proj
        1.0 + nrm(ks[14], (1, D)), nrm(ks[15], (1, D)),       # norm2
        nrm(ks[16], (F, D)), nrm(ks[17], (1, F)),             # linear1 (W: (F,D), b)
        nrm(ks[18], (D, F)), nrm(ks[19], (1, D)),             # linear2 (W: (D,F), b)
    ]

    out, sa_w, ca_w = decoder_layer(query, memory, params, need_weights=True)
    jax.block_until_ready((out, sa_w, ca_w))

    ref_out, ref_sa, ref_ca = jax.vmap(
        lambda q, m: _ref_forward_single(q, m, *params))(query, memory)

    assert out.shape == (B, T, D)
    assert sa_w.shape == (B, T, T)
    assert ca_w.shape == (B, T, S)
    assert jnp.allclose(out, ref_out, atol=2e-3, rtol=2e-3)
    assert jnp.allclose(sa_w, ref_sa, atol=2e-3, rtol=2e-3)
    assert jnp.allclose(ca_w, ref_ca, atol=2e-3, rtol=2e-3)

    print("KERNEL_OK")
</pallas_src>

<mosaic_0001>
module attributes {stable_mosaic.version = 11 : i64} {
  func.func @kernel(%arg0: i32, %arg1: memref<2x8x32xf32, #tpu.memory_space<vmem>>, %arg2: memref<2x16x32xf32, #tpu.memory_space<vmem>>, %arg3: memref<384x32xf32, #tpu.memory_space<vmem>>, %arg4: memref<16x128xf32, #tpu.memory_space<vmem>>, %arg5: memref<2x8x32xf32, #tpu.memory_space<vmem>>, %arg6: memref<2x8x8xf32, #tpu.memory_space<vmem>>, %arg7: memref<2x8x16xf32, #tpu.memory_space<vmem>>) attributes {dimension_semantics = [#tpu.dimension_semantics<parallel>], iteration_bounds = array<i64: 1>, scalar_prefetch = 0 : i64, scratch_operands = 0 : i64, tpu.core_type = #tpu.core_type<tc>, window_params = [{transform_indices = @transform_0, window_bounds = array<i64: 2, 8, 32>}, {transform_indices = @transform_1, window_bounds = array<i64: 2, 16, 32>}, {pipeline_mode = #tpu.pipeline_mode<synchronous>, transform_indices = @transform_2, window_bounds = array<i64: 384, 32>}, {pipeline_mode = #tpu.pipeline_mode<synchronous>, transform_indices = @transform_3, window_bounds = array<i64: 16, 128>}, {transform_indices = @transform_4, window_bounds = array<i64: 2, 8, 32>}, {transform_indices = @transform_5, window_bounds = array<i64: 2, 8, 8>}, {transform_indices = @transform_6, window_bounds = array<i64: 2, 8, 16>}]} {
    %c0 = arith.constant 0 : index
    %c0_0 = arith.constant 0 : index
    %0 = vector.load %arg3[%c0, %c0_0] : memref<384x32xf32, #tpu.memory_space<vmem>>, vector<96x32xf32>
    %c96 = arith.constant 96 : index
    %c0_1 = arith.constant 0 : index
    %1 = vector.load %arg3[%c96, %c0_1] : memref<384x32xf32, #tpu.memory_space<vmem>>, vector<32x32xf32>
    %c128 = arith.constant 128 : index
    %c0_2 = arith.constant 0 : index
    %2 = vector.load %arg3[%c128, %c0_2] : memref<384x32xf32, #tpu.memory_space<vmem>>, vector<32x32xf32>
    %c160 = arith.constant 160 : index
    %c0_3 = arith.constant 0 : index
    %3 = vector.load %arg3[%c160, %c0_3] : memref<384x32xf32, #tpu.memory_space<vmem>>, vector<64x32xf32>
    %c224 = arith.constant 224 : index
    %c0_4 = arith.constant 0 : index
    %4 = vector.load %arg3[%c224, %c0_4] : memref<384x32xf32, #tpu.memory_space<vmem>>, vector<32x32xf32>
    %c256 = arith.constant 256 : index
    %c0_5 = arith.constant 0 : index
    %5 = vector.load %arg3[%c256, %c0_5] : memref<384x32xf32, #tpu.memory_space<vmem>>, vector<64x32xf32>
    %c320 = arith.constant 320 : index
    %c0_6 = arith.constant 0 : index
    %6 = vector.load %arg3[%c320, %c0_6] : memref<384x32xf32, #tpu.memory_space<vmem>>, vector<64x32xf32>
    %c0_7 = arith.constant 0 : index
    %c0_8 = arith.constant 0 : index
    %7 = vector.load %arg4[%c0_7, %c0_8] : memref<16x128xf32, #tpu.memory_space<vmem>>, vector<16x128xf32>
    %8 = vector.extract_strided_slice %7 {offsets = [0, 0], sizes = [1, 32], strides = [1, 1]} : vector<16x128xf32> to vector<1x32xf32>
    %9 = vector.extract_strided_slice %7 {offsets = [1, 0], sizes = [1, 32], strides = [1, 1]} : vector<16x128xf32> to vector<1x32xf32>
    %10 = vector.extract_strided_slice %7 {offsets = [2, 0], sizes = [1, 96], strides = [1, 1]} : vector<16x128xf32> to vector<1x96xf32>
    %11 = vector.extract_strided_slice %7 {offsets = [3, 0], sizes = [1, 32], strides = [1, 1]} : vector<16x128xf32> to vector<1x32xf32>
    %12 = vector.extract_strided_slice %7 {offsets = [4, 0], sizes = [1, 32], strides = [1, 1]} : vector<16x128xf32> to vector<1x32xf32>
    %13 = vector.extract_strided_slice %7 {offsets = [5, 0], sizes = [1, 32], strides = [1, 1]} : vector<16x128xf32> to vector<1x32xf32>
    %14 = vector.extract_strided_slice %7 {offsets = [6, 0], sizes = [1, 96], strides = [1, 1]} : vector<16x128xf32> to vector<1x96xf32>
    %15 = vector.extract_strided_slice %7 {offsets = [7, 0], sizes = [1, 32], strides = [1, 1]} : vector<16x128xf32> to vector<1x32xf32>
    %16 = vector.extract_strided_slice %7 {offsets = [8, 0], sizes = [1, 32], strides = [1, 1]} : vector<16x128xf32> to vector<1x32xf32>
    %17 = vector.extract_strided_slice %7 {offsets = [9, 0], sizes = [1, 32], strides = [1, 1]} : vector<16x128xf32> to vector<1x32xf32>
    %18 = vector.extract_strided_slice %7 {offsets = [10, 0], sizes = [1, 64], strides = [1, 1]} : vector<16x128xf32> to vector<1x64xf32>
    %19 = vector.extract_strided_slice %7 {offsets = [11, 0], sizes = [1, 32], strides = [1, 1]} : vector<16x128xf32> to vector<1x32xf32>
    %c0_9 = arith.constant 0 : index
    %c0_10 = arith.constant 0 : index
    %c0_11 = arith.constant 0 : index
    %20 = vector.load %arg1[%c0_9, %c0_10, %c0_11] : memref<2x8x32xf32, #tpu.memory_space<vmem>>, vector<1x8x32xf32>
    %21 = vector.shape_cast %20 : vector<1x8x32xf32> to vector<8x32xf32>
    %c0_12 = arith.constant 0 : index
    %c0_13 = arith.constant 0 : index
    %c0_14 = arith.constant 0 : index
    %22 = vector.load %arg2[%c0_12, %c0_13, %c0_14] : memref<2x16x32xf32, #tpu.memory_space<vmem>>, vector<1x16x32xf32>
    %23 = vector.shape_cast %22 : vector<1x16x32xf32> to vector<16x32xf32>
    %cst = arith.constant dense<0.000000e+00> : vector<8xf32>
    %24 = vector.multi_reduction <add>, %21, %cst [1] : vector<8x32xf32> to vector<8xf32>
    %25 = vector.shape_cast %24 : vector<8xf32> to vector<8x1xf32>
    %cst_15 = arith.constant 3.200000e+01 : f32
    %26 = vector.broadcast %cst_15 : f32 to vector<8x1xf32>
    %27 = arith.divf %25, %26 : vector<8x1xf32>
    %28 = vector.broadcast %27 : vector<8x1xf32> to vector<8x32xf32>
    %29 = arith.subf %21, %28 : vector<8x32xf32>
    %30 = arith.mulf %29, %29 : vector<8x32xf32>
    %cst_16 = arith.constant dense<0.000000e+00> : vector<8xf32>
    %31 = vector.multi_reduction <add>, %30, %cst_16 [1] : vector<8x32xf32> to vector<8xf32>
    %32 = vector.shape_cast %31 : vector<8xf32> to vector<8x1xf32>
    %cst_17 = arith.constant 3.200000e+01 : f32
    %33 = vector.broadcast %cst_17 : f32 to vector<8x1xf32>
    %34 = arith.divf %32, %33 : vector<8x1xf32>
    %cst_18 = arith.constant 9.99999974E-6 : f32
    %35 = vector.broadcast %cst_18 : f32 to vector<8x1xf32>
    %36 = arith.addf %34, %35 : vector<8x1xf32>
    %37 = math.rsqrt %36 : vector<8x1xf32>
    %38 = vector.broadcast %37 : vector<8x1xf32> to vector<8x32xf32>
    %39 = arith.mulf %29, %38 : vector<8x32xf32>
    %40 = vector.broadcast %8 : vector<1x32xf32> to vector<8x32xf32>
    %41 = arith.mulf %39, %40 : vector<8x32xf32>
    %42 = vector.broadcast %9 : vector<1x32xf32> to vector<8x32xf32>
    %43 = arith.addf %41, %42 : vector<8x32xf32>
    "tpu.trace_start"() <{level = 10 : i32, message = "td,ed->te"}> : () -> ()
    %cst_19 = arith.constant dense<0.000000e+00> : vector<8x96xf32>
    %44 = tpu.matmul %43, %0, %cst_19 {dimension_numbers = #tpu.dot_dimension_numbers<[1], [1], [0], [0], [0, 0, 1, 0], [], []>} : vector<8x32xf32>, vector<96x32xf32>, vector<8x96xf32> -> vector<8x96xf32>
    "tpu.trace_stop"() : () -> ()
    %45 = vector.broadcast %10 : vector<1x96xf32> to vector<8x96xf32>
    %46 = arith.addf %44, %45 : vector<8x96xf32>
    %47 = vector.extract_strided_slice %46 {offsets = [0, 0], sizes = [8, 32], strides = [1, 1]} : vector<8x96xf32> to vector<8x32xf32>
    %48 = vector.extract_strided_slice %46 {offsets = [0, 32], sizes = [8, 32], strides = [1, 1]} : vector<8x96xf32> to vector<8x32xf32>
    %49 = vector.extract_strided_slice %46 {offsets = [0, 64], sizes = [8, 32], strides = [1, 1]} : vector<8x96xf32> to vector<8x32xf32>
    %cst_20 = arith.constant 0.000000e+00 : f32
    %50 = vector.broadcast %cst_20 : f32 to vector<8x32xf32>
    %cst_21 = arith.constant 0.000000e+00 : f32
    %51 = vector.broadcast %cst_21 : f32 to vector<8x8xf32>
    %52 = vector.extract_strided_slice %47 {offsets = [0, 0], sizes = [8, 8], strides = [1, 1]} : vector<8x32xf32> to vector<8x8xf32>
    %cst_22 = arith.constant 0.353553385 : f32
    %53 = vector.broadcast %cst_22 : f32 to vector<8x8xf32>
    %54 = arith.mulf %52, %53 : vector<8x8xf32>
    %55 = vector.extract_strided_slice %48 {offsets = [0, 0], sizes = [8, 8], strides = [1, 1]} : vector<8x32xf32> to vector<8x8xf32>
    "tpu.trace_start"() <{level = 10 : i32, message = "td,sd->ts"}> : () -> ()
    %cst_23 = arith.constant dense<0.000000e+00> : vector<8x8xf32>
    %56 = tpu.matmul %54, %55, %cst_23 {dimension_numbers = #tpu.dot_dimension_numbers<[1], [1], [0], [0], [0, 0, 1, 0], [], []>} : vector<8x8xf32>, vector<8x8xf32>, vector<8x8xf32> -> vector<8x8xf32>
    "tpu.trace_stop"() : () -> ()
    %cst_24 = arith.constant dense<0xFF800000> : vector<8xf32>
    %57 = vector.multi_reduction <maximumf>, %56, %cst_24 [1] : vector<8x8xf32> to vector<8xf32>
    %cst_25 = arith.constant 0xFF800000 : f32
    %58 = vector.broadcast %cst_25 : f32 to vector<8xf32>
    %59 = arith.maximumf %58, %57 : vector<8xf32>
    %60 = vector.shape_cast %59 : vector<8xf32> to vector<8x1xf32>
    %61 = vector.broadcast %60 : vector<8x1xf32> to vector<8x8xf32>
    %62 = arith.subf %56, %61 : vector<8x8xf32>
    %63 = math.exp %62 : vector<8x8xf32>
    %cst_26 = arith.constant dense<0.000000e+00> : vector<8xf32>
    %64 = vector.multi_reduction <add>, %63, %cst_26 [1] : vector<8x8xf32> to vector<8xf32>
    %65 = vector.shape_cast %64 : vector<8xf32> to vector<8x1xf32>
    %66 = vector.broadcast %65 : vector<8x1xf32> to vector<8x8xf32>
    %67 = arith.divf %63, %66 : vector<8x8xf32>
    %68 = arith.addf %51, %67 : vector<8x8xf32>
    %69 = vector.extract_strided_slice %49 {offsets = [0, 0], sizes = [8, 8], strides = [1, 1]} : vector<8x32xf32> to vector<8x8xf32>
    "tpu.trace_start"() <{level = 10 : i32, message = "ts,sd->td"}> : () -> ()
    %cst_27 = arith.constant dense<0.000000e+00> : vector<8x8xf32>
    %70 = tpu.matmul %67, %69, %cst_27 {dimension_numbers = #tpu.dot_dimension_numbers<[1], [0], [0], [1], [0, 0, 1, 1], [], []>} : vector<8x8xf32>, vector<8x8xf32>, vector<8x8xf32> -> vector<8x8xf32>
    "tpu.trace_stop"() : () -> ()
    %71 = vector.extract_strided_slice %1 {offsets = [0, 0], sizes = [8, 32], strides = [1, 1]} : vector<32x32xf32> to vector<8x32xf32>
    "tpu.trace_start"() <{level = 10 : i32, message = "tk,kd->td"}> : () -> ()
    %cst_28 = arith.constant dense<0.000000e+00> : vector<8x32xf32>
    %72 = tpu.matmul %70, %71, %cst_28 {dimension_numbers = #tpu.dot_dimension_numbers<[1], [0], [0], [1], [0, 0, 1, 1], [], []>} : vector<8x8xf32>, vector<8x32xf32>, vector<8x32xf32> -> vector<8x32xf32>
    "tpu.trace_stop"() : () -> ()
    %73 = arith.addf %50, %72 : vector<8x32xf32>
    %74 = vector.extract_strided_slice %47 {offsets = [0, 8], sizes = [8, 8], strides = [1, 1]} : vector<8x32xf32> to vector<8x8xf32>
    %cst_29 = arith.constant 0.353553385 : f32
    %75 = vector.broadcast %cst_29 : f32 to vector<8x8xf32>
    %76 = arith.mulf %74, %75 : vector<8x8xf32>
    %77 = vector.extract_strided_slice %48 {offsets = [0, 8], sizes = [8, 8], strides = [1, 1]} : vector<8x32xf32> to vector<8x8xf32>
    "tpu.trace_start"() <{level = 10 : i32, message = "td,sd->ts"}> : () -> ()
    %cst_30 = arith.constant dense<0.000000e+00> : vector<8x8xf32>
    %78 = tpu.matmul %76, %77, %cst_30 {dimension_numbers = #tpu.dot_dimension_numbers<[1], [1], [0], [0], [0, 0, 1, 0], [], []>} : vector<8x8xf32>, vector<8x8xf32>, vector<8x8xf32> -> vector<8x8xf32>
    "tpu.trace_stop"() : () -> ()
    %cst_31 = arith.constant dense<0xFF800000> : vector<8xf32>
    %79 = vector.multi_reduction <maximumf>, %78, %cst_31 [1] : vector<8x8xf32> to vector<8xf32>
    %cst_32 = arith.constant 0xFF800000 : f32
    %80 = vector.broadcast %cst_32 : f32 to vector<8xf32>
    %81 = arith.maximumf %80, %79 : vector<8xf32>
    %82 = vector.shape_cast %81 : vector<8xf32> to vector<8x1xf32>
    %83 = vector.broadcast %82 : vector<8x1xf32> to vector<8x8xf32>
    %84 = arith.subf %78, %83 : vector<8x8xf32>
    %85 = math.exp %84 : vector<8x8xf32>
    %cst_33 = arith.constant dense<0.000000e+00> : vector<8xf32>
    %86 = vector.multi_reduction <add>, %85, %cst_33 [1] : vector<8x8xf32> to vector<8xf32>
    %87 = vector.shape_cast %86 : vector<8xf32> to vector<8x1xf32>
    %88 = vector.broadcast %87 : vector<8x1xf32> to vector<8x8xf32>
    %89 = arith.divf %85, %88 : vector<8x8xf32>
    %90 = arith.addf %68, %89 : vector<8x8xf32>
    %91 = vector.extract_strided_slice %49 {offsets = [0, 8], sizes = [8, 8], strides = [1, 1]} : vector<8x32xf32> to vector<8x8xf32>
    "tpu.trace_start"() <{level = 10 : i32, message = "ts,sd->td"}> : () -> ()
    %cst_34 = arith.constant dense<0.000000e+00> : vector<8x8xf32>
    %92 = tpu.matmul %89, %91, %cst_34 {dimension_numbers = #tpu.dot_dimension_numbers<[1], [0], [0], [1], [0, 0, 1, 1], [], []>} : vector<8x8xf32>, vector<8x8xf32>, vector<8x8xf32> -> vector<8x8xf32>
    "tpu.trace_stop"() : () -> ()
    %93 = vector.extract_strided_slice %1 {offsets = [8, 0], sizes = [8, 32], strides = [1, 1]} : vector<32x32xf32> to vector<8x32xf32>
    "tpu.trace_start"() <{level = 10 : i32, message = "tk,kd->td"}> : () -> ()
    %cst_35 = arith.constant dense<0.000000e+00> : vector<8x32xf32>
    %94 = tpu.matmul %92, %93, %cst_35 {dimension_numbers = #tpu.dot_dimension_numbers<[1], [0], [0], [1], [0, 0, 1, 1], [], []>} : vector<8x8xf32>, vector<8x32xf32>, vector<8x32xf32> -> vector<8x32xf32>
    "tpu.trace_stop"() : () -> ()
    %95 = arith.addf %73, %94 : vector<8x32xf32>
    %96 = vector.extract_strided_slice %47 {offsets = [0, 16], sizes = [8, 8], strides = [1, 1]} : vector<8x32xf32> to vector<8x8xf32>
    %cst_36 = arith.constant 0.353553385 : f32
    %97 = vector.broadcast %cst_36 : f32 to vector<8x8xf32>
    %98 = arith.mulf %96, %97 : vector<8x8xf32>
    %99 = vector.extract_strided_slice %48 {offsets = [0, 16], sizes = [8, 8], strides = [1, 1]} : vector<8x32xf32> to vector<8x8xf32>
    "tpu.trace_start"() <{level = 10 : i32, message = "td,sd->ts"}> : () -> ()
    %cst_37 = arith.constant dense<0.000000e+00> : vector<8x8xf32>
    %100 = tpu.matmul %98, %99, %cst_37 {dimension_numbers = #tpu.dot_dimension_numbers<[1], [1], [0], [0], [0, 0, 1, 0], [], []>} : vector<8x8xf32>, vector<8x8xf32>, vector<8x8xf32> -> vector<8x8xf32>
    "tpu.trace_stop"() : () -> ()
    %cst_38 = arith.constant dense<0xFF800000> : vector<8xf32>
    %101 = vector.multi_reduction <maximumf>, %100, %cst_38 [1] : vector<8x8xf32> to vector<8xf32>
    %cst_39 = arith.constant 0xFF800000 : f32
    %102 = vector.broadcast %cst_39 : f32 to vector<8xf32>
    %103 = arith.maximumf %102, %101 : vector<8xf32>
    %104 = vector.shape_cast %103 : vector<8xf32> to vector<8x1xf32>
    %105 = vector.broadcast %104 : vector<8x1xf32> to vector<8x8xf32>
    %106 = arith.subf %100, %105 : vector<8x8xf32>
    %107 = math.exp %106 : vector<8x8xf32>
    %cst_40 = arith.constant dense<0.000000e+00> : vector<8xf32>
    %108 = vector.multi_reduction <add>, %107, %cst_40 [1] : vector<8x8xf32> to vector<8xf32>
    %109 = vector.shape_cast %108 : vector<8xf32> to vector<8x1xf32>
    %110 = vector.broadcast %109 : vector<8x1xf32> to vector<8x8xf32>
    %111 = arith.divf %107, %110 : vector<8x8xf32>
    %112 = arith.addf %90, %111 : vector<8x8xf32>
    %113 = vector.extract_strided_slice %49 {offsets = [0, 16], sizes = [8, 8], strides = [1, 1]} : vector<8x32xf32> to vector<8x8xf32>
    "tpu.trace_start"() <{level = 10 : i32, message = "ts,sd->td"}> : () -> ()
    %cst_41 = arith.constant dense<0.000000e+00> : vector<8x8xf32>
    %114 = tpu.matmul %111, %113, %cst_41 {dimension_numbers = #tpu.dot_dimension_numbers<[1], [0], [0], [1], [0, 0, 1, 1], [], []>} : vector<8x8xf32>, vector<8x8xf32>, vector<8x8xf32> -> vector<8x8xf32>
    "tpu.trace_stop"() : () -> ()
    %115 = vector.extract_strided_slice %1 {offsets = [16, 0], sizes = [8, 32], strides = [1, 1]} : vector<32x32xf32> to vector<8x32xf32>
    "tpu.trace_start"() <{level = 10 : i32, message = "tk,kd->td"}> : () -> ()
    %cst_42 = arith.constant dense<0.000000e+00> : vector<8x32xf32>
    %116 = tpu.matmul %114, %115, %cst_42 {dimension_numbers = #tpu.dot_dimension_numbers<[1], [0], [0], [1], [0, 0, 1, 1], [], []>} : vector<8x8xf32>, vector<8x32xf32>, vector<8x32xf32> -> vector<8x32xf32>
    "tpu.trace_stop"() : () -> ()
    %117 = arith.addf %95, %116 : vector<8x32xf32>
    %118 = vector.extract_strided_slice %47 {offsets = [0, 24], sizes = [8, 8], strides = [1, 1]} : vector<8x32xf32> to vector<8x8xf32>
    %cst_43 = arith.constant 0.353553385 : f32
    %119 = vector.broadcast %cst_43 : f32 to vector<8x8xf32>
    %120 = arith.mulf %118, %119 : vector<8x8xf32>
    %121 = vector.extract_strided_slice %48 {offsets = [0, 24], sizes = [8, 8], strides = [1, 1]} : vector<8x32xf32> to vector<8x8xf32>
    "tpu.trace_start"() <{level = 10 : i32, message = "td,sd->ts"}> : () -> ()
    %cst_44 = arith.constant dense<0.000000e+00> : vector<8x8xf32>
    %122 = tpu.matmul %120, %121, %cst_44 {dimension_numbers = #tpu.dot_dimension_numbers<[1], [1], [0], [0], [0, 0, 1, 0], [], []>} : vector<8x8xf32>, vector<8x8xf32>, vector<8x8xf32> -> vector<8x8xf32>
    "tpu.trace_stop"() : () -> ()
    %cst_45 = arith.constant dense<0xFF800000> : vector<8xf32>
    %123 = vector.multi_reduction <maximumf>, %122, %cst_45 [1] : vector<8x8xf32> to vector<8xf32>
    %cst_46 = arith.constant 0xFF800000 : f32
    %124 = vector.broadcast %cst_46 : f32 to vector<8xf32>
    %125 = arith.maximumf %124, %123 : vector<8xf32>
    %126 = vector.shape_cast %125 : vector<8xf32> to vector<8x1xf32>
    %127 = vector.broadcast %126 : vector<8x1xf32> to vector<8x8xf32>
    %128 = arith.subf %122, %127 : vector<8x8xf32>
    %129 = math.exp %128 : vector<8x8xf32>
    %cst_47 = arith.constant dense<0.000000e+00> : vector<8xf32>
    %130 = vector.multi_reduction <add>, %129, %cst_47 [1] : vector<8x8xf32> to vector<8xf32>
    %131 = vector.shape_cast %130 : vector<8xf32> to vector<8x1xf32>
    %132 = vector.broadcast %131 : vector<8x1xf32> to vector<8x8xf32>
    %133 = arith.divf %129, %132 : vector<8x8xf32>
    %134 = arith.addf %112, %133 : vector<8x8xf32>
    %135 = vector.extract_strided_slice %49 {offsets = [0, 24], sizes = [8, 8], strides = [1, 1]} : vector<8x32xf32> to vector<8x8xf32>
    "tpu.trace_start"() <{level = 10 : i32, message = "ts,sd->td"}> : () -> ()
    %cst_48 = arith.constant dense<0.000000e+00> : vector<8x8xf32>
    %136 = tpu.matmul %133, %135, %cst_48 {dimension_numbers = #tpu.dot_dimension_numbers<[1], [0], [0], [1], [0, 0, 1, 1], [], []>} : vector<8x8xf32>, vector<8x8xf32>, vector<8x8xf32> -> vector<8x8xf32>
    "tpu.trace_stop"() : () -> ()
    %137 = vector.extract_strided_slice %1 {offsets = [24, 0], sizes = [8, 32], strides = [1, 1]} : vector<32x32xf32> to vector<8x32xf32>
    "tpu.trace_start"() <{level = 10 : i32, message = "tk,kd->td"}> : () -> ()
    %cst_49 = arith.constant dense<0.000000e+00> : vector<8x32xf32>
    %138 = tpu.matmul %136, %137, %cst_49 {dimension_numbers = #tpu.dot_dimension_numbers<[1], [0], [0], [1], [0, 0, 1, 1], [], []>} : vector<8x8xf32>, vector<8x32xf32>, vector<8x32xf32> -> vector<8x32xf32>
    "tpu.trace_stop"() : () -> ()
    %139 = arith.addf %117, %138 : vector<8x32xf32>
    %140 = vector.broadcast %11 : vector<1x32xf32> to vector<8x32xf32>
    %141 = arith.addf %139, %140 : vector<8x32xf32>
    %cst_50 = arith.constant 2.500000e-01 : f32
    %142 = vector.broadcast %cst_50 : f32 to vector<8x8xf32>
    %143 = arith.mulf %134, %142 : vector<8x8xf32>
    %144 = arith.addf %21, %141 : vector<8x32xf32>
    %cst_51 = arith.constant dense<0.000000e+00> : vector<8xf32>
    %145 = vector.multi_reduction <add>, %144, %cst_51 [1] : vector<8x32xf32> to vector<8xf32>
    %146 = vector.shape_cast %145 : vector<8xf32> to vector<8x1xf32>
    %cst_52 = arith.constant 3.200000e+01 : f32
    %147 = vector.broadcast %cst_52 : f32 to vector<8x1xf32>
    %148 = arith.divf %146, %147 : vector<8x1xf32>
    %149 = vector.broadcast %148 : vector<8x1xf32> to vector<8x32xf32>
    %150 = arith.subf %144, %149 : vector<8x32xf32>
    %151 = arith.mulf %150, %150 : vector<8x32xf32>
    %cst_53 = arith.constant dense<0.000000e+00> : vector<8xf32>
    %152 = vector.multi_reduction <add>, %151, %cst_53 [1] : vector<8x32xf32> to vector<8xf32>
    %153 = vector.shape_cast %152 : vector<8xf32> to vector<8x1xf32>
    %cst_54 = arith.constant 3.200000e+01 : f32
    %154 = vector.broadcast %cst_54 : f32 to vector<8x1xf32>
    %155 = arith.divf %153, %154 : vector<8x1xf32>
    %cst_55 = arith.constant 9.99999974E-6 : f32
    %156 = vector.broadcast %cst_55 : f32 to vector<8x1xf32>
    %157 = arith.addf %155, %156 : vector<8x1xf32>
    %158 = math.rsqrt %157 : vector<8x1xf32>
    %159 = vector.broadcast %158 : vector<8x1xf32> to vector<8x32xf32>
    %160 = arith.mulf %150, %159 : vector<8x32xf32>
    %161 = vector.broadcast %12 : vector<1x32xf32> to vector<8x32xf32>
    %162 = arith.mulf %160, %161 : vector<8x32xf32>
    %163 = vector.broadcast %13 : vector<1x32xf32> to vector<8x32xf32>
    %164 = arith.addf %162, %163 : vector<8x32xf32>
    "tpu.trace_start"() <{level = 10 : i32, message = "td,ed->te"}> : () -> ()
    %cst_56 = arith.constant dense<0.000000e+00> : vector<8x32xf32>
    %165 = tpu.matmul %164, %2, %cst_56 {dimension_numbers = #tpu.dot_dimension_numbers<[1], [1], [0], [0], [0, 0, 1, 0], [], []>} : vector<8x32xf32>, vector<32x32xf32>, vector<8x32xf32> -> vector<8x32xf32>
    "tpu.trace_stop"() : () -> ()
    %166 = vector.extract_strided_slice %14 {offsets = [0, 0], sizes = [1, 32], strides = [1, 1]} : vector<1x96xf32> to vector<1x32xf32>
    %167 = vector.broadcast %166 : vector<1x32xf32> to vector<8x32xf32>
    %168 = arith.addf %165, %167 : vector<8x32xf32>
    "tpu.trace_start"() <{level = 10 : i32, message = "sd,ed->se"}> : () -> ()
    %cst_57 = arith.constant dense<0.000000e+00> : vector<16x64xf32>
    %169 = tpu.matmul %23, %3, %cst_57 {dimension_numbers = #tpu.dot_dimension_numbers<[1], [1], [0], [0], [0, 0, 1, 0], [], []>} : vector<16x32xf32>, vector<64x32xf32>, vector<16x64xf32> -> vector<16x64xf32>
    "tpu.trace_stop"() : () -> ()
    %170 = vector.extract_strided_slice %14 {offsets = [0, 32], sizes = [1, 64], strides = [1, 1]} : vector<1x96xf32> to vector<1x64xf32>
    %171 = vector.broadcast %170 : vector<1x64xf32> to vector<16x64xf32>
    %172 = arith.addf %169, %171 : vector<16x64xf32>
    %173 = vector.extract_strided_slice %172 {offsets = [0, 0], sizes = [16, 32], strides = [1, 1]} : vector<16x64xf32> to vector<16x32xf32>
    %174 = vector.extract_strided_slice %172 {offsets = [0, 32], sizes = [16, 32], strides = [1, 1]} : vector<16x64xf32> to vector<16x32xf32>
    %cst_58 = arith.constant 0.000000e+00 : f32
    %175 = vector.broadcast %cst_58 : f32 to vector<8x32xf32>
    %cst_59 = arith.constant 0.000000e+00 : f32
    %176 = vector.broadcast %cst_59 : f32 to vector<8x16xf32>
    %177 = vector.extract_strided_slice %168 {offsets = [0, 0], sizes = [8, 8], strides = [1, 1]} : vector<8x32xf32> to vector<8x8xf32>
    %cst_60 = arith.constant 0.353553385 : f32
    %178 = vector.broadcast %cst_60 : f32 to vector<8x8xf32>
    %179 = arith.mulf %177, %178 : vector<8x8xf32>
    %180 = vector.extract_strided_slice %173 {offsets = [0, 0], sizes = [16, 8], strides = [1, 1]} : vector<16x32xf32> to vector<16x8xf32>
    "tpu.trace_start"() <{level = 10 : i32, message = "td,sd->ts"}> : () -> ()
    %cst_61 = arith.constant dense<0.000000e+00> : vector<8x16xf32>
    %181 = tpu.matmul %179, %180, %cst_61 {dimension_numbers = #tpu.dot_dimension_numbers<[1], [1], [0], [0], [0, 0, 1, 0], [], []>} : vector<8x8xf32>, vector<16x8xf32>, vector<8x16xf32> -> vector<8x16xf32>
    "tpu.trace_stop"() : () -> ()
    %cst_62 = arith.constant dense<0xFF800000> : vector<8xf32>
    %182 = vector.multi_reduction <maximumf>, %181, %cst_62 [1] : vector<8x16xf32> to vector<8xf32>
    %cst_63 = arith.constant 0xFF800000 : f32
    %183 = vector.broadcast %cst_63 : f32 to vector<8xf32>
    %184 = arith.maximumf %183, %182 : vector<8xf32>
    %185 = vector.shape_cast %184 : vector<8xf32> to vector<8x1xf32>
    %186 = vector.broadcast %185 : vector<8x1xf32> to vector<8x16xf32>
    %187 = arith.subf %181, %186 : vector<8x16xf32>
    %188 = math.exp %187 : vector<8x16xf32>
    %cst_64 = arith.constant dense<0.000000e+00> : vector<8xf32>
    %189 = vector.multi_reduction <add>, %188, %cst_64 [1] : vector<8x16xf32> to vector<8xf32>
    %190 = vector.shape_cast %189 : vector<8xf32> to vector<8x1xf32>
    %191 = vector.broadcast %190 : vector<8x1xf32> to vector<8x16xf32>
    %192 = arith.divf %188, %191 : vector<8x16xf32>
    %193 = arith.addf %176, %192 : vector<8x16xf32>
    %194 = vector.extract_strided_slice %174 {offsets = [0, 0], sizes = [16, 8], strides = [1, 1]} : vector<16x32xf32> to vector<16x8xf32>
    "tpu.trace_start"() <{level = 10 : i32, message = "ts,sd->td"}> : () -> ()
    %cst_65 = arith.constant dense<0.000000e+00> : vector<8x8xf32>
    %195 = tpu.matmul %192, %194, %cst_65 {dimension_numbers = #tpu.dot_dimension_numbers<[1], [0], [0], [1], [0, 0, 1, 1], [], []>} : vector<8x16xf32>, vector<16x8xf32>, vector<8x8xf32> -> vector<8x8xf32>
    "tpu.trace_stop"() : () -> ()
    %196 = vector.extract_strided_slice %4 {offsets = [0, 0], sizes = [8, 32], strides = [1, 1]} : vector<32x32xf32> to vector<8x32xf32>
    "tpu.trace_start"() <{level = 10 : i32, message = "tk,kd->td"}> : () -> ()
    %cst_66 = arith.constant dense<0.000000e+00> : vector<8x32xf32>
    %197 = tpu.matmul %195, %196, %cst_66 {dimension_numbers = #tpu.dot_dimension_numbers<[1], [0], [0], [1], [0, 0, 1, 1], [], []>} : vector<8x8xf32>, vector<8x32xf32>, vector<8x32xf32> -> vector<8x32xf32>
    "tpu.trace_stop"() : () -> ()
    %198 = arith.addf %175, %197 : vector<8x32xf32>
    %199 = vector.extract_strided_slice %168 {offsets = [0, 8], sizes = [8, 8], strides = [1, 1]} : vector<8x32xf32> to vector<8x8xf32>
    %cst_67 = arith.constant 0.353553385 : f32
    %200 = vector.broadcast %cst_67 : f32 to vector<8x8xf32>
    %201 = arith.mulf %199, %200 : vector<8x8xf32>
    %202 = vector.extract_strided_slice %173 {offsets = [0, 8], sizes = [16, 8], strides = [1, 1]} : vector<16x32xf32> to vector<16x8xf32>
    "tpu.trace_start"() <{level = 10 : i32, message = "td,sd->ts"}> : () -> ()
    %cst_68 = arith.constant dense<0.000000e+00> : vector<8x16xf32>
    %203 = tpu.matmul %201, %202, %cst_68 {dimension_numbers = #tpu.dot_dimension_numbers<[1], [1], [0], [0], [0, 0, 1, 0], [], []>} : vector<8x8xf32>, vector<16x8xf32>, vector<8x16xf32> -> vector<8x16xf32>
    "tpu.trace_stop"() : () -> ()
    %cst_69 = arith.constant dense<0xFF800000> : vector<8xf32>
    %204 = vector.multi_reduction <maximumf>, %203, %cst_69 [1] : vector<8x16xf32> to vector<8xf32>
    %cst_70 = arith.constant 0xFF800000 : f32
    %205 = vector.broadcast %cst_70 : f32 to vector<8xf32>
    %206 = arith.maximumf %205, %204 : vector<8xf32>
    %207 = vector.shape_cast %206 : vector<8xf32> to vector<8x1xf32>
    %208 = vector.broadcast %207 : vector<8x1xf32> to vector<8x16xf32>
    %209 = arith.subf %203, %208 : vector<8x16xf32>
    %210 = math.exp %209 : vector<8x16xf32>
    %cst_71 = arith.constant dense<0.000000e+00> : vector<8xf32>
    %211 = vector.multi_reduction <add>, %210, %cst_71 [1] : vector<8x16xf32> to vector<8xf32>
    %212 = vector.shape_cast %211 : vector<8xf32> to vector<8x1xf32>
    %213 = vector.broadcast %212 : vector<8x1xf32> to vector<8x16xf32>
    %214 = arith.divf %210, %213 : vector<8x16xf32>
    %215 = arith.addf %193, %214 : vector<8x16xf32>
    %216 = vector.extract_strided_slice %174 {offsets = [0, 8], sizes = [16, 8], strides = [1, 1]} : vector<16x32xf32> to vector<16x8xf32>
    "tpu.trace_start"() <{level = 10 : i32, message = "ts,sd->td"}> : () -> ()
    %cst_72 = arith.constant dense<0.000000e+00> : vector<8x8xf32>
    %217 = tpu.matmul %214, %216, %cst_72 {dimension_numbers = #tpu.dot_dimension_numbers<[1], [0], [0], [1], [0, 0, 1, 1], [], []>} : vector<8x16xf32>, vector<16x8xf32>, vector<8x8xf32> -> vector<8x8xf32>
    "tpu.trace_stop"() : () -> ()
    %218 = vector.extract_strided_slice %4 {offsets = [8, 0], sizes = [8, 32], strides = [1, 1]} : vector<32x32xf32> to vector<8x32xf32>
    "tpu.trace_start"() <{level = 10 : i32, message = "tk,kd->td"}> : () -> ()
    %cst_73 = arith.constant dense<0.000000e+00> : vector<8x32xf32>
    %219 = tpu.matmul %217, %218, %cst_73 {dimension_numbers = #tpu.dot_dimension_numbers<[1], [0], [0], [1], [0, 0, 1, 1], [], []>} : vector<8x8xf32>, vector<8x32xf32>, vector<8x32xf32> -> vector<8x32xf32>
    "tpu.trace_stop"() : () -> ()
    %220 = arith.addf %198, %219 : vector<8x32xf32>
    %221 = vector.extract_strided_slice %168 {offsets = [0, 16], sizes = [8, 8], strides = [1, 1]} : vector<8x32xf32> to vector<8x8xf32>
    %cst_74 = arith.constant 0.353553385 : f32
    %222 = vector.broadcast %cst_74 : f32 to vector<8x8xf32>
    %223 = arith.mulf %221, %222 : vector<8x8xf32>
    %224 = vector.extract_strided_slice %173 {offsets = [0, 16], sizes = [16, 8], strides = [1, 1]} : vector<16x32xf32> to vector<16x8xf32>
    "tpu.trace_start"() <{level = 10 : i32, message = "td,sd->ts"}> : () -> ()
    %cst_75 = arith.constant dense<0.000000e+00> : vector<8x16xf32>
    %225 = tpu.matmul %223, %224, %cst_75 {dimension_numbers = #tpu.dot_dimension_numbers<[1], [1], [0], [0], [0, 0, 1, 0], [], []>} : vector<8x8xf32>, vector<16x8xf32>, vector<8x16xf32> -> vector<8x16xf32>
    "tpu.trace_stop"() : () -> ()
    %cst_76 = arith.constant dense<0xFF800000> : vector<8xf32>
    %226 = vector.multi_reduction <maximumf>, %225, %cst_76 [1] : vector<8x16xf32> to vector<8xf32>
    %cst_77 = arith.constant 0xFF800000 : f32
    %227 = vector.broadcast %cst_77 : f32 to vector<8xf32>
    %228 = arith.maximumf %227, %226 : vector<8xf32>
    %229 = vector.shape_cast %228 : vector<8xf32> to vector<8x1xf32>
    %230 = vector.broadcast %229 : vector<8x1xf32> to vector<8x16xf32>
    %231 = arith.subf %225, %230 : vector<8x16xf32>
    %232 = math.exp %231 : vector<8x16xf32>
    %cst_78 = arith.constant dense<0.000000e+00> : vector<8xf32>
    %233 = vector.multi_reduction <add>, %232, %cst_78 [1] : vector<8x16xf32> to vector<8xf32>
    %234 = vector.shape_cast %233 : vector<8xf32> to vector<8x1xf32>
    %235 = vector.broadcast %234 : vector<8x1xf32> to vector<8x16xf32>
    %236 = arith.divf %232, %235 : vector<8x16xf32>
    %237 = arith.addf %215, %236 : vector<8x16xf32>
    %238 = vector.extract_strided_slice %174 {offsets = [0, 16], sizes = [16, 8], strides = [1, 1]} : vector<16x32xf32> to vector<16x8xf32>
    "tpu.trace_start"() <{level = 10 : i32, message = "ts,sd->td"}> : () -> ()
    %cst_79 = arith.constant dense<0.000000e+00> : vector<8x8xf32>
    %239 = tpu.matmul %236, %238, %cst_79 {dimension_numbers = #tpu.dot_dimension_numbers<[1], [0], [0], [1], [0, 0, 1, 1], [], []>} : vector<8x16xf32>, vector<16x8xf32>, vector<8x8xf32> -> vector<8x8xf32>
    "tpu.trace_stop"() : () -> ()
    %240 = vector.extract_strided_slice %4 {offsets = [16, 0], sizes = [8, 32], strides = [1, 1]} : vector<32x32xf32> to vector<8x32xf32>
    "tpu.trace_start"() <{level = 10 : i32, message = "tk,kd->td"}> : () -> ()
    %cst_80 = arith.constant dense<0.000000e+00> : vector<8x32xf32>
    %241 = tpu.matmul %239, %240, %cst_80 {dimension_numbers = #tpu.dot_dimension_numbers<[1], [0], [0], [1], [0, 0, 1, 1], [], []>} : vector<8x8xf32>, vector<8x32xf32>, vector<8x32xf32> -> vector<8x32xf32>
    "tpu.trace_stop"() : () -> ()
    %242 = arith.addf %220, %241 : vector<8x32xf32>
    %243 = vector.extract_strided_slice %168 {offsets = [0, 24], sizes = [8, 8], strides = [1, 1]} : vector<8x32xf32> to vector<8x8xf32>
    %cst_81 = arith.constant 0.353553385 : f32
    %244 = vector.broadcast %cst_81 : f32 to vector<8x8xf32>
    %245 = arith.mulf %243, %244 : vector<8x8xf32>
    %246 = vector.extract_strided_slice %173 {offsets = [0, 24], sizes = [16, 8], strides = [1, 1]} : vector<16x32xf32> to vector<16x8xf32>
    "tpu.trace_start"() <{level = 10 : i32, message = "td,sd->ts"}> : () -> ()
    %cst_82 = arith.constant dense<0.000000e+00> : vector<8x16xf32>
    %247 = tpu.matmul %245, %246, %cst_82 {dimension_numbers = #tpu.dot_dimension_numbers<[1], [1], [0], [0], [0, 0, 1, 0], [], []>} : vector<8x8xf32>, vector<16x8xf32>, vector<8x16xf32> -> vector<8x16xf32>
    "tpu.trace_stop"() : () -> ()
    %cst_83 = arith.constant dense<0xFF800000> : vector<8xf32>
    %248 = vector.multi_reduction <maximumf>, %247, %cst_83 [1] : vector<8x16xf32> to vector<8xf32>
    %cst_84 = arith.constant 0xFF800000 : f32
    %249 = vector.broadcast %cst_84 : f32 to vector<8xf32>
    %250 = arith.maximumf %249, %248 : vector<8xf32>
    %251 = vector.shape_cast %250 : vector<8xf32> to vector<8x1xf32>
    %252 = vector.broadcast %251 : vector<8x1xf32> to vector<8x16xf32>
    %253 = arith.subf %247, %252 : vector<8x16xf32>
    %254 = math.exp %253 : vector<8x16xf32>
    %cst_85 = arith.constant dense<0.000000e+00> : vector<8xf32>
    %255 = vector.multi_reduction <add>, %254, %cst_85 [1] : vector<8x16xf32> to vector<8xf32>
    %256 = vector.shape_cast %255 : vector<8xf32> to vector<8x1xf32>
    %257 = vector.broadcast %256 : vector<8x1xf32> to vector<8x16xf32>
    %258 = arith.divf %254, %257 : vector<8x16xf32>
    %259 = arith.addf %237, %258 : vector<8x16xf32>
    %260 = vector.extract_strided_slice %174 {offsets = [0, 24], sizes = [16, 8], strides = [1, 1]} : vector<16x32xf32> to vector<16x8xf32>
    "tpu.trace_start"() <{level = 10 : i32, message = "ts,sd->td"}> : () -> ()
    %cst_86 = arith.constant dense<0.000000e+00> : vector<8x8xf32>
    %261 = tpu.matmul %258, %260, %cst_86 {dimension_numbers = #tpu.dot_dimension_numbers<[1], [0], [0], [1], [0, 0, 1, 1], [], []>} : vector<8x16xf32>, vector<16x8xf32>, vector<8x8xf32> -> vector<8x8xf32>
    "tpu.trace_stop"() : () -> ()
    %262 = vector.extract_strided_slice %4 {offsets = [24, 0], sizes = [8, 32], strides = [1, 1]} : vector<32x32xf32> to vector<8x32xf32>
    "tpu.trace_start"() <{level = 10 : i32, message = "tk,kd->td"}> : () -> ()
    %cst_87 = arith.constant dense<0.000000e+00> : vector<8x32xf32>
    %263 = tpu.matmul %261, %262, %cst_87 {dimension_numbers = #tpu.dot_dimension_numbers<[1], [0], [0], [1], [0, 0, 1, 1], [], []>} : vector<8x8xf32>, vector<8x32xf32>, vector<8x32xf32> -> vector<8x32xf32>
    "tpu.trace_stop"() : () -> ()
    %264 = arith.addf %242, %263 : vector<8x32xf32>
    %265 = vector.broadcast %15 : vector<1x32xf32> to vector<8x32xf32>
    %266 = arith.addf %264, %265 : vector<8x32xf32>
    %cst_88 = arith.constant 2.500000e-01 : f32
    %267 = vector.broadcast %cst_88 : f32 to vector<8x16xf32>
    %268 = arith.mulf %259, %267 : vector<8x16xf32>
    %269 = arith.addf %144, %266 : vector<8x32xf32>
    %cst_89 = arith.constant dense<0.000000e+00> : vector<8xf32>
    %270 = vector.multi_reduction <add>, %269, %cst_89 [1] : vector<8x32xf32> to vector<8xf32>
    %271 = vector.shape_cast %270 : vector<8xf32> to vector<8x1xf32>
    %cst_90 = arith.constant 3.200000e+01 : f32
    %272 = vector.broadcast %cst_90 : f32 to vector<8x1xf32>
    %273 = arith.divf %271, %272 : vector<8x1xf32>
    %274 = vector.broadcast %273 : vector<8x1xf32> to vector<8x32xf32>
    %275 = arith.subf %269, %274 : vector<8x32xf32>
    %276 = arith.mulf %275, %275 : vector<8x32xf32>
    %cst_91 = arith.constant dense<0.000000e+00> : vector<8xf32>
    %277 = vector.multi_reduction <add>, %276, %cst_91 [1] : vector<8x32xf32> to vector<8xf32>
    %278 = vector.shape_cast %277 : vector<8xf32> to vector<8x1xf32>
    %cst_92 = arith.constant 3.200000e+01 : f32
    %279 = vector.broadcast %cst_92 : f32 to vector<8x1xf32>
    %280 = arith.divf %278, %279 : vector<8x1xf32>
    %cst_93 = arith.constant 9.99999974E-6 : f32
    %281 = vector.broadcast %cst_93 : f32 to vector<8x1xf32>
    %282 = arith.addf %280, %281 : vector<8x1xf32>
    %283 = math.rsqrt %282 : vector<8x1xf32>
    %284 = vector.broadcast %283 : vector<8x1xf32> to vector<8x32xf32>
    %285 = arith.mulf %275, %284 : vector<8x32xf32>
    %286 = vector.broadcast %16 : vector<1x32xf32> to vector<8x32xf32>
    %287 = arith.mulf %285, %286 : vector<8x32xf32>
    %288 = vector.broadcast %17 : vector<1x32xf32> to vector<8x32xf32>
    %289 = arith.addf %287, %288 : vector<8x32xf32>
    "tpu.trace_start"() <{level = 10 : i32, message = "td,fd->tf"}> : () -> ()
    %cst_94 = arith.constant dense<0.000000e+00> : vector<8x64xf32>
    %290 = tpu.matmul %289, %5, %cst_94 {dimension_numbers = #tpu.dot_dimension_numbers<[1], [1], [0], [0], [0, 0, 1, 0], [], []>} : vector<8x32xf32>, vector<64x32xf32>, vector<8x64xf32> -> vector<8x64xf32>
    "tpu.trace_stop"() : () -> ()
    %291 = vector.broadcast %18 : vector<1x64xf32> to vector<8x64xf32>
    %292 = arith.addf %290, %291 : vector<8x64xf32>
    %cst_95 = arith.constant 5.000000e-01 : f32
    %293 = vector.broadcast %cst_95 : f32 to vector<8x64xf32>
    %294 = arith.mulf %293, %292 : vector<8x64xf32>
    %cst_96 = arith.constant 0.707106769 : f32
    %295 = vector.broadcast %cst_96 : f32 to vector<8x64xf32>
    %296 = arith.mulf %292, %295 : vector<8x64xf32>
    %297 = math.erf %296 : vector<8x64xf32>
    %cst_97 = arith.constant 1.000000e+00 : f32
    %298 = vector.broadcast %cst_97 : f32 to vector<8x64xf32>
    %299 = arith.addf %298, %297 : vector<8x64xf32>
    %300 = arith.mulf %294, %299 : vector<8x64xf32>
    "tpu.trace_start"() <{level = 10 : i32, message = "tf,fd->td"}> : () -> ()
    %cst_98 = arith.constant dense<0.000000e+00> : vector<8x32xf32>
    %301 = tpu.matmul %300, %6, %cst_98 {dimension_numbers = #tpu.dot_dimension_numbers<[1], [0], [0], [1], [0, 0, 1, 1], [], []>} : vector<8x64xf32>, vector<64x32xf32>, vector<8x32xf32> -> vector<8x32xf32>
    "tpu.trace_stop"() : () -> ()
    %302 = vector.broadcast %19 : vector<1x32xf32> to vector<8x32xf32>
    %303 = arith.addf %301, %302 : vector<8x32xf32>
    %304 = arith.addf %269, %303 : vector<8x32xf32>
    %c0_99 = arith.constant 0 : index
    %c0_100 = arith.constant 0 : index
    %c0_101 = arith.constant 0 : index
    %305 = vector.load %arg5[%c0_99, %c0_100, %c0_101] : memref<2x8x32xf32, #tpu.memory_space<vmem>>, vector<1x8x32xf32>
    %306 = vector.shape_cast %305 : vector<1x8x32xf32> to vector<8x32xf32>
    %307 = vector.shape_cast %304 : vector<8x32xf32> to vector<1x8x32xf32>
    tpu.vector_store %arg5[%c0_99, %c0_100, %c0_101], %307 {strides = array<i32>} : memref<2x8x32xf32, #tpu.memory_space<vmem>>, vector<1x8x32xf32>,
    %c0_102 = arith.constant 0 : index
    %c0_103 = arith.constant 0 : index
    %c0_104 = arith.constant 0 : index
    %308 = vector.load %arg6[%c0_102, %c0_103, %c0_104] : memref<2x8x8xf32, #tpu.memory_space<vmem>>, vector<1x8x8xf32>
    %309 = vector.shape_cast %308 : vector<1x8x8xf32> to vector<8x8xf32>
    %310 = vector.shape_cast %143 : vector<8x8xf32> to vector<1x8x8xf32>
    tpu.vector_store %arg6[%c0_102, %c0_103, %c0_104], %310 {strides = array<i32>} : memref<2x8x8xf32, #tpu.memory_space<vmem>>, vector<1x8x8xf32>,
    %c0_105 = arith.constant 0 : index
    %c0_106 = arith.constant 0 : index
    %c0_107 = arith.constant 0 : index
    %311 = vector.load %arg7[%c0_105, %c0_106, %c0_107] : memref<2x8x16xf32, #tpu.memory_space<vmem>>, vector<1x8x16xf32>
    %312 = vector.shape_cast %311 : vector<1x8x16xf32> to vector<8x16xf32>
    %313 = vector.shape_cast %268 : vector<8x16xf32> to vector<1x8x16xf32>
    tpu.vector_store %arg7[%c0_105, %c0_106, %c0_107], %313 {strides = array<i32>} : memref<2x8x16xf32, #tpu.memory_space<vmem>>, vector<1x8x16xf32>,
    %c1 = arith.constant 1 : index
    %c0_108 = arith.constant 0 : index
    %c0_109 = arith.constant 0 : index
    %314 = vector.load %arg1[%c1, %c0_108, %c0_109] : memref<2x8x32xf32, #tpu.memory_space<vmem>>, vector<1x8x32xf32>
    %315 = vector.shape_cast %314 : vector<1x8x32xf32> to vector<8x32xf32>
    %c1_110 = arith.constant 1 : index
    %c0_111 = arith.constant 0 : index
    %c0_112 = arith.constant 0 : index
    %316 = vector.load %arg2[%c1_110, %c0_111, %c0_112] : memref<2x16x32xf32, #tpu.memory_space<vmem>>, vector<1x16x32xf32>
    %317 = vector.shape_cast %316 : vector<1x16x32xf32> to vector<16x32xf32>
    %cst_113 = arith.constant dense<0.000000e+00> : vector<8xf32>
    %318 = vector.multi_reduction <add>, %315, %cst_113 [1] : vector<8x32xf32> to vector<8xf32>
    %319 = vector.shape_cast %318 : vector<8xf32> to vector<8x1xf32>
    %cst_114 = arith.constant 3.200000e+01 : f32
    %320 = vector.broadcast %cst_114 : f32 to vector<8x1xf32>
    %321 = arith.divf %319, %320 : vector<8x1xf32>
    %322 = vector.broadcast %321 : vector<8x1xf32> to vector<8x32xf32>
    %323 = arith.subf %315, %322 : vector<8x32xf32>
    %324 = arith.mulf %323, %323 : vector<8x32xf32>
    %cst_115 = arith.constant dense<0.000000e+00> : vector<8xf32>
    %325 = vector.multi_reduction <add>, %324, %cst_115 [1] : vector<8x32xf32> to vector<8xf32>
    %326 = vector.shape_cast %325 : vector<8xf32> to vector<8x1xf32>
    %cst_116 = arith.constant 3.200000e+01 : f32
    %327 = vector.broadcast %cst_116 : f32 to vector<8x1xf32>
    %328 = arith.divf %326, %327 : vector<8x1xf32>
    %cst_117 = arith.constant 9.99999974E-6 : f32
    %329 = vector.broadcast %cst_117 : f32 to vector<8x1xf32>
    %330 = arith.addf %328, %329 : vector<8x1xf32>
    %331 = math.rsqrt %330 : vector<8x1xf32>
    %332 = vector.broadcast %331 : vector<8x1xf32> to vector<8x32xf32>
    %333 = arith.mulf %323, %332 : vector<8x32xf32>
    %334 = vector.broadcast %8 : vector<1x32xf32> to vector<8x32xf32>
    %335 = arith.mulf %333, %334 : vector<8x32xf32>
    %336 = vector.broadcast %9 : vector<1x32xf32> to vector<8x32xf32>
    %337 = arith.addf %335, %336 : vector<8x32xf32>
    "tpu.trace_start"() <{level = 10 : i32, message = "td,ed->te"}> : () -> ()
    %cst_118 = arith.constant dense<0.000000e+00> : vector<8x96xf32>
    %338 = tpu.matmul %337, %0, %cst_118 {dimension_numbers = #tpu.dot_dimension_numbers<[1], [1], [0], [0], [0, 0, 1, 0], [], []>} : vector<8x32xf32>, vector<96x32xf32>, vector<8x96xf32> -> vector<8x96xf32>
    "tpu.trace_stop"() : () -> ()
    %339 = vector.broadcast %10 : vector<1x96xf32> to vector<8x96xf32>
    %340 = arith.addf %338, %339 : vector<8x96xf32>
    %341 = vector.extract_strided_slice %340 {offsets = [0, 0], sizes = [8, 32], strides = [1, 1]} : vector<8x96xf32> to vector<8x32xf32>
    %342 = vector.extract_strided_slice %340 {offsets = [0, 32], sizes = [8, 32], strides = [1, 1]} : vector<8x96xf32> to vector<8x32xf32>
    %343 = vector.extract_strided_slice %340 {offsets = [0, 64], sizes = [8, 32], strides = [1, 1]} : vector<8x96xf32> to vector<8x32xf32>
    %cst_119 = arith.constant 0.000000e+00 : f32
    %344 = vector.broadcast %cst_119 : f32 to vector<8x32xf32>
    %cst_120 = arith.constant 0.000000e+00 : f32
    %345 = vector.broadcast %cst_120 : f32 to vector<8x8xf32>
    %346 = vector.extract_strided_slice %341 {offsets = [0, 0], sizes = [8, 8], strides = [1, 1]} : vector<8x32xf32> to vector<8x8xf32>
    %cst_121 = arith.constant 0.353553385 : f32
    %347 = vector.broadcast %cst_121 : f32 to vector<8x8xf32>
    %348 = arith.mulf %346, %347 : vector<8x8xf32>
    %349 = vector.extract_strided_slice %342 {offsets = [0, 0], sizes = [8, 8], strides = [1, 1]} : vector<8x32xf32> to vector<8x8xf32>
    "tpu.trace_start"() <{level = 10 : i32, message = "td,sd->ts"}> : () -> ()
    %cst_122 = arith.constant dense<0.000000e+00> : vector<8x8xf32>
    %350 = tpu.matmul %348, %349, %cst_122 {dimension_numbers = #tpu.dot_dimension_numbers<[1], [1], [0], [0], [0, 0, 1, 0], [], []>} : vector<8x8xf32>, vector<8x8xf32>, vector<8x8xf32> -> vector<8x8xf32>
    "tpu.trace_stop"() : () -> ()
    %cst_123 = arith.constant dense<0xFF800000> : vector<8xf32>
    %351 = vector.multi_reduction <maximumf>, %350, %cst_123 [1] : vector<8x8xf32> to vector<8xf32>
    %cst_124 = arith.constant 0xFF800000 : f32
    %352 = vector.broadcast %cst_124 : f32 to vector<8xf32>
    %353 = arith.maximumf %352, %351 : vector<8xf32>
    %354 = vector.shape_cast %353 : vector<8xf32> to vector<8x1xf32>
    %355 = vector.broadcast %354 : vector<8x1xf32> to vector<8x8xf32>
    %356 = arith.subf %350, %355 : vector<8x8xf32>
    %357 = math.exp %356 : vector<8x8xf32>
    %cst_125 = arith.constant dense<0.000000e+00> : vector<8xf32>
    %358 = vector.multi_reduction <add>, %357, %cst_125 [1] : vector<8x8xf32> to vector<8xf32>
    %359 = vector.shape_cast %358 : vector<8xf32> to vector<8x1xf32>
    %360 = vector.broadcast %359 : vector<8x1xf32> to vector<8x8xf32>
    %361 = arith.divf %357, %360 : vector<8x8xf32>
    %362 = arith.addf %345, %361 : vector<8x8xf32>
    %363 = vector.extract_strided_slice %343 {offsets = [0, 0], sizes = [8, 8], strides = [1, 1]} : vector<8x32xf32> to vector<8x8xf32>
    "tpu.trace_start"() <{level = 10 : i32, message = "ts,sd->td"}> : () -> ()
    %cst_126 = arith.constant dense<0.000000e+00> : vector<8x8xf32>
    %364 = tpu.matmul %361, %363, %cst_126 {dimension_numbers = #tpu.dot_dimension_numbers<[1], [0], [0], [1], [0, 0, 1, 1], [], []>} : vector<8x8xf32>, vector<8x8xf32>, vector<8x8xf32> -> vector<8x8xf32>
    "tpu.trace_stop"() : () -> ()
    %365 = vector.extract_strided_slice %1 {offsets = [0, 0], sizes = [8, 32], strides = [1, 1]} : vector<32x32xf32> to vector<8x32xf32>
    "tpu.trace_start"() <{level = 10 : i32, message = "tk,kd->td"}> : () -> ()
    %cst_127 = arith.constant dense<0.000000e+00> : vector<8x32xf32>
    %366 = tpu.matmul %364, %365, %cst_127 {dimension_numbers = #tpu.dot_dimension_numbers<[1], [0], [0], [1], [0, 0, 1, 1], [], []>} : vector<8x8xf32>, vector<8x32xf32>, vector<8x32xf32> -> vector<8x32xf32>
    "tpu.trace_stop"() : () -> ()
    %367 = arith.addf %344, %366 : vector<8x32xf32>
    %368 = vector.extract_strided_slice %341 {offsets = [0, 8], sizes = [8, 8], strides = [1, 1]} : vector<8x32xf32> to vector<8x8xf32>
    %cst_128 = arith.constant 0.353553385 : f32
    %369 = vector.broadcast %cst_128 : f32 to vector<8x8xf32>
    %370 = arith.mulf %368, %369 : vector<8x8xf32>
    %371 = vector.extract_strided_slice %342 {offsets = [0, 8], sizes = [8, 8], strides = [1, 1]} : vector<8x32xf32> to vector<8x8xf32>
    "tpu.trace_start"() <{level = 10 : i32, message = "td,sd->ts"}> : () -> ()
    %cst_129 = arith.constant dense<0.000000e+00> : vector<8x8xf32>
    %372 = tpu.matmul %370, %371, %cst_129 {dimension_numbers = #tpu.dot_dimension_numbers<[1], [1], [0], [0], [0, 0, 1, 0], [], []>} : vector<8x8xf32>, vector<8x8xf32>, vector<8x8xf32> -> vector<8x8xf32>
    "tpu.trace_stop"() : () -> ()
    %cst_130 = arith.constant dense<0xFF800000> : vector<8xf32>
    %373 = vector.multi_reduction <maximumf>, %372, %cst_130 [1] : vector<8x8xf32> to vector<8xf32>
    %cst_131 = arith.constant 0xFF800000 : f32
    %374 = vector.broadcast %cst_131 : f32 to vector<8xf32>
    %375 = arith.maximumf %374, %373 : vector<8xf32>
    %376 = vector.shape_cast %375 : vector<8xf32> to vector<8x1xf32>
    %377 = vector.broadcast %376 : vector<8x1xf32> to vector<8x8xf32>
    %378 = arith.subf %372, %377 : vector<8x8xf32>
    %379 = math.exp %378 : vector<8x8xf32>
    %cst_132 = arith.constant dense<0.000000e+00> : vector<8xf32>
    %380 = vector.multi_reduction <add>, %379, %cst_132 [1] : vector<8x8xf32> to vector<8xf32>
    %381 = vector.shape_cast %380 : vector<8xf32> to vector<8x1xf32>
    %382 = vector.broadcast %381 : vector<8x1xf32> to vector<8x8xf32>
    %383 = arith.divf %379, %382 : vector<8x8xf32>
    %384 = arith.addf %362, %383 : vector<8x8xf32>
    %385 = vector.extract_strided_slice %343 {offsets = [0, 8], sizes = [8, 8], strides = [1, 1]} : vector<8x32xf32> to vector<8x8xf32>
    "tpu.trace_start"() <{level = 10 : i32, message = "ts,sd->td"}> : () -> ()
    %cst_133 = arith.constant dense<0.000000e+00> : vector<8x8xf32>
    %386 = tpu.matmul %383, %385, %cst_133 {dimension_numbers = #tpu.dot_dimension_numbers<[1], [0], [0], [1], [0, 0, 1, 1], [], []>} : vector<8x8xf32>, vector<8x8xf32>, vector<8x8xf32> -> vector<8x8xf32>
    "tpu.trace_stop"() : () -> ()
    %387 = vector.extract_strided_slice %1 {offsets = [8, 0], sizes = [8, 32], strides = [1, 1]} : vector<32x32xf32> to vector<8x32xf32>
    "tpu.trace_start"() <{level = 10 : i32, message = "tk,kd->td"}> : () -> ()
    %cst_134 = arith.constant dense<0.000000e+00> : vector<8x32xf32>
    %388 = tpu.matmul %386, %387, %cst_134 {dimension_numbers = #tpu.dot_dimension_numbers<[1], [0], [0], [1], [0, 0, 1, 1], [], []>} : vector<8x8xf32>, vector<8x32xf32>, vector<8x32xf32> -> vector<8x32xf32>
    "tpu.trace_stop"() : () -> ()
    %389 = arith.addf %367, %388 : vector<8x32xf32>
    %390 = vector.extract_strided_slice %341 {offsets = [0, 16], sizes = [8, 8], strides = [1, 1]} : vector<8x32xf32> to vector<8x8xf32>
    %cst_135 = arith.constant 0.353553385 : f32
    %391 = vector.broadcast %cst_135 : f32 to vector<8x8xf32>
    %392 = arith.mulf %390, %391 : vector<8x8xf32>
    %393 = vector.extract_strided_slice %342 {offsets = [0, 16], sizes = [8, 8], strides = [1, 1]} : vector<8x32xf32> to vector<8x8xf32>
    "tpu.trace_start"() <{level = 10 : i32, message = "td,sd->ts"}> : () -> ()
    %cst_136 = arith.constant dense<0.000000e+00> : vector<8x8xf32>
    %394 = tpu.matmul %392, %393, %cst_136 {dimension_numbers = #tpu.dot_dimension_numbers<[1], [1], [0], [0], [0, 0, 1, 0], [], []>} : vector<8x8xf32>, vector<8x8xf32>, vector<8x8xf32> -> vector<8x8xf32>
    "tpu.trace_stop"() : () -> ()
    %cst_137 = arith.constant dense<0xFF800000> : vector<8xf32>
    %395 = vector.multi_reduction <maximumf>, %394, %cst_137 [1] : vector<8x8xf32> to vector<8xf32>
    %cst_138 = arith.constant 0xFF800000 : f32
    %396 = vector.broadcast %cst_138 : f32 to vector<8xf32>
    %397 = arith.maximumf %396, %395 : vector<8xf32>
    %398 = vector.shape_cast %397 : vector<8xf32> to vector<8x1xf32>
    %399 = vector.broadcast %398 : vector<8x1xf32> to vector<8x8xf32>
    %400 = arith.subf %394, %399 : vector<8x8xf32>
    %401 = math.exp %400 : vector<8x8xf32>
    %cst_139 = arith.constant dense<0.000000e+00> : vector<8xf32>
    %402 = vector.multi_reduction <add>, %401, %cst_139 [1] : vector<8x8xf32> to vector<8xf32>
    %403 = vector.shape_cast %402 : vector<8xf32> to vector<8x1xf32>
    %404 = vector.broadcast %403 : vector<8x1xf32> to vector<8x8xf32>
    %405 = arith.divf %401, %404 : vector<8x8xf32>
    %406 = arith.addf %384, %405 : vector<8x8xf32>
    %407 = vector.extract_strided_slice %343 {offsets = [0, 16], sizes = [8, 8], strides = [1, 1]} : vector<8x32xf32> to vector<8x8xf32>
    "tpu.trace_start"() <{level = 10 : i32, message = "ts,sd->td"}> : () -> ()
    %cst_140 = arith.constant dense<0.000000e+00> : vector<8x8xf32>
    %408 = tpu.matmul %405, %407, %cst_140 {dimension_numbers = #tpu.dot_dimension_numbers<[1], [0], [0], [1], [0, 0, 1, 1], [], []>} : vector<8x8xf32>, vector<8x8xf32>, vector<8x8xf32> -> vector<8x8xf32>
    "tpu.trace_stop"() : () -> ()
    %409 = vector.extract_strided_slice %1 {offsets = [16, 0], sizes = [8, 32], strides = [1, 1]} : vector<32x32xf32> to vector<8x32xf32>
    "tpu.trace_start"() <{level = 10 : i32, message = "tk,kd->td"}> : () -> ()
    %cst_141 = arith.constant dense<0.000000e+00> : vector<8x32xf32>
    %410 = tpu.matmul %408, %409, %cst_141 {dimension_numbers = #tpu.dot_dimension_numbers<[1], [0], [0], [1], [0, 0, 1, 1], [], []>} : vector<8x8xf32>, vector<8x32xf32>, vector<8x32xf32> -> vector<8x32xf32>
    "tpu.trace_stop"() : () -> ()
    %411 = arith.addf %389, %410 : vector<8x32xf32>
    %412 = vector.extract_strided_slice %341 {offsets = [0, 24], sizes = [8, 8], strides = [1, 1]} : vector<8x32xf32> to vector<8x8xf32>
    %cst_142 = arith.constant 0.353553385 : f32
    %413 = vector.broadcast %cst_142 : f32 to vector<8x8xf32>
    %414 = arith.mulf %412, %413 : vector<8x8xf32>
    %415 = vector.extract_strided_slice %342 {offsets = [0, 24], sizes = [8, 8], strides = [1, 1]} : vector<8x32xf32> to vector<8x8xf32>
    "tpu.trace_start"() <{level = 10 : i32, message = "td,sd->ts"}> : () -> ()
    %cst_143 = arith.constant dense<0.000000e+00> : vector<8x8xf32>
    %416 = tpu.matmul %414, %415, %cst_143 {dimension_numbers = #tpu.dot_dimension_numbers<[1], [1], [0], [0], [0, 0, 1, 0], [], []>} : vector<8x8xf32>, vector<8x8xf32>, vector<8x8xf32> -> vector<8x8xf32>
    "tpu.trace_stop"() : () -> ()
    %cst_144 = arith.constant dense<0xFF800000> : vector<8xf32>
    %417 = vector.multi_reduction <maximumf>, %416, %cst_144 [1] : vector<8x8xf32> to vector<8xf32>
    %cst_145 = arith.constant 0xFF800000 : f32
    %418 = vector.broadcast %cst_145 : f32 to vector<8xf32>
    %419 = arith.maximumf %418, %417 : vector<8xf32>
    %420 = vector.shape_cast %419 : vector<8xf32> to vector<8x1xf32>
    %421 = vector.broadcast %420 : vector<8x1xf32> to vector<8x8xf32>
    %422 = arith.subf %416, %421 : vector<8x8xf32>
    %423 = math.exp %422 : vector<8x8xf32>
    %cst_146 = arith.constant dense<0.000000e+00> : vector<8xf32>
    %424 = vector.multi_reduction <add>, %423, %cst_146 [1] : vector<8x8xf32> to vector<8xf32>
    %425 = vector.shape_cast %424 : vector<8xf32> to vector<8x1xf32>
    %426 = vector.broadcast %425 : vector<8x1xf32> to vector<8x8xf32>
    %427 = arith.divf %423, %426 : vector<8x8xf32>
    %428 = arith.addf %406, %427 : vector<8x8xf32>
    %429 = vector.extract_strided_slice %343 {offsets = [0, 24], sizes = [8, 8], strides = [1, 1]} : vector<8x32xf32> to vector<8x8xf32>
    "tpu.trace_start"() <{level = 10 : i32, message = "ts,sd->td"}> : () -> ()
    %cst_147 = arith.constant dense<0.000000e+00> : vector<8x8xf32>
    %430 = tpu.matmul %427, %429, %cst_147 {dimension_numbers = #tpu.dot_dimension_numbers<[1], [0], [0], [1], [0, 0, 1, 1], [], []>} : vector<8x8xf32>, vector<8x8xf32>, vector<8x8xf32> -> vector<8x8xf32>
    "tpu.trace_stop"() : () -> ()
    %431 = vector.extract_strided_slice %1 {offsets = [24, 0], sizes = [8, 32], strides = [1, 1]} : vector<32x32xf32> to vector<8x32xf32>
    "tpu.trace_start"() <{level = 10 : i32, message = "tk,kd->td"}> : () -> ()
    %cst_148 = arith.constant dense<0.000000e+00> : vector<8x32xf32>
    %432 = tpu.matmul %430, %431, %cst_148 {dimension_numbers = #tpu.dot_dimension_numbers<[1], [0], [0], [1], [0, 0, 1, 1], [], []>} : vector<8x8xf32>, vector<8x32xf32>, vector<8x32xf32> -> vector<8x32xf32>
    "tpu.trace_stop"() : () -> ()
    %433 = arith.addf %411, %432 : vector<8x32xf32>
    %434 = vector.broadcast %11 : vector<1x32xf32> to vector<8x32xf32>
    %435 = arith.addf %433, %434 : vector<8x32xf32>
    %cst_149 = arith.constant 2.500000e-01 : f32
    %436 = vector.broadcast %cst_149 : f32 to vector<8x8xf32>
    %437 = arith.mulf %428, %436 : vector<8x8xf32>
    %438 = arith.addf %315, %435 : vector<8x32xf32>
    %cst_150 = arith.constant dense<0.000000e+00> : vector<8xf32>
    %439 = vector.multi_reduction <add>, %438, %cst_150 [1] : vector<8x32xf32> to vector<8xf32>
    %440 = vector.shape_cast %439 : vector<8xf32> to vector<8x1xf32>
    %cst_151 = arith.constant 3.200000e+01 : f32
    %441 = vector.broadcast %cst_151 : f32 to vector<8x1xf32>
    %442 = arith.divf %440, %441 : vector<8x1xf32>
    %443 = vector.broadcast %442 : vector<8x1xf32> to vector<8x32xf32>
    %444 = arith.subf %438, %443 : vector<8x32xf32>
    %445 = arith.mulf %444, %444 : vector<8x32xf32>
    %cst_152 = arith.constant dense<0.000000e+00> : vector<8xf32>
    %446 = vector.multi_reduction <add>, %445, %cst_152 [1] : vector<8x32xf32> to vector<8xf32>
    %447 = vector.shape_cast %446 : vector<8xf32> to vector<8x1xf32>
    %cst_153 = arith.constant 3.200000e+01 : f32
    %448 = vector.broadcast %cst_153 : f32 to vector<8x1xf32>
    %449 = arith.divf %447, %448 : vector<8x1xf32>
    %cst_154 = arith.constant 9.99999974E-6 : f32
    %450 = vector.broadcast %cst_154 : f32 to vector<8x1xf32>
    %451 = arith.addf %449, %450 : vector<8x1xf32>
    %452 = math.rsqrt %451 : vector<8x1xf32>
    %453 = vector.broadcast %452 : vector<8x1xf32> to vector<8x32xf32>
    %454 = arith.mulf %444, %453 : vector<8x32xf32>
    %455 = vector.broadcast %12 : vector<1x32xf32> to vector<8x32xf32>
    %456 = arith.mulf %454, %455 : vector<8x32xf32>
    %457 = vector.broadcast %13 : vector<1x32xf32> to vector<8x32xf32>
    %458 = arith.addf %456, %457 : vector<8x32xf32>
    "tpu.trace_start"() <{level = 10 : i32, message = "td,ed->te"}> : () -> ()
    %cst_155 = arith.constant dense<0.000000e+00> : vector<8x32xf32>
    %459 = tpu.matmul %458, %2, %cst_155 {dimension_numbers = #tpu.dot_dimension_numbers<[1], [1], [0], [0], [0, 0, 1, 0], [], []>} : vector<8x32xf32>, vector<32x32xf32>, vector<8x32xf32> -> vector<8x32xf32>
    "tpu.trace_stop"() : () -> ()
    %460 = vector.extract_strided_slice %14 {offsets = [0, 0], sizes = [1, 32], strides = [1, 1]} : vector<1x96xf32> to vector<1x32xf32>
    %461 = vector.broadcast %460 : vector<1x32xf32> to vector<8x32xf32>
    %462 = arith.addf %459, %461 : vector<8x32xf32>
    "tpu.trace_start"() <{level = 10 : i32, message = "sd,ed->se"}> : () -> ()
    %cst_156 = arith.constant dense<0.000000e+00> : vector<16x64xf32>
    %463 = tpu.matmul %317, %3, %cst_156 {dimension_numbers = #tpu.dot_dimension_numbers<[1], [1], [0], [0], [0, 0, 1, 0], [], []>} : vector<16x32xf32>, vector<64x32xf32>, vector<16x64xf32> -> vector<16x64xf32>
    "tpu.trace_stop"() : () -> ()
    %464 = vector.extract_strided_slice %14 {offsets = [0, 32], sizes = [1, 64], strides = [1, 1]} : vector<1x96xf32> to vector<1x64xf32>
    %465 = vector.broadcast %464 : vector<1x64xf32> to vector<16x64xf32>
    %466 = arith.addf %463, %465 : vector<16x64xf32>
    %467 = vector.extract_strided_slice %466 {offsets = [0, 0], sizes = [16, 32], strides = [1, 1]} : vector<16x64xf32> to vector<16x32xf32>
    %468 = vector.extract_strided_slice %466 {offsets = [0, 32], sizes = [16, 32], strides = [1, 1]} : vector<16x64xf32> to vector<16x32xf32>
    %cst_157 = arith.constant 0.000000e+00 : f32
    %469 = vector.broadcast %cst_157 : f32 to vector<8x32xf32>
    %cst_158 = arith.constant 0.000000e+00 : f32
    %470 = vector.broadcast %cst_158 : f32 to vector<8x16xf32>
    %471 = vector.extract_strided_slice %462 {offsets = [0, 0], sizes = [8, 8], strides = [1, 1]} : vector<8x32xf32> to vector<8x8xf32>
    %cst_159 = arith.constant 0.353553385 : f32
    %472 = vector.broadcast %cst_159 : f32 to vector<8x8xf32>
    %473 = arith.mulf %471, %472 : vector<8x8xf32>
    %474 = vector.extract_strided_slice %467 {offsets = [0, 0], sizes = [16, 8], strides = [1, 1]} : vector<16x32xf32> to vector<16x8xf32>
    "tpu.trace_start"() <{level = 10 : i32, message = "td,sd->ts"}> : () -> ()
    %cst_160 = arith.constant dense<0.000000e+00> : vector<8x16xf32>
    %475 = tpu.matmul %473, %474, %cst_160 {dimension_numbers = #tpu.dot_dimension_numbers<[1], [1], [0], [0], [0, 0, 1, 0], [], []>} : vector<8x8xf32>, vector<16x8xf32>, vector<8x16xf32> -> vector<8x16xf32>
    "tpu.trace_stop"() : () -> ()
    %cst_161 = arith.constant dense<0xFF800000> : vector<8xf32>
    %476 = vector.multi_reduction <maximumf>, %475, %cst_161 [1] : vector<8x16xf32> to vector<8xf32>
    %cst_162 = arith.constant 0xFF800000 : f32
    %477 = vector.broadcast %cst_162 : f32 to vector<8xf32>
    %478 = arith.maximumf %477, %476 : vector<8xf32>
    %479 = vector.shape_cast %478 : vector<8xf32> to vector<8x1xf32>
    %480 = vector.broadcast %479 : vector<8x1xf32> to vector<8x16xf32>
    %481 = arith.subf %475, %480 : vector<8x16xf32>
    %482 = math.exp %481 : vector<8x16xf32>
    %cst_163 = arith.constant dense<0.000000e+00> : vector<8xf32>
    %483 = vector.multi_reduction <add>, %482, %cst_163 [1] : vector<8x16xf32> to vector<8xf32>
    %484 = vector.shape_cast %483 : vector<8xf32> to vector<8x1xf32>
    %485 = vector.broadcast %484 : vector<8x1xf32> to vector<8x16xf32>
    %486 = arith.divf %482, %485 : vector<8x16xf32>
    %487 = arith.addf %470, %486 : vector<8x16xf32>
    %488 = vector.extract_strided_slice %468 {offsets = [0, 0], sizes = [16, 8], strides = [1, 1]} : vector<16x32xf32> to vector<16x8xf32>
    "tpu.trace_start"() <{level = 10 : i32, message = "ts,sd->td"}> : () -> ()
    %cst_164 = arith.constant dense<0.000000e+00> : vector<8x8xf32>
    %489 = tpu.matmul %486, %488, %cst_164 {dimension_numbers = #tpu.dot_dimension_numbers<[1], [0], [0], [1], [0, 0, 1, 1], [], []>} : vector<8x16xf32>, vector<16x8xf32>, vector<8x8xf32> -> vector<8x8xf32>
    "tpu.trace_stop"() : () -> ()
    %490 = vector.extract_strided_slice %4 {offsets = [0, 0], sizes = [8, 32], strides = [1, 1]} : vector<32x32xf32> to vector<8x32xf32>
    "tpu.trace_start"() <{level = 10 : i32, message = "tk,kd->td"}> : () -> ()
    %cst_165 = arith.constant dense<0.000000e+00> : vector<8x32xf32>
    %491 = tpu.matmul %489, %490, %cst_165 {dimension_numbers = #tpu.dot_dimension_numbers<[1], [0], [0], [1], [0, 0, 1, 1], [], []>} : vector<8x8xf32>, vector<8x32xf32>, vector<8x32xf32> -> vector<8x32xf32>
    "tpu.trace_stop"() : () -> ()
    %492 = arith.addf %469, %491 : vector<8x32xf32>
    %493 = vector.extract_strided_slice %462 {offsets = [0, 8], sizes = [8, 8], strides = [1, 1]} : vector<8x32xf32> to vector<8x8xf32>
    %cst_166 = arith.constant 0.353553385 : f32
    %494 = vector.broadcast %cst_166 : f32 to vector<8x8xf32>
    %495 = arith.mulf %493, %494 : vector<8x8xf32>
    %496 = vector.extract_strided_slice %467 {offsets = [0, 8], sizes = [16, 8], strides = [1, 1]} : vector<16x32xf32> to vector<16x8xf32>
    "tpu.trace_start"() <{level = 10 : i32, message = "td,sd->ts"}> : () -> ()
    %cst_167 = arith.constant dense<0.000000e+00> : vector<8x16xf32>
    %497 = tpu.matmul %495, %496, %cst_167 {dimension_numbers = #tpu.dot_dimension_numbers<[1], [1], [0], [0], [0, 0, 1, 0], [], []>} : vector<8x8xf32>, vector<16x8xf32>, vector<8x16xf32> -> vector<8x16xf32>
    "tpu.trace_stop"() : () -> ()
    %cst_168 = arith.constant dense<0xFF800000> : vector<8xf32>
    %498 = vector.multi_reduction <maximumf>, %497, %cst_168 [1] : vector<8x16xf32> to vector<8xf32>
    %cst_169 = arith.constant 0xFF800000 : f32
    %499 = vector.broadcast %cst_169 : f32 to vector<8xf32>
    %500 = arith.maximumf %499, %498 : vector<8xf32>
    %501 = vector.shape_cast %500 : vector<8xf32> to vector<8x1xf32>
    %502 = vector.broadcast %501 : vector<8x1xf32> to vector<8x16xf32>
    %503 = arith.subf %497, %502 : vector<8x16xf32>
    %504 = math.exp %503 : vector<8x16xf32>
    %cst_170 = arith.constant dense<0.000000e+00> : vector<8xf32>
    %505 = vector.multi_reduction <add>, %504, %cst_170 [1] : vector<8x16xf32> to vector<8xf32>
    %506 = vector.shape_cast %505 : vector<8xf32> to vector<8x1xf32>
    %507 = vector.broadcast %506 : vector<8x1xf32> to vector<8x16xf32>
    %508 = arith.divf %504, %507 : vector<8x16xf32>
    %509 = arith.addf %487, %508 : vector<8x16xf32>
    %510 = vector.extract_strided_slice %468 {offsets = [0, 8], sizes = [16, 8], strides = [1, 1]} : vector<16x32xf32> to vector<16x8xf32>
    "tpu.trace_start"() <{level = 10 : i32, message = "ts,sd->td"}> : () -> ()
    %cst_171 = arith.constant dense<0.000000e+00> : vector<8x8xf32>
    %511 = tpu.matmul %508, %510, %cst_171 {dimension_numbers = #tpu.dot_dimension_numbers<[1], [0], [0], [1], [0, 0, 1, 1], [], []>} : vector<8x16xf32>, vector<16x8xf32>, vector<8x8xf32> -> vector<8x8xf32>
    "tpu.trace_stop"() : () -> ()
    %512 = vector.extract_strided_slice %4 {offsets = [8, 0], sizes = [8, 32], strides = [1, 1]} : vector<32x32xf32> to vector<8x32xf32>
    "tpu.trace_start"() <{level = 10 : i32, message = "tk,kd->td"}> : () -> ()
    %cst_172 = arith.constant dense<0.000000e+00> : vector<8x32xf32>
    %513 = tpu.matmul %511, %512, %cst_172 {dimension_numbers = #tpu.dot_dimension_numbers<[1], [0], [0], [1], [0, 0, 1, 1], [], []>} : vector<8x8xf32>, vector<8x32xf32>, vector<8x32xf32> -> vector<8x32xf32>
    "tpu.trace_stop"() : () -> ()
    %514 = arith.addf %492, %513 : vector<8x32xf32>
    %515 = vector.extract_strided_slice %462 {offsets = [0, 16], sizes = [8, 8], strides = [1, 1]} : vector<8x32xf32> to vector<8x8xf32>
    %cst_173 = arith.constant 0.353553385 : f32
    %516 = vector.broadcast %cst_173 : f32 to vector<8x8xf32>
    %517 = arith.mulf %515, %516 : vector<8x8xf32>
    %518 = vector.extract_strided_slice %467 {offsets = [0, 16], sizes = [16, 8], strides = [1, 1]} : vector<16x32xf32> to vector<16x8xf32>
    "tpu.trace_start"() <{level = 10 : i32, message = "td,sd->ts"}> : () -> ()
    %cst_174 = arith.constant dense<0.000000e+00> : vector<8x16xf32>
    %519 = tpu.matmul %517, %518, %cst_174 {dimension_numbers = #tpu.dot_dimension_numbers<[1], [1], [0], [0], [0, 0, 1, 0], [], []>} : vector<8x8xf32>, vector<16x8xf32>, vector<8x16xf32> -> vector<8x16xf32>
    "tpu.trace_stop"() : () -> ()
    %cst_175 = arith.constant dense<0xFF800000> : vector<8xf32>
    %520 = vector.multi_reduction <maximumf>, %519, %cst_175 [1] : vector<8x16xf32> to vector<8xf32>
    %cst_176 = arith.constant 0xFF800000 : f32
    %521 = vector.broadcast %cst_176 : f32 to vector<8xf32>
    %522 = arith.maximumf %521, %520 : vector<8xf32>
    %523 = vector.shape_cast %522 : vector<8xf32> to vector<8x1xf32>
    %524 = vector.broadcast %523 : vector<8x1xf32> to vector<8x16xf32>
    %525 = arith.subf %519, %524 : vector<8x16xf32>
    %526 = math.exp %525 : vector<8x16xf32>
    %cst_177 = arith.constant dense<0.000000e+00> : vector<8xf32>
    %527 = vector.multi_reduction <add>, %526, %cst_177 [1] : vector<8x16xf32> to vector<8xf32>
    %528 = vector.shape_cast %527 : vector<8xf32> to vector<8x1xf32>
    %529 = vector.broadcast %528 : vector<8x1xf32> to vector<8x16xf32>
    %530 = arith.divf %526, %529 : vector<8x16xf32>
    %531 = arith.addf %509, %530 : vector<8x16xf32>
    %532 = vector.extract_strided_slice %468 {offsets = [0, 16], sizes = [16, 8], strides = [1, 1]} : vector<16x32xf32> to vector<16x8xf32>
    "tpu.trace_start"() <{level = 10 : i32, message = "ts,sd->td"}> : () -> ()
    %cst_178 = arith.constant dense<0.000000e+00> : vector<8x8xf32>
    %533 = tpu.matmul %530, %532, %cst_178 {dimension_numbers = #tpu.dot_dimension_numbers<[1], [0], [0], [1], [0, 0, 1, 1], [], []>} : vector<8x16xf32>, vector<16x8xf32>, vector<8x8xf32> -> vector<8x8xf32>
    "tpu.trace_stop"() : () -> ()
    %534 = vector.extract_strided_slice %4 {offsets = [16, 0], sizes = [8, 32], strides = [1, 1]} : vector<32x32xf32> to vector<8x32xf32>
    "tpu.trace_start"() <{level = 10 : i32, message = "tk,kd->td"}> : () -> ()
    %cst_179 = arith.constant dense<0.000000e+00> : vector<8x32xf32>
    %535 = tpu.matmul %533, %534, %cst_179 {dimension_numbers = #tpu.dot_dimension_numbers<[1], [0], [0], [1], [0, 0, 1, 1], [], []>} : vector<8x8xf32>, vector<8x32xf32>, vector<8x32xf32> -> vector<8x32xf32>
    "tpu.trace_stop"() : () -> ()
    %536 = arith.addf %514, %535 : vector<8x32xf32>
    %537 = vector.extract_strided_slice %462 {offsets = [0, 24], sizes = [8, 8], strides = [1, 1]} : vector<8x32xf32> to vector<8x8xf32>
    %cst_180 = arith.constant 0.353553385 : f32
    %538 = vector.broadcast %cst_180 : f32 to vector<8x8xf32>
    %539 = arith.mulf %537, %538 : vector<8x8xf32>
    %540 = vector.extract_strided_slice %467 {offsets = [0, 24], sizes = [16, 8], strides = [1, 1]} : vector<16x32xf32> to vector<16x8xf32>
    "tpu.trace_start"() <{level = 10 : i32, message = "td,sd->ts"}> : () -> ()
    %cst_181 = arith.constant dense<0.000000e+00> : vector<8x16xf32>
    %541 = tpu.matmul %539, %540, %cst_181 {dimension_numbers = #tpu.dot_dimension_numbers<[1], [1], [0], [0], [0, 0, 1, 0], [], []>} : vector<8x8xf32>, vector<16x8xf32>, vector<8x16xf32> -> vector<8x16xf32>
    "tpu.trace_stop"() : () -> ()
    %cst_182 = arith.constant dense<0xFF800000> : vector<8xf32>
    %542 = vector.multi_reduction <maximumf>, %541, %cst_182 [1] : vector<8x16xf32> to vector<8xf32>
    %cst_183 = arith.constant 0xFF800000 : f32
    %543 = vector.broadcast %cst_183 : f32 to vector<8xf32>
    %544 = arith.maximumf %543, %542 : vector<8xf32>
    %545 = vector.shape_cast %544 : vector<8xf32> to vector<8x1xf32>
    %546 = vector.broadcast %545 : vector<8x1xf32> to vector<8x16xf32>
    %547 = arith.subf %541, %546 : vector<8x16xf32>
    %548 = math.exp %547 : vector<8x16xf32>
    %cst_184 = arith.constant dense<0.000000e+00> : vector<8xf32>
    %549 = vector.multi_reduction <add>, %548, %cst_184 [1] : vector<8x16xf32> to vector<8xf32>
    %550 = vector.shape_cast %549 : vector<8xf32> to vector<8x1xf32>
    %551 = vector.broadcast %550 : vector<8x1xf32> to vector<8x16xf32>
    %552 = arith.divf %548, %551 : vector<8x16xf32>
    %553 = arith.addf %531, %552 : vector<8x16xf32>
    %554 = vector.extract_strided_slice %468 {offsets = [0, 24], sizes = [16, 8], strides = [1, 1]} : vector<16x32xf32> to vector<16x8xf32>
    "tpu.trace_start"() <{level = 10 : i32, message = "ts,sd->td"}> : () -> ()
    %cst_185 = arith.constant dense<0.000000e+00> : vector<8x8xf32>
    %555 = tpu.matmul %552, %554, %cst_185 {dimension_numbers = #tpu.dot_dimension_numbers<[1], [0], [0], [1], [0, 0, 1, 1], [], []>} : vector<8x16xf32>, vector<16x8xf32>, vector<8x8xf32> -> vector<8x8xf32>
    "tpu.trace_stop"() : () -> ()
    %556 = vector.extract_strided_slice %4 {offsets = [24, 0], sizes = [8, 32], strides = [1, 1]} : vector<32x32xf32> to vector<8x32xf32>
    "tpu.trace_start"() <{level = 10 : i32, message = "tk,kd->td"}> : () -> ()
    %cst_186 = arith.constant dense<0.000000e+00> : vector<8x32xf32>
    %557 = tpu.matmul %555, %556, %cst_186 {dimension_numbers = #tpu.dot_dimension_numbers<[1], [0], [0], [1], [0, 0, 1, 1], [], []>} : vector<8x8xf32>, vector<8x32xf32>, vector<8x32xf32> -> vector<8x32xf32>
    "tpu.trace_stop"() : () -> ()
    %558 = arith.addf %536, %557 : vector<8x32xf32>
    %559 = vector.broadcast %15 : vector<1x32xf32> to vector<8x32xf32>
    %560 = arith.addf %558, %559 : vector<8x32xf32>
    %cst_187 = arith.constant 2.500000e-01 : f32
    %561 = vector.broadcast %cst_187 : f32 to vector<8x16xf32>
    %562 = arith.mulf %553, %561 : vector<8x16xf32>
    %563 = arith.addf %438, %560 : vector<8x32xf32>
    %cst_188 = arith.constant dense<0.000000e+00> : vector<8xf32>
    %564 = vector.multi_reduction <add>, %563, %cst_188 [1] : vector<8x32xf32> to vector<8xf32>
    %565 = vector.shape_cast %564 : vector<8xf32> to vector<8x1xf32>
    %cst_189 = arith.constant 3.200000e+01 : f32
    %566 = vector.broadcast %cst_189 : f32 to vector<8x1xf32>
    %567 = arith.divf %565, %566 : vector<8x1xf32>
    %568 = vector.broadcast %567 : vector<8x1xf32> to vector<8x32xf32>
    %569 = arith.subf %563, %568 : vector<8x32xf32>
    %570 = arith.mulf %569, %569 : vector<8x32xf32>
    %cst_190 = arith.constant dense<0.000000e+00> : vector<8xf32>
    %571 = vector.multi_reduction <add>, %570, %cst_190 [1] : vector<8x32xf32> to vector<8xf32>
    %572 = vector.shape_cast %571 : vector<8xf32> to vector<8x1xf32>
    %cst_191 = arith.constant 3.200000e+01 : f32
    %573 = vector.broadcast %cst_191 : f32 to vector<8x1xf32>
    %574 = arith.divf %572, %573 : vector<8x1xf32>
    %cst_192 = arith.constant 9.99999974E-6 : f32
    %575 = vector.broadcast %cst_192 : f32 to vector<8x1xf32>
    %576 = arith.addf %574, %575 : vector<8x1xf32>
    %577 = math.rsqrt %576 : vector<8x1xf32>
    %578 = vector.broadcast %577 : vector<8x1xf32> to vector<8x32xf32>
    %579 = arith.mulf %569, %578 : vector<8x32xf32>
    %580 = vector.broadcast %16 : vector<1x32xf32> to vector<8x32xf32>
    %581 = arith.mulf %579, %580 : vector<8x32xf32>
    %582 = vector.broadcast %17 : vector<1x32xf32> to vector<8x32xf32>
    %583 = arith.addf %581, %582 : vector<8x32xf32>
    "tpu.trace_start"() <{level = 10 : i32, message = "td,fd->tf"}> : () -> ()
    %cst_193 = arith.constant dense<0.000000e+00> : vector<8x64xf32>
    %584 = tpu.matmul %583, %5, %cst_193 {dimension_numbers = #tpu.dot_dimension_numbers<[1], [1], [0], [0], [0, 0, 1, 0], [], []>} : vector<8x32xf32>, vector<64x32xf32>, vector<8x64xf32> -> vector<8x64xf32>
    "tpu.trace_stop"() : () -> ()
    %585 = vector.broadcast %18 : vector<1x64xf32> to vector<8x64xf32>
    %586 = arith.addf %584, %585 : vector<8x64xf32>
    %cst_194 = arith.constant 5.000000e-01 : f32
    %587 = vector.broadcast %cst_194 : f32 to vector<8x64xf32>
    %588 = arith.mulf %587, %586 : vector<8x64xf32>
    %cst_195 = arith.constant 0.707106769 : f32
    %589 = vector.broadcast %cst_195 : f32 to vector<8x64xf32>
    %590 = arith.mulf %586, %589 : vector<8x64xf32>
    %591 = math.erf %590 : vector<8x64xf32>
    %cst_196 = arith.constant 1.000000e+00 : f32
    %592 = vector.broadcast %cst_196 : f32 to vector<8x64xf32>
    %593 = arith.addf %592, %591 : vector<8x64xf32>
    %594 = arith.mulf %588, %593 : vector<8x64xf32>
    "tpu.trace_start"() <{level = 10 : i32, message = "tf,fd->td"}> : () -> ()
    %cst_197 = arith.constant dense<0.000000e+00> : vector<8x32xf32>
    %595 = tpu.matmul %594, %6, %cst_197 {dimension_numbers = #tpu.dot_dimension_numbers<[1], [0], [0], [1], [0, 0, 1, 1], [], []>} : vector<8x64xf32>, vector<64x32xf32>, vector<8x32xf32> -> vector<8x32xf32>
    "tpu.trace_stop"() : () -> ()
    %596 = vector.broadcast %19 : vector<1x32xf32> to vector<8x32xf32>
    %597 = arith.addf %595, %596 : vector<8x32xf32>
    %598 = arith.addf %563, %597 : vector<8x32xf32>
    %c1_198 = arith.constant 1 : index
    %c0_199 = arith.constant 0 : index
    %c0_200 = arith.constant 0 : index
    %599 = vector.load %arg5[%c1_198, %c0_199, %c0_200] : memref<2x8x32xf32, #tpu.memory_space<vmem>>, vector<1x8x32xf32>
    %600 = vector.shape_cast %599 : vector<1x8x32xf32> to vector<8x32xf32>
    %601 = vector.shape_cast %598 : vector<8x32xf32> to vector<1x8x32xf32>
    tpu.vector_store %arg5[%c1_198, %c0_199, %c0_200], %601 {strides = array<i32>} : memref<2x8x32xf32, #tpu.memory_space<vmem>>, vector<1x8x32xf32>,
    %c1_201 = arith.constant 1 : index
    %c0_202 = arith.constant 0 : index
    %c0_203 = arith.constant 0 : index
    %602 = vector.load %arg6[%c1_201, %c0_202, %c0_203] : memref<2x8x8xf32, #tpu.memory_space<vmem>>, vector<1x8x8xf32>
    %603 = vector.shape_cast %602 : vector<1x8x8xf32> to vector<8x8xf32>
    %604 = vector.shape_cast %437 : vector<8x8xf32> to vector<1x8x8xf32>
    tpu.vector_store %arg6[%c1_201, %c0_202, %c0_203], %604 {strides = array<i32>} : memref<2x8x8xf32, #tpu.memory_space<vmem>>, vector<1x8x8xf32>,
    %c1_204 = arith.constant 1 : index
    %c0_205 = arith.constant 0 : index
    %c0_206 = arith.constant 0 : index
    %605 = vector.load %arg7[%c1_204, %c0_205, %c0_206] : memref<2x8x16xf32, #tpu.memory_space<vmem>>, vector<1x8x16xf32>
    %606 = vector.shape_cast %605 : vector<1x8x16xf32> to vector<8x16xf32>
    %607 = vector.shape_cast %562 : vector<8x16xf32> to vector<1x8x16xf32>
    tpu.vector_store %arg7[%c1_204, %c0_205, %c0_206], %607 {strides = array<i32>} : memref<2x8x16xf32, #tpu.memory_space<vmem>>, vector<1x8x16xf32>,
    return
  }
  func.func @transform_0(%arg0: i32) -> (i32, i32, i32) {
    %c0_i32 = arith.constant 0 : i32
    %c0_i32_0 = arith.constant 0 : i32
    %c0_i32_1 = arith.constant 0 : i32
    return %arg0, %c0_i32, %c0_i32_0 : i32, i32, i32
  }
  func.func @transform_1(%arg0: i32) -> (i32, i32, i32) {
    %c0_i32 = arith.constant 0 : i32
    %c0_i32_0 = arith.constant 0 : i32
    %c0_i32_1 = arith.constant 0 : i32
    return %arg0, %c0_i32, %c0_i32_0 : i32, i32, i32
  }
  func.func @transform_2(%arg0: i32) -> (i32, i32) {
    %c0_i32 = arith.constant 0 : i32
    %c0_i32_0 = arith.constant 0 : i32
    %c0_i32_1 = arith.constant 0 : i32
    return %c0_i32, %c0_i32_0 : i32, i32
  }
  func.func @transform_3(%arg0: i32) -> (i32, i32) {
    %c0_i32 = arith.constant 0 : i32
    %c0_i32_0 = arith.constant 0 : i32
    %c0_i32_1 = arith.constant 0 : i32
    return %c0_i32, %c0_i32_0 : i32, i32
  }
  func.func @transform_4(%arg0: i32) -> (i32, i32, i32) {
    %c0_i32 = arith.constant 0 : i32
    %c0_i32_0 = arith.constant 0 : i32
    %c0_i32_1 = arith.constant 0 : i32
    return %arg0, %c0_i32, %c0_i32_0 : i32, i32, i32
  }
  func.func @transform_5(%arg0: i32) -> (i32, i32, i32) {
    %c0_i32 = arith.constant 0 : i32
    %c0_i32_0 = arith.constant 0 : i32
    %c0_i32_1 = arith.constant 0 : i32
    return %arg0, %c0_i32, %c0_i32_0 : i32, i32, i32
  }
  func.func @transform_6(%arg0: i32) -> (i32, i32, i32) {
    %c0_i32 = arith.constant 0 : i32
    %c0_i32_0 = arith.constant 0 : i32
    %c0_i32_1 = arith.constant 0 : i32
    return %arg0, %c0_i32, %c0_i32_0 : i32, i32, i32
  }
}

</mosaic_0001>

<bundles_post_ra>
// kernel: tpu_custom_call.1
= control target key start
LH: loop header
LB: loop body
LE: loop exit
PB: predicated region body
PF: predicated region fallthrough
CT: control target
= control target key end

     0   :  { %12 = vsyncpa [#allocation3], 0  ;;  %vm75_vm0 = vcmask 261120   ;;  %s7365_s0 = inlined_call_operand.vmem [shape: f32[2,8,32], index: 0, kind: input, shape index: {}]   ;;  %s7366_s1 = inlined_call_operand.vmem [shape: f32[2,16,32], index: 1, kind: input, shape index: {}]   ;;  %s7367_s2 = inlined_call_operand.vmem [shape: f32[384,32], index: 2, kind: input, shape index: {}]   ;;  %s7368_s3 = inlined_call_operand.vmem [shape: f32[16,128], index: 3, kind: input, shape index: {}]   ;;  %s7369_s4 = inlined_call_operand.hbm [shape: f32[2,8,32], index: 4, kind: output, shape index: {0}]   ;;  %s7370_s5 = inlined_call_operand.hbm [shape: f32[2,8,8], index: 5, kind: output, shape index: {1}]   ;;  %s7371_s6 = inlined_call_operand.hbm [shape: f32[2,8,16], index: 6, kind: output, shape index: {2}]  }
   0x1   :  { %v6375_v0 = vld [vmem:[%s7365_s0] sm:$0xff] }
   0x2   :  { %13 = vsyncpa [#allocation5], 0  ;;  %v76_v1 = vsel %vm75_vm0, %v6375_v0, 0.0  ;;  %v22_v3 = vld [vmem:[%s7367_s2] sm:$0xff]  ;;  %v23_v4 = vld [vmem:[%s7367_s2 + $0x8] sm:$0xff]  ;;  %v6318_v5 = vmov 0.0|0.0   ;;  %v90_v30 = vlaneseq }
   0x3   :  { %77 = vadd.xlane.f32.xlu0 %v76_v1  ;;  %vm6381_vm1 = vmpackc.low %vm75_vm0, %vm75_vm0  ;;  %5852 = vmatprep.subr.bf16.mxu0 %v6318_v5  ;;  %v6392_v6 = vpack.c.bf16 %v23_v4, %v22_v3  ;;  %v24_v7 = vld [vmem:[%s7367_s2 + $0x10] sm:$0xff]  ;;  %v25_v8 = vld [vmem:[%s7367_s2 + $0x18] sm:$0xff]  ;;  %vm6319_vm2 = vmmov 0   ;;  %v6320_v24 = vmov 0.0   ;;  %s6321_s25 = smov 64   ;;  %s6322_s26 = smov 96  }
   0x4   :  { %v6404_v9 = vpack.c.bf16 %v25_v8, %v24_v7  ;;  %v26_v10 = vld [vmem:[%s7367_s2 + $0x20] sm:$0xff]  ;;  %v27_v11 = vld [vmem:[%s7367_s2 + $0x28] sm:$0xff]  ;;  %v28_v13 = vld [vmem:[%s7367_s2 + $0x30] sm:$0xff]  ;;  %5414 = vmatprep.mubr.msk.f32.mxu0 %vm6319_vm2, %v6320_v24  ;;  %5417 = vmatprep.subr.mxu1 %v6320_v24  ;;  %v6465_v32 = vshrl.u32 %v90_v30, 7  ;;  %s6323_s27 = smov 88   ;;  %vm217_vm3 = vcmask 64512  }
   0x5   :  { %5855 = vmatpush3.bf16.xpose.msk.msra.mxu0 %vm6381_vm1, %v6392_v6  ;;  %v6416_v12 = vpack.c.bf16 %v27_v11, %v26_v10  ;;  %v29_v14 = vld [vmem:[%s7367_s2 + $0x38] sm:$0xff]  ;;  %v30_v21 = vld [vmem:[%s7367_s2 + $0x40] sm:$0xff]  ;;  %v31_v22 = vld [vmem:[%s7367_s2 + $0x48] sm:$0xff]  ;;  %5419 = vmatprep.mubr.msk.f32.mxu1 %vm6319_vm2, %v6320_v24  ;;  %s6324_s28 = smov 120   ;;  %s6325_s29 = smov 56   ;;  %vm1481_vm5 = vcmask 130048  }
   0x6   :  { %5856 = vmatprep.subr.bf16.mxu0 %v6318_v5  ;;  %v6428_v15 = vpack.c.bf16 %v29_v14, %v28_v13  ;;  %v6442_v23 = vpack.c.bf16 %v31_v22, %v30_v21  ;;  %v32_v25 = vld [vmem:[%s7367_s2 + $0x50] sm:$0xff]  ;;  %v33_v26 = vld [vmem:[%s7367_s2 + $0x58] sm:$0xff]  ;;  %v92_v33 = vsub.s32 0, %v6465_v32  ;;  %v6471_v34 = vld [vmem:[%s7368_s3] sm:$0xff]  ;;  %v97_v35 = vsub.s32 1, %v6465_v32  ;;  %s6326_s30 = smov 80  }
   0x7   :  { %v6459_v27 = vpack.c.bf16 %v33_v26, %v32_v25  ;;  %v102_v42 = vsub.s32 2, %v6465_v32  ;;  %s6327_s7 = smov 112   ;;  %v34_v21 = vld [vmem:[%s7367_s2 + $0x60] sm:$0xff]  ;;  %s6328_s12 = smov 48   ;;  %vm6731_vm4 = vmpackc.low %vm217_vm3, %vm217_vm3  ;;  %vm2526_vm6 = vcmask 523264  }
   0x8   :  { %v6477_v36 = vrot.slane %v6471_v34, %v92_v33  ;;  %v6482_v39 = vrot.slane %v6471_v34, %v97_v35  ;;  %s6329_s13 = smov 72   ;;  %s6330_s14 = smov 104  }
   0x9   :  { %v6493_v43 = vrot.slane %v6471_v34, %v102_v42  ;;  %s6331_s17 = smov 40  }
   0xd   :  { %5859 = vmatpush3.bf16.xpose.msk.msra.mxu0 %vm6381_vm1, %v6404_v9 }
   0xe   :  { %5860 = vmatprep.subr.bf16.mxu0 %v6318_v5 }
  0x15   :  { %5863 = vmatpush3.bf16.xpose.msk.msra.mxu0 %vm6381_vm1, %v6416_v12 }
  0x16   :  { %5864 = vmatprep.subr.bf16.mxu0 %v6318_v5 }
  0x1d   :  { %5867 = vmatpush3.bf16.xpose.msk.msra.mxu0 %vm6381_vm1, %v6428_v15 }
  0x1e   :  { %5868 = vmatprep.subr.bf16.mxu0 %v6318_v5 }
  0x25   :  { %5871 = vmatpush3.bf16.xpose.msk.msra.mxu0 %vm6381_vm1, %v6442_v23 }
  0x26   :  { %5872 = vmatprep.subr.bf16.mxu0 %v6318_v5 }
  0x2d   :  { %5875 = vmatpush3.bf16.xpose.msk.msra.mxu0 %vm6381_vm1, %v6459_v27 }
  0x2e   :  { %5876 = vmatprep.subr.bf16.mxu0 %v6318_v5 }
  0x90   :  { %v78_v16 = vpop.xlane.xlu0 %77 }
  0x91   :  { %v80_v17 = vmul.f32 0.03125, %v78_v16 }
  0x93   :  { %v81_v18 = vsub.f32 %v6375_v0, %v80_v17 }
  0x95   :  { %v82_v19 = vmul.f32 %v81_v18, %v81_v18 }
  0x97   :  { %v83_v20 = vsel %vm75_vm0, %v82_v19, 0.0 }
  0x98   :  { %84 = vadd.xlane.f32.xlu0 %v83_v20  ;;  %v35_v20 = vld [vmem:[%s7367_s2 + $0x68] sm:$0xff] }
 0x125   :  { %v85_v28 = vpop.xlane.xlu0 %84 }
 0x126   :  { %v86_v29 = vmul.f32 0.03125, %v85_v28 }
 0x128   :  { %v87_v31 = vadd.f32 1e-05, %v86_v29 }
 0x12a   :  { %6165 = vrsqrt.f32 %v87_v31 }
 0x134   :  { %v6166_v37 = vpop.eup %6165 }
 0x135   :  { %v89_v38 = vmul.f32 %v6166_v37, %v81_v18 }
 0x137   :  { %v94_v40 = vmul.f32 %v6477_v36, %v89_v38 }
 0x139   :  { %v99_v41 = vadd.f32 %v6482_v39, %v94_v40 }
 0x13b   :  { %5415 = vmatmul.mubr.msk.f32.vlgmr.msra.gmra.mrb[0].mxu0 %vm75_vm0, %v99_v41 }
 0x13c   :  { %5485 = vmatprep.mubr.msk.f32.mxu0 %vm6319_vm2, %v6320_v24 }
 0x20e   :  { %v209_v44 = vpop.f32.mrb[0].mxu0 }
 0x20f   :  { %v6496_v45 = vadd.f32 %v209_v44, %v6493_v43  ;;  %v5416_v46 = vpop.f32.mrb[1].mxu0 }
 0x211   :  { %305 = vrot.lane.b32.xlu0 %v6496_v45, %s6321_s25  ;;  %215 = vrot.lane.b32.xlu1 %v6496_v45, %s6322_s26  ;;  %v6506_v48 = vmul.f32 0.35355338, %v6496_v45 }
 0x215   :  { %383 = vrot.lane.b32.xlu0 %v6496_v45, %s6323_s27 }
 0x283   :  { %v216_v47 = vpop.permute.xlu1 %215  ;;  %v306_v49 = vpop.permute.xlu0 %305 }
 0x284   :  { %5418 = vmatpush3.xpose.msk.msra.mxu1 %vm217_vm3, %v216_v47 }
 0x285   :  { %5422 = vmatprep.subr.mxu1 %v6320_v24 }
 0x287   :  { %5420 = vmatmul.mubr.msk.f32.vlgmr.msra.gmra.mrb[0].mxu1 %vm217_vm3, %v6506_v48  ;;  %v384_v58 = vpop.permute.xlu0 %383 }
 0x288   :  { %5423 = vmatpush3.msra.mxu1 %v306_v49  ;;  %5424 = vmatprep.mubr.msk.f32.mxu1 %vm6319_vm2, %v6320_v24 }
 0x289   :  { %5427 = vmatprep.subr.mxu1 %v6320_v24 }
 0x35a   :  { %v289_v50 = vpop.f32.mrb[0].mxu1 }
 0x35b   :  { %v5421_v51 = vpop.f32.mrb[1].mxu1  ;;  %v293_v52 = vsel %vm217_vm3, %v289_v50, -inf }
 0x35c   :  { %294 = vmax.xlane.f32.xlu1 %v293_v52 }
 0x3e9   :  { %v295_v53 = vpop.xlane.xlu1 %294 }
 0x3ea   :  { %v296_v54 = vsub.f32 %v289_v50, %v295_v53 }
 0x3ec   :  { %v297_v55 = vmul.f32 1.442695, %v296_v54 }
 0x3ee   :  { %6167 = vpow2.f32 %v297_v55 }
 0x3f8   :  { %v6168_v56 = vpop.eup %6167 }
 0x3f9   :  { %v299_v57 = vsel %vm217_vm3, %v6168_v56, 0.0 }
 0x3fa   :  { %300 = vadd.xlane.f32.xlu0 %v299_v57  ;;  %v36_v57 = vld [vmem:[%s7367_s2 + $0x70] sm:$0xff] }
 0x410   :  { %381 = vrot.lane.b32.xlu0 %v6506_v48, %s6324_s28 }
 0x487   :  { %v301_v59 = vpop.xlane.xlu0 %300 }
 0x488   :  { %6169 = vrcp.f32 %v301_v59 }
 0x48b   :  { %v382_v62 = vpop.permute.xlu0 %381 }
 0x492   :  { %v6170_v60 = vpop.eup %6169 }
 0x493   :  { %v6518_v61 = vmul.f32 %v6170_v60, %v6168_v56 }
 0x495   :  { %5425 = vmatmul.mubr.msk.f32.vlgmr.msra.gmra.mrb[2].mxu1 %vm217_vm3, %v6518_v61 }
 0x496   :  { %5428 = vmatpush3.xpose.msk.msra.mxu1 %vm217_vm3, %v384_v58  ;;  %5429 = vmatprep.mubr.msk.f32.mxu1 %vm6319_vm2, %v6320_v24 }
 0x497   :  { %5432 = vmatprep.subr.mxu1 %v6320_v24 }
 0x499   :  { %5430 = vmatmul.mubr.msk.f32.vlgmr.msra.gmra.mrb[4].mxu1 %vm217_vm3, %v382_v62 }
 0x49a   :  { %5434 = vmatprep.mubr.msk.f32.mxu1 %vm6319_vm2, %v6320_v24 }
 0x568   :  { %v377_v63 = vpop.f32.mrb[2].mxu1 }
 0x569   :  { %v5426_v1 = vpop.f32.mrb[3].mxu1 }
 0x56c   :  { %v455_v3 = vpop.f32.mrb[4].mxu1 }
 0x56d   :  { %v5431_v4 = vpop.f32.mrb[5].mxu1  ;;  %v459_v7 = vsel %vm217_vm3, %v455_v3, -inf }
 0x56e   :  { %460 = vmax.xlane.f32.xlu1 %v459_v7 }
 0x57f   :  { %471 = vrot.lane.b32.xlu1 %v6496_v45, %s6325_s29 }
 0x583   :  { %695 = vrot.lane.b32.xlu1 %v6496_v45, %s6326_s30 }
 0x587   :  { %693 = vrot.lane.b32.xlu1 %v6506_v48, %s6327_s7 }
 0x5fb   :  { %v461_v8 = vpop.xlane.xlu1 %460 }
 0x5fc   :  { %v462_v10 = vsub.f32 %v455_v3, %v461_v8 }
 0x5fe   :  { %v463_v11 = vmul.f32 1.442695, %v462_v10 }
 0x5ff   :  { %v472_v13 = vpop.permute.xlu1 %471 }
 0x600   :  { %6171 = vpow2.f32 %v463_v11  ;;  %5433 = vmatpush3.msra.mxu1 %v472_v13 }
 0x601   :  { %5437 = vmatprep.subr.mxu1 %v6320_v24 }
 0x603   :  { %v696_v26 = vpop.permute.xlu1 %695 }
 0x607   :  { %v694_v28 = vpop.permute.xlu1 %693 }
 0x60a   :  { %v6172_v14 = vpop.eup %6171 }
 0x60b   :  { %v465_v16 = vsel %vm217_vm3, %v6172_v14, 0.0 }
 0x60c   :  { %466 = vadd.xlane.f32.xlu0 %v465_v16 }
 0x699   :  { %v467_v17 = vpop.xlane.xlu0 %466 }
 0x69a   :  { %6173 = vrcp.f32 %v467_v17 }
 0x6a4   :  { %v6174_v18 = vpop.eup %6173 }
 0x6a5   :  { %v469_v19 = vmul.f32 %v6174_v18, %v6172_v14 }
 0x6a7   :  { %5435 = vmatmul.mubr.msk.f32.vlgmr.msra.gmra.mrb[6].mxu1 %vm217_vm3, %v469_v19  ;;  %v470_v55 = vadd.f32 %v469_v19, %v6518_v61 }
 0x6a8   :  { %5438 = vmatpush3.msra.mxu1 %v35_v20  ;;  %5439 = vmatprep.mubr.msk.f32.mxu1 %vm6319_vm2, %v6320_v24 }
 0x6a9   :  { %5442 = vmatprep.subr.mxu1 %v6320_v24 }
 0x77a   :  { %v543_v22 = vpop.f32.mrb[6].mxu1 }
 0x77b   :  { %v5436_v25 = vpop.f32.mrb[7].mxu1  ;;  %5440 = vmatmul.mubr.msk.f32.vlgmr.msra.gmra.mrb[8].mxu1 %vm217_vm3, %v543_v22 }
 0x77c   :  { %5443 = vmatpush3.msra.mxu1 %v34_v21  ;;  %5444 = vmatprep.mubr.msk.f32.mxu1 %vm6319_vm2, %v6320_v24 }
 0x77d   :  { %5447 = vmatprep.subr.mxu1 %v6320_v24 }
 0x77f   :  { %5445 = vmatmul.mubr.msk.f32.vlgmr.msra.gmra.mrb[10].mxu1 %vm217_vm3, %v377_v63 }
 0x780   :  { %5449 = vmatprep.mubr.msk.f32.mxu1 %vm6319_vm2, %v6320_v24 }
 0x783   :  { %5448 = vmatpush3.xpose.msk.msra.mxu1 %vm217_vm3, %v696_v26  ;;  %v1175_v26 = vsub.s32 3, %v6465_v32 }
 0x784   :  { %5452 = vmatprep.subr.mxu1 %v6320_v24 }
 0x786   :  { %5450 = vmatmul.mubr.msk.f32.vlgmr.msra.gmra.mrb[12].mxu1 %vm217_vm3, %v694_v28  ;;  %v6605_v28 = vrot.slane %v6471_v34, %v1175_v26 }
 0x787   :  { %5454 = vmatprep.mubr.msk.f32.mxu1 %vm6319_vm2, %v6320_v24 }
 0x84e   :  { %v616_v29 = vpop.f32.mrb[8].mxu1 }
 0x84f   :  { %v5441_v30 = vpop.f32.mrb[9].mxu1 }
 0x852   :  { %v689_v31 = vpop.f32.mrb[10].mxu1 }
 0x853   :  { %v690_v37 = vadd.f32 %v689_v31, %v616_v29  ;;  %v5446_v38 = vpop.f32.mrb[11].mxu1 }
 0x859   :  { %v767_v40 = vpop.f32.mrb[12].mxu1 }
 0x85a   :  { %v5451_v41 = vpop.f32.mrb[13].mxu1  ;;  %v771_v44 = vsel %vm217_vm3, %v767_v40, -inf }
 0x85b   :  { %772 = vmax.xlane.f32.xlu1 %v771_v44  ;;  %v42_v41 = vld [vmem:[%s7367_s2 + $0xa0] sm:$0xff]  ;;  %v43_v44 = vld [vmem:[%s7367_s2 + $0xa8] sm:$0xff] }
 0x8e8   :  { %v773_v46 = vpop.xlane.xlu1 %772 }
 0x8e9   :  { %v774_v47 = vsub.f32 %v767_v40, %v773_v46  ;;  %v44_v46 = vld [vmem:[%s7367_s2 + $0xb0] sm:$0xff] }
 0x8eb   :  { %v775_v49 = vmul.f32 1.442695, %v774_v47  ;;  %v6622_v47 = vpack.c.bf16 %v43_v44, %v42_v41 }
 0x8ed   :  { %6175 = vpow2.f32 %v775_v49 }
 0x8f7   :  { %v6176_v50 = vpop.eup %6175 }
 0x8f8   :  { %v777_v51 = vsel %vm217_vm3, %v6176_v50, 0.0 }
 0x8f9   :  { %778 = vadd.xlane.f32.xlu0 %v777_v51  ;;  %v47_v51 = vld [vmem:[%s7367_s2 + $0xc8] sm:$0xff] }
 0x90f   :  { %783 = vrot.lane.b32.xlu0 %v6496_v45, %s6328_s12 }
 0x913   :  { %935 = vrot.lane.b32.xlu0 %v6496_v45, %s6329_s13 }
 0x917   :  { %933 = vrot.lane.b32.xlu0 %v6506_v48, %s6330_s14 }
 0x986   :  { %v779_v52 = vpop.xlane.xlu0 %778 }
 0x987   :  { %6177 = vrcp.f32 %v779_v52 }
 0x98a   :  { %v784_v53 = vpop.permute.xlu0 %783 }
 0x98b   :  { %5453 = vmatpush3.msra.mxu1 %v784_v53 }
 0x98c   :  { %5457 = vmatprep.subr.mxu1 %v6320_v24 }
 0x98e   :  { %v936_v48 = vpop.permute.xlu0 %935 }
 0x991   :  { %v6178_v54 = vpop.eup %6177 }
 0x992   :  { %v781_v56 = vmul.f32 %v6178_v54, %v6176_v50  ;;  %v934_v61 = vpop.permute.xlu0 %933  ;;  %v46_v50 = vld [vmem:[%s7367_s2 + $0xc0] sm:$0xff] }
 0x993   :  { %v6644_v52 = vpack.c.bf16 %v47_v51, %v46_v50 }
 0x994   :  { %5455 = vmatmul.mubr.msk.f32.vlgmr.msra.gmra.mrb[14].mxu1 %vm217_vm3, %v781_v56  ;;  %v782_v58 = vadd.f32 %v781_v56, %v470_v55 }
 0x995   :  { %5458 = vmatpush3.msra.mxu1 %v36_v57  ;;  %5459 = vmatprep.mubr.msk.f32.mxu1 %vm6319_vm2, %v6320_v24 }
 0x996   :  { %5462 = vmatprep.subr.mxu1 %v6320_v24 }
 0xa67   :  { %v855_v59 = vpop.f32.mrb[14].mxu1 }
 0xa68   :  { %v5456_v60 = vpop.f32.mrb[15].mxu1  ;;  %5460 = vmatmul.mubr.msk.f32.vlgmr.msra.gmra.mrb[16].mxu1 %vm217_vm3, %v855_v59 }
 0xa69   :  { %5463 = vmatpush3.xpose.msk.msra.mxu1 %vm217_vm3, %v936_v48  ;;  %5464 = vmatprep.mubr.msk.f32.mxu1 %vm6319_vm2, %v6320_v24  ;;  %v49_v48 = vld [vmem:[%s7367_s2 + $0xd8] sm:$0xff]  ;;  %v38_v60 = vld [vmem:[%s7367_s2 + $0x80] sm:$0xff] }
 0xa6a   :  { %5467 = vmatprep.subr.mxu1 %v6320_v24 }
 0xa6c   :  { %5465 = vmatmul.mubr.msk.f32.vlgmr.msra.gmra.mrb[18].mxu1 %vm217_vm3, %v934_v61  ;;  %v39_v61 = vld [vmem:[%s7367_s2 + $0x88] sm:$0xff] }
 0xa6d   :  { %5469 = vmatprep.mubr.msk.f32.mxu1 %vm6319_vm2, %v6320_v24 }
 0xb3b   :  { %v928_v62 = vpop.f32.mrb[16].mxu1 }
 0xb3c   :  { %v932_v63 = vadd.f32 %v928_v62, %v690_v37  ;;  %v5461_v1 = vpop.f32.mrb[17].mxu1  ;;  %v6674_v62 = vpack.c.bf16 %v39_v61, %v38_v60 }
 0xb3d   :  { %v74_v1 = vld [vmem:[%s7366_s1 + $0x8] sm:$0xff] }
 0xb3e   :  { %5879 = vmatpush3.bf16.xpose.msk.msra.mxu0 %vm6381_vm1, %v6674_v62 }
 0xb3f   :  { %v1007_v3 = vpop.f32.mrb[18].mxu1  ;;  %5880 = vmatprep.subr.bf16.mxu0 %v6318_v5 }
 0xb40   :  { %v5466_v4 = vpop.f32.mrb[19].mxu1  ;;  %v1011_v7 = vsel %vm217_vm3, %v1007_v3, -inf }
 0xb41   :  { %1012 = vmax.xlane.f32.xlu1 %v1011_v7  ;;  %v41_v4 = vld [vmem:[%s7367_s2 + $0x98] sm:$0xff] }
 0xb52   :  { %1023 = vrot.lane.b32.xlu1 %v6496_v45, %s6331_s17  ;;  %v6593_v45 = vld [vmem:[%s7367_s2 + $0x78] sm:$0xff] }
 0xbce   :  { %v1013_v8 = vpop.xlane.xlu1 %1012 }
 0xbcf   :  { %v1014_v10 = vsub.f32 %v1007_v3, %v1013_v8  ;;  %v40_v3 = vld [vmem:[%s7367_s2 + $0x90] sm:$0xff]  ;;  %v1205_v8 = vsub.s32 6, %v6465_v32 }
 0xbd0   :  { %v6698_v7 = vpack.c.bf16 %v41_v4, %v40_v3 }
 0xbd1   :  { %v1015_v11 = vmul.f32 1.442695, %v1014_v10  ;;  %v6708_v10 = vrot.slane %v6471_v34, %v1205_v8 }
 0xbd2   :  { %v1024_v13 = vpop.permute.xlu1 %1023  ;;  %5883 = vmatpush3.bf16.xpose.msk.msra.mxu0 %vm6381_vm1, %v6698_v7 }
 0xbd3   :  { %6179 = vpow2.f32 %v1015_v11  ;;  %5468 = vmatpush3.msra.mxu1 %v1024_v13  ;;  %5912 = vmatprep.subr.bf16.mxu0 %v6318_v5 }
 0xbd4   :  { %5472 = vmatprep.subr.mxu1 %v6320_v24 }
 0xbdd   :  { %v6180_v14 = vpop.eup %6179 }
 0xbde   :  { %v1017_v16 = vsel %vm217_vm3, %v6180_v14, 0.0 }
 0xbdf   :  { %1018 = vadd.xlane.f32.xlu0 %v1017_v16  ;;  %v1195_v16 = vsub.s32 4, %v6465_v32 }
 0xc6c   :  { %v1019_v17 = vpop.xlane.xlu0 %1018 }
 0xc6d   :  { %6181 = vrcp.f32 %v1019_v17  ;;  %v1200_v17 = vsub.s32 5, %v6465_v32 }
 0xc77   :  { %v6182_v18 = vpop.eup %6181 }
 0xc78   :  { %v1021_v19 = vmul.f32 %v6182_v18, %v6180_v14  ;;  %v6715_v18 = vrot.slane %v6471_v34, %v1195_v16 }
 0xc7a   :  { %5470 = vmatmul.mubr.msk.f32.vlgmr.msra.gmra.mrb[20].mxu1 %vm217_vm3, %v1021_v19  ;;  %v1022_v20 = vadd.f32 %v1021_v19, %v782_v58  ;;  %v48_v58 = vld [vmem:[%s7367_s2 + $0xd0] sm:$0xff] }
 0xc7b   :  { %5473 = vmatpush3.msra.mxu1 %v6593_v45  ;;  %5474 = vmatprep.mubr.msk.f32.mxu1 %vm6319_vm2, %v6320_v24  ;;  %v6663_v59 = vpack.c.bf16 %v49_v48, %v48_v58 }
 0xc7c   :  { %v1178_v21 = vmul.f32 0.25, %v1022_v20  ;;  %5886 = vmatprep.subr.msk.bf16.mxu1 %vm6381_vm1, %v6622_v47 }
 0xc7e   :  { %2602 = vst.msk [vmem:[#allocation4] sm:$0xff] %vm217_vm3, %v1178_v21  ;;  %v6718_v21 = vrot.slane %v6471_v34, %v1200_v17 }
 0xd4d   :  { %v1095_v22 = vpop.f32.mrb[20].mxu1 }
 0xd4e   :  { %v5471_v25 = vpop.f32.mrb[21].mxu1  ;;  %5475 = vmatmul.mubr.msk.f32.vlgmr.msra.gmra.mrb[22].mxu1 %vm217_vm3, %v1095_v22 }
 0xd4f   :  { %5889 = vmatpush3.bf16.xpose.msk.msra.mxu1 %vm6381_vm1, %v6622_v47 }
 0xe21   :  { %v1168_v29 = vpop.f32.mrb[22].mxu1 }
 0xe22   :  { %v1172_v30 = vadd.f32 %v1168_v29, %v932_v63  ;;  %v5476_v31 = vpop.f32.mrb[23].mxu1  ;;  %v73_v63 = vld [vmem:[%s7366_s1] sm:$0xff] }
 0xe23   :  { %5504 = vmatprep.mubr.msk.f32.mxu1 %vm75_vm0, %v73_v63 }
 0xe24   :  { %v1177_v37 = vadd.f32 %v6605_v28, %v1172_v30 }
 0xe26   :  { %v6609_v38 = vadd.f32 %v1177_v37, %v6375_v0  ;;  %v45_v0 = vld [vmem:[%s7367_s2 + $0xb8] sm:$0xff] }
 0xe27   :  { %v6627_v49 = vpack.c.bf16 %v45_v0, %v44_v46 }
 0xe28   :  { %v1180_v40 = vsel %vm75_vm0, %v6609_v38, 0.0 }
 0xe29   :  { %1181 = vadd.xlane.f32.xlu1 %v1180_v40  ;;  %5892 = vmatprep.subr.msk.bf16.mxu1 %vm6381_vm1, %v6627_v49 }
 0xe2a   :  { %5895 = vmatpush3.bf16.xpose.msk.msra.mxu1 %vm6381_vm1, %v6627_v49 }
 0xe2b   :  { %5898 = vmatprep.subr.msk.bf16.mxu1 %vm6381_vm1, %v6644_v52 }
 0xe32   :  { %5901 = vmatpush3.bf16.xpose.msk.msra.mxu1 %vm6381_vm1, %v6644_v52 }
 0xe33   :  { %5904 = vmatprep.subr.msk.bf16.mxu1 %vm6381_vm1, %v6663_v59 }
 0xe3a   :  { %5907 = vmatpush3.bf16.xpose.msk.msra.mxu1 %vm6381_vm1, %v6663_v59 }
 0xe3b   :  { %5908 = vmatprep.subr.bf16.mxu1 %v6318_v5 }
 0xe41   :  { %5505 = vmatmul.mubr.msk.f32.vlgmr.msra.gmra.mrb[24].mxu1 %vm75_vm0, %v74_v1 }
 0xe42   :  { %5511 = vmatprep.mubr.msk.f32.mxu1 %vm6319_vm2, %v6320_v24 }
 0xeb6   :  { %v1182_v53 = vpop.xlane.xlu1 %1181 }
 0xeb7   :  { %v1183_v54 = vmul.f32 0.03125, %v1182_v53 }
 0xeb9   :  { %v1184_v55 = vsub.f32 %v6609_v38, %v1183_v54 }
 0xebb   :  { %v1185_v56 = vmul.f32 %v1184_v55, %v1184_v55 }
 0xebd   :  { %v1186_v57 = vsel %vm75_vm0, %v1185_v56, 0.0 }
 0xebe   :  { %1187 = vadd.xlane.f32.xlu0 %v1186_v57 }
 0xed4   :  { %1293 = vrot.lane.b32.xlu0 %v6708_v10, %s6322_s26 }
 0xf14   :  { %v5506_v30 = vpop.f32.mrb[24].mxu1 }
 0xf15   :  { %v1392_v37 = vpop.f32.mrb[25].mxu1 }
 0xf4b   :  { %v1188_v11 = vpop.xlane.xlu0 %1187 }
 0xf4c   :  { %v1189_v13 = vmul.f32 0.03125, %v1188_v11 }
 0xf4e   :  { %v1190_v14 = vadd.f32 1e-05, %v1189_v13 }
 0xf4f   :  { %v6725_v29 = vpop.permute.xlu0 %1293 }
 0xf50   :  { %6183 = vrsqrt.f32 %v1190_v14  ;;  %v1398_v31 = vadd.f32 %v5506_v30, %v6725_v29  ;;  %v1393_v40 = vadd.f32 %v1392_v37, %v6725_v29 }
 0xf52   :  { %v5909_v44 = vpack.c.bf16 %v1398_v31, %v1393_v40  ;;  %v6735_v46 = vpack.i.bf16 %v1398_v31, %v1393_v40 }
 0xf54   :  { %5911 = vmatpush3.bf16.xpose.msk.msra.mxu1 %vm6731_vm4, %v5909_v44 }
 0xf55   :  { %5919 = vmatprep.subr.bf16.mxu1 %v6318_v5 }
 0xf5a   :  { %v6184_v19 = vpop.eup %6183 }
 0xf5b   :  { %v1192_v20 = vmul.f32 %v6184_v19, %v1184_v55 }
 0xf5d   :  { %v1197_v22 = vmul.f32 %v6715_v18, %v1192_v20 }
 0xf5f   :  { %v1202_v25 = vadd.f32 %v6718_v21, %v1197_v22 }
 0xf61   :  { %5486 = vmatmul.mubr.msk.f32.vlgmr.msra.gmra.mrb[2].mxu0 %vm75_vm0, %v1202_v25 }
 0xf62   :  { %5518 = vmatprep.mubr.msk.f32.mxu0 %vm6319_vm2, %v6320_v24 }
0x1034   :  { %v1288_v0 = vpop.f32.mrb[2].mxu0 }
0x1035   :  { %v1289_v50 = vadd.f32 %v1288_v0, %v6708_v10  ;;  %v5487_v51 = vpop.f32.mrb[3].mxu0 }
0x1037   :  { %v1401_v53 = vmul.f32 0.35355338, %v1289_v50 }
0x1039   :  { %5512 = vmatmul.mubr.msk.f32.vlgmr.msra.gmra.mrb[26].mxu1 %vm217_vm3, %v1401_v53 }
0x103a   :  { %5532 = vmatprep.mubr.msk.f32.mxu1 %vm6319_vm2, %v6320_v24 }
0x110c   :  { %v1477_v54 = vpop.f32.mrb[26].mxu1 }
0x110d   :  { %v5513_v55 = vpop.f32.mrb[27].mxu1  ;;  %v1482_v56 = vsel %vm1481_vm5, %v1477_v54, -inf }
0x110e   :  { %1483 = vmax.xlane.f32.xlu1 %v1482_v56 }
0x111f   :  { %6096 = vrot.lane.b32.xlu1 %v6735_v46, %s6322_s26 }
0x1123   :  { %6101 = vrot.lane.b32.xlu1 %v6735_v46, %s6324_s28 }
0x1127   :  { %1573 = vrot.lane.b32.xlu1 %v1401_v53, %s6324_s28 }
0x119b   :  { %v1484_v57 = vpop.xlane.xlu1 %1483 }
0x119c   :  { %v1485_v58 = vsub.f32 %v1477_v54, %v1484_v57  ;;  %v6776_v54 = vld [vmem:[%s7367_s2 + $0xe8] sm:$0xff] }
0x119e   :  { %v1486_v48 = vmul.f32 1.442695, %v1485_v58 }
0x119f   :  { %v6097_v60 = vpop.permute.xlu1 %6096 }
0x11a0   :  { %6185 = vpow2.f32 %v1486_v48  ;;  %v6099_v61 = vunpack.i.h.bf16 %v6097_v60  ;;  %v6098_v63 = vunpack.i.l.bf16 %v6097_v60 }
0x11a2   :  { %v5913_v1 = vpack.c.bf16 %v6099_v61, %v6098_v63  ;;  %v6787_v63 = vld [vmem:[%s7367_s2 + $0xe0] sm:$0xff] }
0x11a3   :  { %v6102_v11 = vpop.permute.xlu1 %6101 }
0x11a4   :  { %5914 = vmatpush3.bf16.msra.mxu0 %v5913_v1  ;;  %v6104_v13 = vunpack.i.h.bf16 %v6102_v11  ;;  %v6103_v14 = vunpack.i.l.bf16 %v6102_v11 }
0x11a5   :  { %5915 = vmatprep.subr.bf16.mxu0 %v6318_v5 }
0x11a6   :  { %v5916_v19 = vpack.c.bf16 %v6104_v13, %v6103_v14 }
0x11a7   :  { %v1574_v20 = vpop.permute.xlu1 %1573 }
0x11aa   :  { %v6186_v3 = vpop.eup %6185 }
0x11ab   :  { %v1488_v4 = vsel %vm1481_vm5, %v6186_v3, 0.0 }
0x11ac   :  { %1489 = vadd.xlane.f32.xlu0 %v1488_v4 }
0x1239   :  { %v1490_v8 = vpop.xlane.xlu0 %1489 }
0x123a   :  { %6187 = vrcp.f32 %v1490_v8 }
0x1244   :  { %v6188_v16 = vpop.eup %6187 }
0x1245   :  { %v6752_v17 = vmul.f32 %v6188_v16, %v6186_v3 }
0x1247   :  { %5519 = vmatmul.mubr.msk.f32.vlgmr.msra.gmra.mrb[4].mxu0 %vm1481_vm5, %v6752_v17 }
0x1248   :  { %5918 = vmatpush3.bf16.xpose.msk.msra.mxu0 %vm6731_vm4, %v5916_v19  ;;  %5525 = vmatprep.mubr.msk.f32.mxu0 %vm6319_vm2, %v6320_v24 }
0x1249   :  { %5535 = vmatprep.subr.mxu0 %v6320_v24 }
0x124f   :  { %5526 = vmatmul.mubr.msk.f32.vlgmr.msra.gmra.mrb[6].mxu0 %vm217_vm3, %v1574_v20 }
0x1250   :  { %5537 = vmatprep.mubr.msk.f32.mxu0 %vm6319_vm2, %v6320_v24  ;;  %5536 = vmatpush3.msra.mxu0 %v6776_v54 }
0x1251   :  { %5922 = vmatprep.subr.bf16.mxu0 %v6318_v5 }
0x131a   :  { %v1569_v22 = vpop.f32.mrb[4].mxu0 }
0x131b   :  { %v5520_v25 = vpop.f32.mrb[5].mxu0 }
0x1322   :  { %v1651_v30 = vpop.f32.mrb[6].mxu0 }
0x1323   :  { %v5527_v31 = vpop.f32.mrb[7].mxu0  ;;  %v1655_v37 = vsel %vm1481_vm5, %v1651_v30, -inf }
0x1324   :  { %1656 = vmax.xlane.f32.xlu1 %v1655_v37 }
0x1335   :  { %6116 = vrot.lane.b32.xlu1 %v6735_v46, %s6330_s14 }
0x13b1   :  { %v1657_v40 = vpop.xlane.xlu1 %1656 }
0x13b2   :  { %v1658_v44 = vsub.f32 %v1651_v30, %v1657_v40 }
0x13b4   :  { %v1659_v0 = vmul.f32 1.442695, %v1658_v44 }
0x13b5   :  { %v6117_v11 = vpop.permute.xlu1 %6116 }
0x13b6   :  { %6189 = vpow2.f32 %v1659_v0  ;;  %v6119_v14 = vunpack.i.h.bf16 %v6117_v11  ;;  %v6118_v16 = vunpack.i.l.bf16 %v6117_v11 }
0x13c0   :  { %v6190_v50 = vpop.eup %6189 }
0x13c1   :  { %v1661_v51 = vsel %vm1481_vm5, %v6190_v50, 0.0 }
0x13c2   :  { %1662 = vadd.xlane.f32.xlu0 %v1661_v51 }
0x13d8   :  { %6106 = vrot.lane.b32.xlu0 %v6735_v46, %s6323_s27 }
0x13dc   :  { %6111 = vrot.lane.b32.xlu0 %v6735_v46, %s6327_s7 }
0x13e0   :  { %1892 = vrot.lane.b32.xlu0 %v1401_v53, %s6327_s7 }
0x13e4   :  { %2139 = vrot.lane.b32.xlu0 %v1401_v53, %s6330_s14 }
0x144f   :  { %v1663_v55 = vpop.xlane.xlu0 %1662 }
0x1450   :  { %6191 = vrcp.f32 %v1663_v55 }
0x1453   :  { %v6107_v56 = vpop.permute.xlu0 %6106 }
0x1454   :  { %v6109_v57 = vunpack.i.h.bf16 %v6107_v56  ;;  %v6108_v58 = vunpack.i.l.bf16 %v6107_v56 }
0x1456   :  { %v5920_v48 = vpack.c.bf16 %v6109_v57, %v6108_v58 }
0x1457   :  { %v6112_v53 = vpop.permute.xlu0 %6111 }
0x1458   :  { %5921 = vmatpush3.bf16.msra.mxu1 %v5920_v48  ;;  %v6114_v1 = vunpack.i.h.bf16 %v6112_v53  ;;  %v6113_v3 = vunpack.i.l.bf16 %v6112_v53 }
0x1459   :  { %5540 = vmatprep.subr.mxu1 %v6320_v24 }
0x145a   :  { %v6192_v60 = vpop.eup %6191  ;;  %v5923_v4 = vpack.c.bf16 %v6114_v1, %v6113_v3 }
0x145b   :  { %v6782_v61 = vmul.f32 %v6192_v60, %v6190_v50  ;;  %v1893_v25 = vpop.permute.xlu0 %1892 }
0x145d   :  { %5533 = vmatmul.mubr.msk.f32.vlgmr.msra.gmra.mrb[28].mxu1 %vm1481_vm5, %v6782_v61 }
0x145e   :  { %5541 = vmatpush3.msra.mxu1 %v6787_v63  ;;  %5542 = vmatprep.mubr.msk.f32.mxu1 %vm6319_vm2, %v6320_v24 }
0x145f   :  { %5926 = vmatprep.subr.bf16.mxu1 %v6318_v5  ;;  %v2140_v30 = vpop.permute.xlu0 %2139 }
0x1461   :  { %5543 = vmatmul.mubr.msk.f32.vlgmr.msra.gmra.mrb[30].mxu1 %vm217_vm3, %v1569_v22  ;;  %v5930_v22 = vpack.c.bf16 %v6119_v14, %v6118_v16 }
0x1462   :  { %5556 = vmatprep.mubr.msk.f32.mxu1 %vm6319_vm2, %v6320_v24 }
0x1530   :  { %v1742_v8 = vpop.f32.mrb[28].mxu1 }
0x1531   :  { %v5534_v13 = vpop.f32.mrb[29].mxu1  ;;  %5538 = vmatmul.mubr.msk.f32.vlgmr.msra.gmra.mrb[8].mxu0 %vm217_vm3, %v1742_v8 }
0x1532   :  { %5925 = vmatpush3.bf16.xpose.msk.msra.mxu0 %vm6731_vm4, %v5923_v4  ;;  %5549 = vmatprep.mubr.msk.f32.mxu0 %vm6319_vm2, %v6320_v24 }
0x1533   :  { %5929 = vmatprep.subr.bf16.mxu0 %v6318_v5 }
0x1534   :  { %v1888_v19 = vpop.f32.mrb[30].mxu1 }
0x1535   :  { %v5544_v20 = vpop.f32.mrb[31].mxu1 }
0x1539   :  { %5550 = vmatmul.mubr.msk.f32.vlgmr.msra.gmra.mrb[10].mxu0 %vm217_vm3, %v1893_v25 }
0x153a   :  { %5932 = vmatpush3.bf16.xpose.msk.msra.mxu0 %vm6731_vm4, %v5930_v22  ;;  %5568 = vmatprep.mubr.msk.f32.mxu0 %vm6319_vm2, %v6320_v24 }
0x153b   :  { %5936 = vmatprep.subr.bf16.mxu0 %v6318_v5 }
0x1541   :  { %5569 = vmatmul.mubr.msk.f32.vlgmr.msra.gmra.mrb[12].mxu0 %vm217_vm3, %v2140_v30 }
0x1542   :  { %5599 = vmatprep.mubr.msk.f32.mxu0 %vm6319_vm2, %v6320_v24 }
0x1604   :  { %v1815_v31 = vpop.f32.mrb[8].mxu0 }
0x1605   :  { %v6813_v37 = vadd.f32 %v1888_v19, %v1815_v31  ;;  %v5539_v40 = vpop.f32.mrb[9].mxu0  ;;  %v1666_v19 = vadd.f32 %v6782_v61, %v6752_v17  ;;  %v6832_v31 = vld [vmem:[%s7367_s2 + $0xf0] sm:$0xff] }
0x160c   :  { %v1970_v44 = vpop.f32.mrb[10].mxu0 }
0x160d   :  { %v5551_v0 = vpop.f32.mrb[11].mxu0  ;;  %v1974_v50 = vsel %vm1481_vm5, %v1970_v44, -inf }
0x160e   :  { %1975 = vmax.xlane.f32.xlu0 %v1974_v50 }
0x1614   :  { %v2217_v51 = vpop.f32.mrb[12].mxu0 }
0x1615   :  { %v5570_v55 = vpop.f32.mrb[13].mxu0  ;;  %v2221_v8 = vsel %vm1481_vm5, %v2217_v51, -inf }
0x1624   :  { %6121 = vrot.lane.b32.xlu0 %v6735_v46, %s6326_s30 }
0x1628   :  { %6126 = vrot.lane.b32.xlu0 %v6735_v46, %s6329_s13 }
0x169b   :  { %v1976_v56 = vpop.xlane.xlu0 %1975 }
0x169c   :  { %v1977_v57 = vsub.f32 %v1970_v44, %v1976_v56 }
0x169e   :  { %v1978_v58 = vmul.f32 1.442695, %v1977_v57 }
0x169f   :  { %v6122_v48 = vpop.permute.xlu0 %6121 }
0x16a0   :  { %6193 = vpow2.f32 %v1978_v58  ;;  %v6124_v60 = vunpack.i.h.bf16 %v6122_v48  ;;  %v6123_v53 = vunpack.i.l.bf16 %v6122_v48  ;;  %v6847_v48 = vld [vmem:[%s7367_s2 + $0xf8] sm:$0xff] }
0x16a2   :  { %v5927_v1 = vpack.c.bf16 %v6124_v60, %v6123_v53 }
0x16a3   :  { %v6127_v50 = vpop.permute.xlu0 %6126 }
0x16a4   :  { %5928 = vmatpush3.bf16.msra.mxu1 %v5927_v1  ;;  %v6128_v55 = vunpack.i.l.bf16 %v6127_v50 }
0x16a5   :  { %5559 = vmatprep.subr.mxu1 %v6320_v24 }
0x16aa   :  { %v6194_v3 = vpop.eup %6193 }
0x16ab   :  { %v1980_v4 = vsel %vm1481_vm5, %v6194_v3, 0.0 }
0x16ac   :  { %1981 = vadd.xlane.f32.xlu1 %v1980_v4 }
0x16b0   :  { %2222 = vmax.xlane.f32.xlu1 %v2221_v8  ;;  %v2388_v8 = vsub.s32 7, %v6465_v32 }
0x1739   :  { %v1982_v11 = vpop.xlane.xlu1 %1981 }
0x173a   :  { %6195 = vrcp.f32 %v1982_v11  ;;  %v6857_v11 = vrot.slane %v6471_v34, %v2388_v8  ;;  %v61_v8 = vld [vmem:[%s7367_s2 + $0x138] sm:$0xff] }
0x173d   :  { %v2223_v46 = vpop.xlane.xlu1 %2222 }
0x173e   :  { %v2224_v13 = vsub.f32 %v2217_v51, %v2223_v46  ;;  %v6129_v51 = vunpack.i.h.bf16 %v6127_v50 }
0x1740   :  { %v2225_v14 = vmul.f32 1.442695, %v2224_v13  ;;  %v5934_v56 = vpack.c.bf16 %v6129_v51, %v6128_v55 }
0x1742   :  { %6197 = vpow2.f32 %v2225_v14 }
0x1744   :  { %v6196_v16 = vpop.eup %6195 }
0x1745   :  { %v1984_v20 = vmul.f32 %v6196_v16, %v6194_v3 }
0x1747   :  { %5557 = vmatmul.mubr.msk.f32.vlgmr.msra.gmra.mrb[32].mxu1 %vm1481_vm5, %v1984_v20  ;;  %v1985_v22 = vadd.f32 %v1984_v20, %v1666_v19  ;;  %v6866_v19 = vld [vmem:[%s7365_s0 + $0x8] sm:$0xff] }
0x1748   :  { %5561 = vmatprep.mubr.msk.f32.mxu1 %vm6319_vm2, %v6320_v24  ;;  %5560 = vmatpush3.msra.mxu1 %v6832_v31  ;;  %v2609_v34 = vsel %vm75_vm0, %v6866_v19, 0.0 }
0x1749   :  { %5933 = vmatprep.subr.bf16.mxu1 %v6318_v5 }
0x174c   :  { %v6198_v25 = vpop.eup %6197 }
0x174d   :  { %v2227_v30 = vsel %vm1481_vm5, %v6198_v25, 0.0 }
0x174e   :  { %2228 = vadd.xlane.f32.xlu1 %v2227_v30  ;;  %v56_v30 = vld [vmem:[%s7367_s2 + $0x110] sm:$0xff] }
0x17db   :  { %v2229_v17 = vpop.xlane.xlu1 %2228 }
0x17dc   :  { %6199 = vrcp.f32 %v2229_v17  ;;  %v57_v17 = vld [vmem:[%s7367_s2 + $0x118] sm:$0xff] }
0x17e6   :  { %v6200_v61 = vpop.eup %6199 }
0x17e7   :  { %v2231_v40 = vmul.f32 %v6200_v61, %v6198_v25  ;;  %v6890_v61 = vpack.c.bf16 %v57_v17, %v56_v30 }
0x17e9   :  { %v2232_v44 = vadd.f32 %v2231_v40, %v1985_v22  ;;  %v54_v22 = vld [vmem:[%s7367_s2 + $0x100] sm:$0xff] }
0x17eb   :  { %v2391_v0 = vmul.f32 0.25, %v2232_v44 }
0x17ed   :  { %2603 = vst.msk [vmem:[#allocation6] sm:$0xff] %vm1481_vm5, %v2391_v0 }
0x181a   :  { %v2061_v57 = vpop.f32.mrb[32].mxu1 }
0x181b   :  { %v5558_v58 = vpop.f32.mrb[33].mxu1  ;;  %5562 = vmatmul.mubr.msk.f32.vlgmr.msra.gmra.mrb[34].mxu1 %vm217_vm3, %v2061_v57 }
0x181c   :  { %5935 = vmatpush3.bf16.msra.mxu1 %v5934_v56  ;;  %5575 = vmatprep.mubr.msk.f32.mxu1 %vm6319_vm2, %v6320_v24 }
0x181d   :  { %5578 = vmatprep.subr.mxu1 %v6320_v24 }
0x181f   :  { %5576 = vmatmul.mubr.msk.f32.vlgmr.msra.gmra.mrb[36].mxu1 %vm1481_vm5, %v2231_v40 }
0x1820   :  { %5580 = vmatprep.mubr.msk.f32.mxu1 %vm6319_vm2, %v6320_v24  ;;  %5579 = vmatpush3.msra.mxu1 %v6847_v48 }
0x1821   :  { %5952 = vmatprep.subr.bf16.mxu1 %v6318_v5 }
0x18ee   :  { %v2134_v60 = vpop.f32.mrb[34].mxu1 }
0x18ef   :  { %v2138_v53 = vadd.f32 %v2134_v60, %v6813_v37  ;;  %v5563_v1 = vpop.f32.mrb[35].mxu1 }
0x18f0   :  { %v59_v1 = vld [vmem:[%s7367_s2 + $0x128] sm:$0xff] }
0x18f2   :  { %v2308_v3 = vpop.f32.mrb[36].mxu1 }
0x18f3   :  { %v5577_v4 = vpop.f32.mrb[37].mxu1  ;;  %5581 = vmatmul.mubr.msk.f32.vlgmr.msra.gmra.mrb[38].mxu1 %vm217_vm3, %v2308_v3 }
0x18f4   :  { %5618 = vmatprep.mubr.msk.f32.mxu1 %vm6319_vm2, %v6320_v24  ;;  %v60_v4 = vld [vmem:[%s7367_s2 + $0x130] sm:$0xff] }
0x19c6   :  { %v2381_v46 = vpop.f32.mrb[38].mxu1 }
0x19c7   :  { %v2385_v13 = vadd.f32 %v2381_v46, %v2138_v53  ;;  %v5582_v14 = vpop.f32.mrb[39].mxu1  ;;  %v58_v53 = vld [vmem:[%s7367_s2 + $0x120] sm:$0xff]  ;;  %v6922_v46 = vpack.c.bf16 %v61_v8, %v60_v4 }
0x19c8   :  { %v6910_v3 = vpack.c.bf16 %v59_v1, %v58_v53  ;;  %v63_v14 = vld [vmem:[%s7367_s2 + $0x148] sm:$0xff]  ;;  %v69_v53 = vld [vmem:[%s7367_s2 + $0x178] sm:$0xff] }
0x19c9   :  { %v2390_v16 = vadd.f32 %v6857_v11, %v2385_v13  ;;  %v62_v13 = vld [vmem:[%s7367_s2 + $0x140] sm:$0xff] }
0x19cb   :  { %v6861_v37 = vadd.f32 %v2390_v16, %v6609_v38  ;;  %v55_v38 = vld [vmem:[%s7367_s2 + $0x108] sm:$0xff]  ;;  %v6934_v16 = vpack.c.bf16 %v63_v14, %v62_v13 }
0x19cc   :  { %v6878_v25 = vpack.c.bf16 %v55_v38, %v54_v22  ;;  %v71_v38 = vld [vmem:[%s7368_s3 + $0x8] sm:$0xff] }
0x19cd   :  { %v2393_v20 = vsel %vm75_vm0, %v6861_v37, 0.0  ;;  %5954 = vmatpush3.bf16.msra.mxu1 %v6934_v16  ;;  %v6943_v30 = vrot.slane %v71_v38, %v92_v33  ;;  %v64_v33 = vld [vmem:[%s7367_s2 + $0x150] sm:$0xff]  ;;  %v6986_v4 = vrot.slane %v71_v38, %v102_v42 }
0x19ce   :  { %2394 = vadd.xlane.f32.xlu1 %v2393_v20  ;;  %5939 = vmatpush3.bf16.xpose.msk.msra.mxu0 %vm6381_vm1, %v6878_v25 }
0x19cf   :  { %5940 = vmatprep.subr.bf16.mxu0 %v6318_v5  ;;  %5955 = vmatprep.subr.bf16.mxu1 %v6318_v5 }
0x19d2   :  { %2610 = vadd.xlane.f32.xlu1 %v2609_v34 }
0x19d6   :  { %5943 = vmatpush3.bf16.xpose.msk.msra.mxu0 %vm6381_vm1, %v6890_v61 }
0x19d7   :  { %5944 = vmatprep.subr.bf16.mxu0 %v6318_v5 }
0x19de   :  { %5947 = vmatpush3.bf16.xpose.msk.msra.mxu0 %vm6381_vm1, %v6910_v3 }
0x19df   :  { %5948 = vmatprep.subr.bf16.mxu0 %v6318_v5 }
0x19e6   :  { %5951 = vmatpush3.bf16.xpose.msk.msra.mxu0 %vm6381_vm1, %v6922_v46 }
0x19e7   :  { %5648 = vmatprep.subr.mxu0 %v6320_v24 }
0x1a5b   :  { %v2395_v40 = vpop.xlane.xlu1 %2394 }
0x1a5c   :  { %v2396_v44 = vmul.f32 0.03125, %v2395_v40  ;;  %v6947_v40 = vrot.slane %v71_v38, %v97_v35 }
0x1a5e   :  { %v2397_v0 = vsub.f32 %v6861_v37, %v2396_v44 }
0x1a5f   :  { %v2611_v50 = vpop.xlane.xlu1 %2610 }
0x1a60   :  { %v2398_v51 = vmul.f32 %v2397_v0, %v2397_v0  ;;  %v2612_v55 = vmul.f32 0.03125, %v2611_v50 }
0x1a62   :  { %v2399_v56 = vsel %vm75_vm0, %v2398_v51, 0.0  ;;  %v6899_v57 = vsub.f32 %v6866_v19, %v2612_v55  ;;  %v65_v55 = vld [vmem:[%s7367_s2 + $0x158] sm:$0xff] }
0x1a63   :  { %2400 = vadd.xlane.f32.xlu0 %v2399_v56  ;;  %v6960_v35 = vpack.c.bf16 %v65_v55, %v64_v33  ;;  %v67_v56 = vld [vmem:[%s7367_s2 + $0x168] sm:$0xff] }
0x1a64   :  { %v2614_v58 = vmul.f32 %v6899_v57, %v6899_v57 }
0x1a65   :  { %5957 = vmatpush3.bf16.msra.mxu1 %v6960_v35 }
0x1a66   :  { %v2615_v60 = vsel %vm75_vm0, %v2614_v58, 0.0  ;;  %5958 = vmatprep.subr.bf16.mxu1 %v6318_v5 }
0x1a67   :  { %2616 = vadd.xlane.f32.xlu1 %v2615_v60  ;;  %v68_v60 = vld [vmem:[%s7367_s2 + $0x170] sm:$0xff] }
0x1a68   :  { %v6980_v1 = vpack.c.bf16 %v69_v53, %v68_v60 }
0x1af0   :  { %v2401_v20 = vpop.xlane.xlu0 %2400 }
0x1af1   :  { %v2402_v34 = vmul.f32 0.03125, %v2401_v20 }
0x1af3   :  { %v2403_v22 = vadd.f32 1e-05, %v2402_v34 }
0x1af4   :  { %v2617_v42 = vpop.xlane.xlu1 %2616 }
0x1af5   :  { %6201 = vrsqrt.f32 %v2403_v22 }
0x1aff   :  { %v6202_v17 = vpop.eup %6201 }
0x1b00   :  { %v2405_v44 = vmul.f32 %v6202_v17, %v2397_v0  ;;  %v66_v0 = vld [vmem:[%s7367_s2 + $0x160] sm:$0xff] }
0x1b01   :  { %v6970_v58 = vpack.c.bf16 %v67_v56, %v66_v0 }
0x1b02   :  { %v2410_v50 = vmul.f32 %v6943_v30, %v2405_v44 }
0x1b03   :  { %5960 = vmatpush3.bf16.msra.mxu1 %v6970_v58 }
0x1b04   :  { %v2415_v51 = vadd.f32 %v6947_v40, %v2410_v50  ;;  %5961 = vmatprep.subr.bf16.mxu1 %v6318_v5  ;;  %v2618_v50 = vmul.f32 0.03125, %v2617_v42 }
0x1b06   :  { %5600 = vmatmul.mubr.msk.f32.vlgmr.msra.gmra.mrb[14].mxu0 %vm75_vm0, %v2415_v51 }
0x1b07   :  { %5650 = vmatprep.mubr.msk.f32.mxu0 %vm6319_vm2, %v6320_v24  ;;  %5963 = vmatpush3.bf16.msra.mxu1 %v6980_v1 }
0x1b08   :  { %5964 = vmatprep.subr.bf16.mxu1 %v6318_v5 }
0x1bd9   :  { %v2513_v8 = vpop.f32.mrb[14].mxu0 }
0x1bda   :  { %v2514_v13 = vadd.f32 %v2513_v8, %v6986_v4  ;;  %v5601_v14 = vpop.f32.mrb[15].mxu0 }
0x1bdc   :  { %v2518_v20 = vmul.f32 0.70710677, %v2514_v13  ;;  %v2517_v22 = vmul.f32 0.5, %v2514_v13 }
0x1bde   :  { %6203 = verf.f32 %v2518_v20 }
0x1be8   :  { %v6204_v34 = vpop.eup %6203 }
0x1be9   :  { %v2520_v17 = vadd.f32 1.0, %v6204_v34 }
0x1beb   :  { %v2521_v44 = vmul.f32 %v2520_v17, %v2517_v22 }
0x1bed   :  { %5619 = vmatmul.mubr.msk.f32.vlgmr.msra.gmra.mrb[40].mxu1 %vm2526_vm6, %v2521_v44 }
0x1bee   :  { %5967 = vmatpush3.bf16.xpose.msk.msra.mxu1 %vm6381_vm1, %v6392_v6  ;;  %5645 = vmatprep.mubr.msk.f32.mxu1 %vm6319_vm2, %v6320_v24  ;;  %v2619_v6 = vadd.f32 1e-05, %v2618_v50 }
0x1bef   :  { %5968 = vmatprep.subr.bf16.mxu1 %v6318_v5 }
0x1bf0   :  { %6205 = vrsqrt.f32 %v2619_v6 }
0x1bf6   :  { %5971 = vmatpush3.bf16.xpose.msk.msra.mxu1 %vm6381_vm1, %v6404_v9 }
0x1bf7   :  { %5972 = vmatprep.subr.bf16.mxu1 %v6318_v5 }
0x1bfa   :  { %v6206_v9 = vpop.eup %6205 }
0x1bfb   :  { %v2621_v51 = vmul.f32 %v6206_v9, %v6899_v57 }
0x1bfe   :  { %5975 = vmatpush3.bf16.xpose.msk.msra.mxu1 %vm6381_vm1, %v6416_v12  ;;  %v2622_v12 = vmul.f32 %v2621_v51, %v6477_v36 }
0x1bff   :  { %5976 = vmatprep.subr.bf16.mxu1 %v6318_v5 }
0x1c06   :  { %5979 = vmatpush3.bf16.xpose.msk.msra.mxu1 %vm6381_vm1, %v6428_v15  ;;  %v2623_v15 = vadd.f32 %v2622_v12, %v6482_v39 }
0x1c07   :  { %5980 = vmatprep.subr.bf16.mxu1 %v6318_v5 }
0x1c0e   :  { %5983 = vmatpush3.bf16.xpose.msk.msra.mxu1 %vm6381_vm1, %v6442_v23  ;;  %v7024_v23 = vrot.slane %v71_v38, %v1175_v26 }
0x1c0f   :  { %5984 = vmatprep.subr.bf16.mxu1 %v6318_v5 }
0x1c16   :  { %5987 = vmatpush3.bf16.xpose.msk.msra.mxu1 %vm6381_vm1, %v6459_v27 }
0x1c17   :  { %5693 = vmatprep.subr.mxu1 %v6320_v24 }
0x1c1d   :  { %5646 = vmatmul.mubr.msk.f32.vlgmr.msra.gmra.mrb[42].mxu1 %vm75_vm0, %v2623_v15 }
0x1c1e   :  { %5695 = vmatprep.mubr.msk.f32.mxu1 %vm6319_vm2, %v6320_v24 }
0x1cc0   :  { %v2596_v57 = vpop.f32.mrb[40].mxu1 }
0x1cc1   :  { %v2597_v33 = vadd.f32 %v2596_v57, %v7024_v23  ;;  %v5620_v55 = vpop.f32.mrb[41].mxu1 }
0x1cc3   :  { %v2600_v27 = vadd.f32 %v2597_v33, %v6861_v37 }
0x1cc5   :  { %2601 = vst.msk [vmem:[#allocation2] sm:$0xff] %vm75_vm0, %v2600_v27 }
0x1cf0   :  { %v2693_v36 = vpop.f32.mrb[42].mxu1 }
0x1cf1   :  { %v7030_v39 = vadd.f32 %v2693_v36, %v6493_v43  ;;  %v5647_v0 = vpop.f32.mrb[43].mxu1 }
0x1cf3   :  { %2788 = vrot.lane.b32.xlu0 %v7030_v39, %s6321_s25  ;;  %2699 = vrot.lane.b32.xlu1 %v7030_v39, %s6322_s26  ;;  %v2697_v26 = vmul.f32 0.35355338, %v7030_v39 }
0x1cf7   :  { %2866 = vrot.lane.b32.xlu0 %v7030_v39, %s6323_s27 }
0x1d65   :  { %v2700_v32 = vpop.permute.xlu1 %2699  ;;  %v2789_v37 = vpop.permute.xlu0 %2788 }
0x1d66   :  { %5649 = vmatpush3.xpose.msk.msra.mxu0 %vm217_vm3, %v2700_v32 }
0x1d67   :  { %5653 = vmatprep.subr.mxu0 %v6320_v24 }
0x1d69   :  { %5651 = vmatmul.mubr.msk.f32.vlgmr.msra.gmra.mrb[16].mxu0 %vm217_vm3, %v2697_v26  ;;  %v2867_v20 = vpop.permute.xlu0 %2866 }
0x1d6a   :  { %5654 = vmatpush3.msra.mxu0 %v2789_v37  ;;  %5655 = vmatprep.mubr.msk.f32.mxu0 %vm6319_vm2, %v6320_v24 }
0x1d6b   :  { %5658 = vmatprep.subr.mxu0 %v6320_v24 }
0x1e3c   :  { %v2772_v43 = vpop.f32.mrb[16].mxu0 }
0x1e3d   :  { %v5652_v38 = vpop.f32.mrb[17].mxu0  ;;  %v2776_v56 = vsel %vm217_vm3, %v2772_v43, -inf }
0x1e3e   :  { %2777 = vmax.xlane.f32.xlu1 %v2776_v56 }
0x1ecb   :  { %v2778_v60 = vpop.xlane.xlu1 %2777 }
0x1ecc   :  { %v2779_v53 = vsub.f32 %v2772_v43, %v2778_v60 }
0x1ece   :  { %v2780_v8 = vmul.f32 1.442695, %v2779_v53 }
0x1ed0   :  { %6207 = vpow2.f32 %v2780_v8 }
0x1eda   :  { %v6208_v13 = vpop.eup %6207 }
0x1edb   :  { %v2782_v14 = vsel %vm217_vm3, %v6208_v13, 0.0 }
0x1edc   :  { %2783 = vadd.xlane.f32.xlu0 %v2782_v14 }
0x1ef2   :  { %2864 = vrot.lane.b32.xlu0 %v2697_v26, %s6324_s28 }
0x1f69   :  { %v2784_v34 = vpop.xlane.xlu0 %2783 }
0x1f6a   :  { %6209 = vrcp.f32 %v2784_v34 }
0x1f6d   :  { %v2865_v44 = vpop.permute.xlu0 %2864 }
0x1f74   :  { %v6210_v22 = vpop.eup %6209 }
0x1f75   :  { %v7048_v17 = vmul.f32 %v6210_v22, %v6208_v13  ;;  %v6246_v13 = vld [vmem:[%s7367_s2 + $0x60] sm:$0xff] }
0x1f77   :  { %5656 = vmatmul.mubr.msk.f32.vlgmr.msra.gmra.mrb[18].mxu0 %vm217_vm3, %v7048_v17 }
0x1f78   :  { %5659 = vmatpush3.xpose.msk.msra.mxu0 %vm217_vm3, %v2867_v20  ;;  %5660 = vmatprep.mubr.msk.f32.mxu0 %vm6319_vm2, %v6320_v24 }
0x1f79   :  { %5663 = vmatprep.subr.mxu0 %v6320_v24 }
0x1f7b   :  { %5661 = vmatmul.mubr.msk.f32.vlgmr.msra.gmra.mrb[20].mxu0 %vm217_vm3, %v2865_v44 }
0x1f7c   :  { %5665 = vmatprep.mubr.msk.f32.mxu0 %vm6319_vm2, %v6320_v24 }
0x204a   :  { %v2860_v42 = vpop.f32.mrb[18].mxu0 }
0x204b   :  { %v5657_v50 = vpop.f32.mrb[19].mxu0 }
0x204e   :  { %v2938_v6 = vpop.f32.mrb[20].mxu0 }
0x204f   :  { %v5662_v9 = vpop.f32.mrb[21].mxu0  ;;  %v2942_v51 = vsel %vm217_vm3, %v2938_v6, -inf }
0x2050   :  { %2943 = vmax.xlane.f32.xlu1 %v2942_v51 }
0x2061   :  { %2954 = vrot.lane.b32.xlu1 %v7030_v39, %s6325_s29 }
0x2065   :  { %3178 = vrot.lane.b32.xlu1 %v7030_v39, %s6326_s30 }
0x2069   :  { %3176 = vrot.lane.b32.xlu1 %v2697_v26, %s6327_s7 }
0x206d   :  { %3418 = vrot.lane.b32.xlu1 %v7030_v39, %s6329_s13 }
0x20dd   :  { %v2944_v12 = vpop.xlane.xlu1 %2943 }
0x20de   :  { %v2945_v15 = vsub.f32 %v2938_v6, %v2944_v12 }
0x20e0   :  { %v2946_v57 = vmul.f32 1.442695, %v2945_v15 }
0x20e1   :  { %v2955_v33 = vpop.permute.xlu1 %2954 }
0x20e2   :  { %6211 = vpow2.f32 %v2946_v57  ;;  %5664 = vmatpush3.msra.mxu0 %v2955_v33 }
0x20e3   :  { %5668 = vmatprep.subr.mxu0 %v6320_v24 }
0x20e5   :  { %v3179_v55 = vpop.permute.xlu1 %3178 }
0x20e9   :  { %v3177_v27 = vpop.permute.xlu1 %3176 }
0x20ec   :  { %v6212_v36 = vpop.eup %6211 }
0x20ed   :  { %v3419_v0 = vpop.permute.xlu1 %3418  ;;  %v2948_v32 = vsel %vm217_vm3, %v6212_v36, 0.0 }
0x20ee   :  { %2949 = vadd.xlane.f32.xlu0 %v2948_v32  ;;  %5694 = vmatpush3.xpose.msk.msra.mxu1 %vm217_vm3, %v3419_v0 }
0x20ef   :  { %5703 = vmatprep.subr.mxu1 %v6320_v24 }
0x2104   :  { %3416 = vrot.lane.b32.xlu0 %v2697_v26, %s6330_s14  ;;  %v6245_v26 = vld [vmem:[%s7367_s2 + $0x68] sm:$0xff] }
0x217b   :  { %v2950_v37 = vpop.xlane.xlu0 %2949 }
0x217c   :  { %6213 = vrcp.f32 %v2950_v37 }
0x217f   :  { %v3417_v43 = vpop.permute.xlu0 %3416 }
0x2180   :  { %5696 = vmatmul.mubr.msk.f32.vlgmr.msra.gmra.mrb[44].mxu1 %vm217_vm3, %v3417_v43 }
0x2181   :  { %5704 = vmatpush3.msra.mxu1 %v6593_v45  ;;  %5705 = vmatprep.mubr.msk.f32.mxu1 %vm6319_vm2, %v6320_v24 }
0x2182   :  { %5998 = vmatprep.subr.msk.bf16.mxu1 %vm6381_vm1, %v6622_v47 }
0x2186   :  { %v6214_v38 = vpop.eup %6213 }
0x2187   :  { %v2952_v56 = vmul.f32 %v6214_v38, %v6212_v36 }
0x2189   :  { %5666 = vmatmul.mubr.msk.f32.vlgmr.msra.gmra.mrb[22].mxu0 %vm217_vm3, %v2952_v56  ;;  %v2953_v43 = vadd.f32 %v2952_v56, %v7048_v17 }
0x218a   :  { %5669 = vmatpush3.msra.mxu0 %v6245_v26  ;;  %5670 = vmatprep.mubr.msk.f32.mxu0 %vm6319_vm2, %v6320_v24 }
0x218b   :  { %5673 = vmatprep.subr.mxu0 %v6320_v24 }
0x2253   :  { %v3490_v45 = vpop.f32.mrb[44].mxu1 }
0x2254   :  { %v5697_v60 = vpop.f32.mrb[45].mxu1 }
0x2255   :  { %v6247_v60 = vld [vmem:[%s7367_s2 + $0x70] sm:$0xff] }
0x225c   :  { %v3026_v53 = vpop.f32.mrb[22].mxu0 }
0x225d   :  { %v5667_v8 = vpop.f32.mrb[23].mxu0  ;;  %5671 = vmatmul.mubr.msk.f32.vlgmr.msra.gmra.mrb[24].mxu0 %vm217_vm3, %v3026_v53 }
0x225e   :  { %5674 = vmatpush3.msra.mxu0 %v6246_v13  ;;  %5675 = vmatprep.mubr.msk.f32.mxu0 %vm6319_vm2, %v6320_v24 }
0x225f   :  { %5678 = vmatprep.subr.mxu0 %v6320_v24 }
0x2261   :  { %5676 = vmatmul.mubr.msk.f32.vlgmr.msra.gmra.mrb[26].mxu0 %vm217_vm3, %v2860_v42 }
0x2262   :  { %5680 = vmatprep.mubr.msk.f32.mxu0 %vm6319_vm2, %v6320_v24 }
0x2265   :  { %5679 = vmatpush3.xpose.msk.msra.mxu0 %vm217_vm3, %v3179_v55  ;;  %v3494_v55 = vsel %vm217_vm3, %v3490_v45, -inf }
0x2266   :  { %5683 = vmatprep.subr.mxu0 %v6320_v24 }
0x2268   :  { %5681 = vmatmul.mubr.msk.f32.vlgmr.msra.gmra.mrb[28].mxu0 %vm217_vm3, %v3177_v27 }
0x2269   :  { %5685 = vmatprep.mubr.msk.f32.mxu0 %vm6319_vm2, %v6320_v24 }
0x2330   :  { %v3099_v14 = vpop.f32.mrb[24].mxu0 }
0x2331   :  { %v5672_v20 = vpop.f32.mrb[25].mxu0 }
0x2334   :  { %v3172_v34 = vpop.f32.mrb[26].mxu0 }
0x2335   :  { %v3173_v22 = vadd.f32 %v3172_v34, %v3099_v14  ;;  %v5677_v44 = vpop.f32.mrb[27].mxu0 }
0x233b   :  { %v3250_v50 = vpop.f32.mrb[28].mxu0 }
0x233c   :  { %v5682_v6 = vpop.f32.mrb[29].mxu0  ;;  %v3254_v42 = vsel %vm217_vm3, %v3250_v50, -inf }
0x233d   :  { %3255 = vmax.xlane.f32.xlu1 %v3254_v42  ;;  %v5110_v42 = vld [vmem:[%s7366_s1 + $0x10] sm:$0xff] }
0x234e   :  { %3266 = vrot.lane.b32.xlu1 %v7030_v39, %s6328_s12 }
0x23ca   :  { %v3256_v9 = vpop.xlane.xlu1 %3255 }
0x23cb   :  { %v3257_v51 = vsub.f32 %v3250_v50, %v3256_v9 }
0x23cd   :  { %v3258_v12 = vmul.f32 1.442695, %v3257_v51 }
0x23ce   :  { %v3267_v15 = vpop.permute.xlu1 %3266 }
0x23cf   :  { %6215 = vpow2.f32 %v3258_v12  ;;  %5684 = vmatpush3.msra.mxu0 %v3267_v15 }
0x23d0   :  { %5688 = vmatprep.subr.mxu0 %v6320_v24 }
0x23d9   :  { %v6216_v57 = vpop.eup %6215 }
0x23da   :  { %v3260_v33 = vsel %vm217_vm3, %v6216_v57, 0.0 }
0x23db   :  { %3261 = vadd.xlane.f32.xlu0 %v3260_v33 }
0x23df   :  { %3495 = vmax.xlane.f32.xlu0 %v3494_v55 }
0x23f5   :  { %3506 = vrot.lane.b32.xlu0 %v7030_v39, %s6331_s17 }
0x2468   :  { %v3262_v27 = vpop.xlane.xlu0 %3261 }
0x2469   :  { %6217 = vrcp.f32 %v3262_v27 }
0x246c   :  { %v3496_v36 = vpop.xlane.xlu0 %3495 }
0x246d   :  { %v3497_v0 = vsub.f32 %v3490_v45, %v3496_v36 }
0x246f   :  { %v3498_v32 = vmul.f32 1.442695, %v3497_v0 }
0x2470   :  { %v3507_v20 = vpop.permute.xlu0 %3506 }
0x2471   :  { %6219 = vpow2.f32 %v3498_v32 }
0x2473   :  { %v6218_v37 = vpop.eup %6217 }
0x2474   :  { %v3264_v38 = vmul.f32 %v6218_v37, %v6216_v57 }
0x2476   :  { %5686 = vmatmul.mubr.msk.f32.vlgmr.msra.gmra.mrb[30].mxu0 %vm217_vm3, %v3264_v38  ;;  %v3265_v26 = vadd.f32 %v3264_v38, %v2953_v43 }
0x2477   :  { %5689 = vmatpush3.msra.mxu0 %v6247_v60  ;;  %5690 = vmatprep.mubr.msk.f32.mxu0 %vm6319_vm2, %v6320_v24 }
0x2478   :  { %5698 = vmatprep.subr.mxu0 %v6320_v24 }
0x247b   :  { %v6220_v39 = vpop.eup %6219 }
0x247c   :  { %v3500_v45 = vsel %vm217_vm3, %v6220_v39, 0.0 }
0x247d   :  { %3501 = vadd.xlane.f32.xlu1 %v3500_v45 }
0x250a   :  { %v3502_v53 = vpop.xlane.xlu1 %3501 }
0x250b   :  { %6221 = vrcp.f32 %v3502_v53 }
0x2515   :  { %v6222_v17 = vpop.eup %6221 }
0x2516   :  { %v3504_v56 = vmul.f32 %v6222_v17, %v6220_v39 }
0x2518   :  { %v3505_v8 = vadd.f32 %v3504_v56, %v3265_v26 }
0x251a   :  { %v3657_v13 = vmul.f32 0.25, %v3505_v8 }
0x251c   :  { %4985 = vst.msk [vmem:[#allocation4 + $0x8] sm:$0xff] %vm217_vm3, %v3657_v13 }
0x2549   :  { %v3338_v14 = vpop.f32.mrb[30].mxu0 }
0x254a   :  { %v5687_v34 = vpop.f32.mrb[31].mxu0  ;;  %5691 = vmatmul.mubr.msk.f32.vlgmr.msra.gmra.mrb[32].mxu0 %vm217_vm3, %v3338_v14 }
0x254b   :  { %5699 = vmatpush3.msra.mxu0 %v3507_v20  ;;  %5700 = vmatprep.mubr.msk.f32.mxu0 %vm6319_vm2, %v6320_v24 }
0x254c   :  { %5988 = vmatprep.subr.bf16.mxu0 %v6318_v5 }
0x254e   :  { %5701 = vmatmul.mubr.msk.f32.vlgmr.msra.gmra.mrb[34].mxu0 %vm217_vm3, %v3504_v56 }
0x254f   :  { %5716 = vmatprep.mubr.msk.f32.mxu0 %vm6319_vm2, %v6320_v24 }
0x2552   :  { %5991 = vmatpush3.bf16.xpose.msk.msra.mxu0 %vm6381_vm1, %v6674_v62 }
0x2553   :  { %5992 = vmatprep.subr.bf16.mxu0 %v6318_v5 }
0x255a   :  { %5995 = vmatpush3.bf16.xpose.msk.msra.mxu0 %vm6381_vm1, %v6698_v7 }
0x255b   :  { %6020 = vmatprep.subr.bf16.mxu0 %v6318_v5 }
0x261d   :  { %v3411_v44 = vpop.f32.mrb[32].mxu0 }
0x261e   :  { %v3415_v50 = vadd.f32 %v3411_v44, %v3173_v22  ;;  %v5692_v6 = vpop.f32.mrb[33].mxu0 }
0x2621   :  { %v3578_v9 = vpop.f32.mrb[34].mxu0 }
0x2622   :  { %v5702_v51 = vpop.f32.mrb[35].mxu0  ;;  %5706 = vmatmul.mubr.msk.f32.vlgmr.msra.gmra.mrb[46].mxu1 %vm217_vm3, %v3578_v9 }
0x2623   :  { %6001 = vmatpush3.bf16.xpose.msk.msra.mxu1 %vm6381_vm1, %v6622_v47  ;;  %5735 = vmatprep.mubr.msk.f32.mxu1 %vm75_vm0, %v5110_v42  ;;  %v5111_v47 = vld [vmem:[%s7366_s1 + $0x18] sm:$0xff]  ;;  %s6332_s1 = smov [#allocation4]  }
0x2624   :  { %6004 = vmatprep.subr.msk.bf16.mxu1 %vm6381_vm1, %v6627_v49 }
0x262b   :  { %6007 = vmatpush3.bf16.xpose.msk.msra.mxu1 %vm6381_vm1, %v6627_v49 }
0x262c   :  { %6010 = vmatprep.subr.msk.bf16.mxu1 %vm6381_vm1, %v6644_v52 }
0x2633   :  { %6013 = vmatpush3.bf16.xpose.msk.msra.mxu1 %vm6381_vm1, %v6644_v52 }
0x2634   :  { %6016 = vmatprep.subr.msk.bf16.mxu1 %vm6381_vm1, %v6663_v59 }
0x263b   :  { %6019 = vmatpush3.bf16.xpose.msk.msra.mxu1 %vm6381_vm1, %v6663_v59 }
0x263c   :  { %6031 = vmatprep.subr.bf16.mxu1 %v6318_v5 }
0x2642   :  { %5736 = vmatmul.mubr.msk.f32.vlgmr.msra.gmra.mrb[48].mxu1 %vm75_vm0, %v5111_v47 }
0x2643   :  { %5763 = vmatprep.mubr.msk.f32.mxu1 %vm6319_vm2, %v6320_v24 }
0x26f5   :  { %v3651_v49 = vpop.f32.mrb[46].mxu1 }
0x26f6   :  { %v3655_v52 = vadd.f32 %v3651_v49, %v3415_v50  ;;  %v5707_v62 = vpop.f32.mrb[47].mxu1 }
0x26f8   :  { %v3656_v7 = vadd.f32 %v3655_v52, %v6605_v28 }
0x26fa   :  { %v7169_v22 = vadd.f32 %v6866_v19, %v3656_v7 }
0x26fc   :  { %v3659_v59 = vsel %vm75_vm0, %v7169_v22, 0.0 }
0x26fd   :  { %3660 = vadd.xlane.f32.xlu0 %v3659_v59 }
0x2715   :  { %v5737_v12 = vpop.f32.mrb[48].mxu1 }
0x2716   :  { %v3825_v15 = vadd.f32 %v5737_v12, %v6725_v29  ;;  %v3819_v57 = vpop.f32.mrb[49].mxu1 }
0x2717   :  { %v3820_v33 = vadd.f32 %v3819_v57, %v6725_v29 }
0x2719   :  { %v7175_v55 = vpack.i.bf16 %v3825_v15, %v3820_v33  ;;  %v6021_v27 = vpack.c.bf16 %v3825_v15, %v3820_v33 }
0x271b   :  { %6136 = vrot.lane.b32.xlu0 %v7175_v55, %s6324_s28 }
0x278a   :  { %v3661_v28 = vpop.xlane.xlu0 %3660 }
0x278b   :  { %v3662_v36 = vmul.f32 0.03125, %v3661_v28 }
0x278d   :  { %v3663_v19 = vsub.f32 %v7169_v22, %v3662_v36 }
0x278e   :  { %v6137_v51 = vpop.permute.xlu0 %6136 }
0x278f   :  { %v3664_v0 = vmul.f32 %v3663_v19, %v3663_v19  ;;  %v6139_v47 = vunpack.i.h.bf16 %v6137_v51  ;;  %v6138_v49 = vunpack.i.l.bf16 %v6137_v51 }
0x2791   :  { %v3665_v32 = vsel %vm75_vm0, %v3664_v0, 0.0  ;;  %v6028_v7 = vpack.c.bf16 %v6139_v47, %v6138_v49 }
0x2792   :  { %3666 = vadd.xlane.f32.xlu1 %v3665_v32 }
0x281f   :  { %v3667_v37 = vpop.xlane.xlu1 %3666 }
0x2820   :  { %v3668_v43 = vmul.f32 0.03125, %v3667_v37 }
0x2822   :  { %v3669_v38 = vadd.f32 1e-05, %v3668_v43 }
0x2824   :  { %6223 = vrsqrt.f32 %v3669_v38 }
0x282e   :  { %v6224_v26 = vpop.eup %6223 }
0x282f   :  { %v3671_v29 = vmul.f32 %v6224_v26, %v3663_v19 }
0x2831   :  { %v3672_v60 = vmul.f32 %v3671_v29, %v6715_v18 }
0x2833   :  { %v3673_v39 = vadd.f32 %v3672_v60, %v6718_v21 }
0x2835   :  { %5717 = vmatmul.mubr.msk.f32.vlgmr.msra.gmra.mrb[36].mxu0 %vm75_vm0, %v3673_v39 }
0x2836   :  { %6023 = vmatpush3.bf16.xpose.msk.msra.mxu0 %vm6731_vm4, %v6021_v27  ;;  %5742 = vmatprep.mubr.msk.f32.mxu0 %vm6319_vm2, %v6320_v24 }
0x2837   :  { %6024 = vmatprep.subr.bf16.mxu0 %v6318_v5 }
0x2908   :  { %v3743_v45 = vpop.f32.mrb[36].mxu0 }
0x2909   :  { %v3744_v53 = vadd.f32 %v3743_v45, %v6708_v10  ;;  %v5718_v17 = vpop.f32.mrb[37].mxu0 }
0x290b   :  { %v3828_v56 = vmul.f32 0.35355338, %v3744_v53 }
0x290d   :  { %5743 = vmatmul.mubr.msk.f32.vlgmr.msra.gmra.mrb[38].mxu0 %vm217_vm3, %v3828_v56 }
0x290e   :  { %5749 = vmatprep.mubr.msk.f32.mxu0 %vm6319_vm2, %v6320_v24 }
0x29e0   :  { %v3904_v18 = vpop.f32.mrb[38].mxu0 }
0x29e1   :  { %v5744_v21 = vpop.f32.mrb[39].mxu0  ;;  %v3908_v8 = vsel %vm1481_vm5, %v3904_v18, -inf }
0x29e2   :  { %3909 = vmax.xlane.f32.xlu1 %v3908_v8 }
0x29f3   :  { %6131 = vrot.lane.b32.xlu1 %v7175_v55, %s6322_s26  ;;  %s5005_s26 = sshll.u32 %s6332_s1, 4  ;;  %s5006_s26 = int_to_ptr.vmem [resolvable:$true] %s5005_s26 }
0x29f4   :  { %p6253_p1 = scmp.lt.s32.totalorder %s5006_s26, %s5006_s26 }
0x2a6f   :  { %v3910_v13 = vpop.xlane.xlu1 %3909 }
0x2a70   :  { %v3911_v14 = vsub.f32 %v3904_v18, %v3910_v13 }
0x2a72   :  { %v3912_v20 = vmul.f32 1.442695, %v3911_v14 }
0x2a73   :  { %v6132_v34 = vpop.permute.xlu1 %6131 }
0x2a74   :  { %6225 = vpow2.f32 %v3912_v20  ;;  %v6134_v10 = vunpack.i.h.bf16 %v6132_v34  ;;  %v6133_v44 = vunpack.i.l.bf16 %v6132_v34 }
0x2a76   :  { %v6025_v50 = vpack.c.bf16 %v6134_v10, %v6133_v44 }
0x2a78   :  { %6026 = vmatpush3.bf16.msra.mxu0 %v6025_v50 }
0x2a79   :  { %6027 = vmatprep.subr.bf16.mxu0 %v6318_v5 }
0x2a7e   :  { %v6226_v6 = vpop.eup %6225 }
0x2a7f   :  { %v3914_v42 = vsel %vm1481_vm5, %v6226_v6, 0.0 }
0x2a80   :  { %3915 = vadd.xlane.f32.xlu1 %v3914_v42 }
0x2a91   :  { %3999 = vrot.lane.b32.xlu1 %v3828_v56, %s6324_s28 }
0x2b0d   :  { %v3916_v9 = vpop.xlane.xlu1 %3915 }
0x2b0e   :  { %6227 = vrcp.f32 %v3916_v9 }
0x2b11   :  { %v4000_v59 = vpop.permute.xlu1 %3999 }
0x2b18   :  { %v6228_v52 = vpop.eup %6227 }
0x2b19   :  { %v7199_v62 = vmul.f32 %v6228_v52, %v6226_v6 }
0x2b1b   :  { %5750 = vmatmul.mubr.msk.f32.vlgmr.msra.gmra.mrb[40].mxu0 %vm1481_vm5, %v7199_v62 }
0x2b1c   :  { %6030 = vmatpush3.bf16.xpose.msk.msra.mxu0 %vm6731_vm4, %v6028_v7  ;;  %5756 = vmatprep.mubr.msk.f32.mxu0 %vm6319_vm2, %v6320_v24 }
0x2b1d   :  { %5766 = vmatprep.subr.mxu0 %v6320_v24 }
0x2b23   :  { %5757 = vmatmul.mubr.msk.f32.vlgmr.msra.gmra.mrb[42].mxu0 %vm217_vm3, %v4000_v59 }
0x2b24   :  { %5767 = vmatpush3.msra.mxu0 %v6776_v54  ;;  %5768 = vmatprep.mubr.msk.f32.mxu0 %vm6319_vm2, %v6320_v24 }
0x2b25   :  { %6034 = vmatprep.subr.bf16.mxu0 %v6318_v5 }
0x2bee   :  { %v3995_v12 = vpop.f32.mrb[40].mxu0 }
0x2bef   :  { %v5751_v15 = vpop.f32.mrb[41].mxu0 }
0x2bf6   :  { %v4077_v57 = vpop.f32.mrb[42].mxu0 }
0x2bf7   :  { %v5758_v33 = vpop.f32.mrb[43].mxu0  ;;  %v4081_v27 = vsel %vm1481_vm5, %v4077_v57, -inf }
0x2bf8   :  { %4082 = vmax.xlane.f32.xlu1 %v4081_v27 }
0x2c09   :  { %6141 = vrot.lane.b32.xlu1 %v7175_v55, %s6323_s27  ;;  %s6248_s27 = scalar_lea.vmem %s5006_s26, 256 }
0x2c0a   :  { %p6249_p0 = scmp.ne.s32.totalorder %s5006_s26, %s6248_s27  ;;  %p6254_p2 = scmp.lt.s32.totalorder %s6248_s27, %s6248_s27 }
0x2c0c   :  { %p6255_p3 = por %p6254_p2, %p6253_p1 }
0x2c0d   :  { %4318 = vrot.lane.b32.xlu1 %v3828_v56, %s6327_s7 }
0x2c0e   :  { %p6256_p4 = pnand %p6255_p3, %p6249_p0 }
0x2c11   :  { %6151 = vrot.lane.b32.xlu1 %v7175_v55, %s6330_s14 }
0x2c15   :  { %4565 = vrot.lane.b32.xlu1 %v3828_v56, %s6330_s14 }
0x2c85   :  { %v4083_v54 = vpop.xlane.xlu1 %4082 }
0x2c86   :  { %v4084_v28 = vsub.f32 %v4077_v57, %v4083_v54 }
0x2c88   :  { %v4085_v36 = vmul.f32 1.442695, %v4084_v28 }
0x2c89   :  { %v6142_v19 = vpop.permute.xlu1 %6141 }
0x2c8a   :  { %6229 = vpow2.f32 %v4085_v36  ;;  %v6144_v0 = vunpack.i.h.bf16 %v6142_v19  ;;  %v6143_v32 = vunpack.i.l.bf16 %v6142_v19 }
0x2c8c   :  { %v6032_v37 = vpack.c.bf16 %v6144_v0, %v6143_v32 }
0x2c8d   :  { %v4319_v45 = vpop.permute.xlu1 %4318 }
0x2c8e   :  { %6033 = vmatpush3.bf16.msra.mxu1 %v6032_v37 }
0x2c8f   :  { %5771 = vmatprep.subr.mxu1 %v6320_v24 }
0x2c91   :  { %v6152_v21 = vpop.permute.xlu1 %6151 }
0x2c92   :  { %v6153_v13 = vunpack.i.l.bf16 %v6152_v21 }
0x2c94   :  { %v6230_v43 = vpop.eup %6229 }
0x2c95   :  { %v4087_v38 = vsel %vm1481_vm5, %v6230_v43, 0.0  ;;  %v4566_v10 = vpop.permute.xlu1 %4565 }
0x2c96   :  { %4088 = vadd.xlane.f32.xlu0 %v4087_v38 }
0x2cac   :  { %6146 = vrot.lane.b32.xlu0 %v7175_v55, %s6327_s7 }
0x2d23   :  { %v4089_v26 = vpop.xlane.xlu0 %4088 }
0x2d24   :  { %6231 = vrcp.f32 %v4089_v26 }
0x2d27   :  { %v6147_v39 = vpop.permute.xlu0 %6146 }
0x2d28   :  { %v6149_v53 = vunpack.i.h.bf16 %v6147_v39  ;;  %v6148_v17 = vunpack.i.l.bf16 %v6147_v39 }
0x2d2a   :  { %v6035_v56 = vpack.c.bf16 %v6149_v53, %v6148_v17 }
0x2d2e   :  { %v6232_v29 = vpop.eup %6231 }
0x2d2f   :  { %v7224_v60 = vmul.f32 %v6232_v29, %v6230_v43 }
0x2d31   :  { %5764 = vmatmul.mubr.msk.f32.vlgmr.msra.gmra.mrb[50].mxu1 %vm1481_vm5, %v7224_v60  ;;  %v4092_v28 = vadd.f32 %v7224_v60, %v7199_v62 }
0x2d32   :  { %5772 = vmatpush3.msra.mxu1 %v6787_v63  ;;  %5773 = vmatprep.mubr.msk.f32.mxu1 %vm6319_vm2, %v6320_v24  ;;  %v6154_v63 = vunpack.i.h.bf16 %v6152_v21 }
0x2d33   :  { %6038 = vmatprep.subr.bf16.mxu1 %v6318_v5 }
0x2d34   :  { %v6042_v34 = vpack.c.bf16 %v6154_v63, %v6153_v13 }
0x2d35   :  { %5774 = vmatmul.mubr.msk.f32.vlgmr.msra.gmra.mrb[52].mxu1 %vm217_vm3, %v3995_v12 }
0x2d36   :  { %5787 = vmatprep.mubr.msk.f32.mxu1 %vm6319_vm2, %v6320_v24 }
0x2e04   :  { %v4168_v18 = vpop.f32.mrb[50].mxu1 }
0x2e05   :  { %v5765_v8 = vpop.f32.mrb[51].mxu1  ;;  %5769 = vmatmul.mubr.msk.f32.vlgmr.msra.gmra.mrb[44].mxu0 %vm217_vm3, %v4168_v18 }
0x2e06   :  { %6037 = vmatpush3.bf16.xpose.msk.msra.mxu0 %vm6731_vm4, %v6035_v56  ;;  %5780 = vmatprep.mubr.msk.f32.mxu0 %vm6319_vm2, %v6320_v24 }
0x2e07   :  { %6041 = vmatprep.subr.bf16.mxu0 %v6318_v5 }
0x2e08   :  { %v4314_v14 = vpop.f32.mrb[52].mxu1 }
0x2e09   :  { %v5775_v20 = vpop.f32.mrb[53].mxu1 }
0x2e0d   :  { %5781 = vmatmul.mubr.msk.f32.vlgmr.msra.gmra.mrb[46].mxu0 %vm217_vm3, %v4319_v45 }
0x2e0e   :  { %6044 = vmatpush3.bf16.xpose.msk.msra.mxu0 %vm6731_vm4, %v6042_v34  ;;  %5799 = vmatprep.mubr.msk.f32.mxu0 %vm6319_vm2, %v6320_v24 }
0x2e0f   :  { %6048 = vmatprep.subr.bf16.mxu0 %v6318_v5 }
0x2e15   :  { %5800 = vmatmul.mubr.msk.f32.vlgmr.msra.gmra.mrb[48].mxu0 %vm217_vm3, %v4566_v10 }
0x2e16   :  { %6051 = vmatpush3.bf16.xpose.msk.msra.mxu0 %vm6381_vm1, %v6878_v25  ;;  %5830 = vmatprep.mubr.msk.f32.mxu0 %vm6319_vm2, %v6320_v24 }
0x2e17   :  { %6052 = vmatprep.subr.bf16.mxu0 %v6318_v5 }
0x2e1e   :  { %6055 = vmatpush3.bf16.xpose.msk.msra.mxu0 %vm6381_vm1, %v6890_v61 }
0x2e1f   :  { %6056 = vmatprep.subr.bf16.mxu0 %v6318_v5 }
0x2e26   :  { %6059 = vmatpush3.bf16.xpose.msk.msra.mxu0 %vm6381_vm1, %v6910_v3 }
0x2e27   :  { %6060 = vmatprep.subr.bf16.mxu0 %v6318_v5 }
0x2e2e   :  { %6063 = vmatpush3.bf16.xpose.msk.msra.mxu0 %vm6381_vm1, %v6922_v46 }
0x2ed8   :  { %v4241_v41 = vpop.f32.mrb[44].mxu0 }
0x2ed9   :  { %v7265_v25 = vadd.f32 %v4314_v14, %v4241_v41  ;;  %v5770_v44 = vpop.f32.mrb[45].mxu0 }
0x2ee0   :  { %v4396_v50 = vpop.f32.mrb[46].mxu0 }
0x2ee1   :  { %v5782_v6 = vpop.f32.mrb[47].mxu0  ;;  %v4400_v61 = vsel %vm1481_vm5, %v4396_v50, -inf }
0x2ee2   :  { %4401 = vmax.xlane.f32.xlu0 %v4400_v61 }
0x2ee8   :  { %v4643_v42 = vpop.f32.mrb[48].mxu0 }
0x2ee9   :  { %v5801_v9 = vpop.f32.mrb[49].mxu0  ;;  %v4647_v12 = vsel %vm1481_vm5, %v4643_v42, -inf }
0x2ef8   :  { %6156 = vrot.lane.b32.xlu0 %v7175_v55, %s6326_s30 }
0x2f6f   :  { %v4402_v3 = vpop.xlane.xlu0 %4401 }
0x2f70   :  { %v4403_v51 = vsub.f32 %v4396_v50, %v4402_v3 }
0x2f72   :  { %v4404_v47 = vmul.f32 1.442695, %v4403_v51 }
0x2f73   :  { %v6157_v49 = vpop.permute.xlu0 %6156 }
0x2f74   :  { %6233 = vpow2.f32 %v4404_v47  ;;  %v6159_v2 = vunpack.i.h.bf16 %v6157_v49  ;;  %v6158_v46 = vunpack.i.l.bf16 %v6157_v49 }
0x2f76   :  { %v6039_v52 = vpack.c.bf16 %v6159_v2, %v6158_v46 }
0x2f78   :  { %6040 = vmatpush3.bf16.msra.mxu1 %v6039_v52 }
0x2f79   :  { %5790 = vmatprep.subr.mxu1 %v6320_v24 }
0x2f7e   :  { %v6234_v7 = vpop.eup %6233 }
0x2f7f   :  { %v4406_v59 = vsel %vm1481_vm5, %v6234_v7, 0.0 }
0x2f80   :  { %4407 = vadd.xlane.f32.xlu1 %v4406_v59 }
0x2f84   :  { %4648 = vmax.xlane.f32.xlu1 %v4647_v12 }
0x300d   :  { %v4408_v15 = vpop.xlane.xlu1 %4407 }
0x300e   :  { %6235 = vrcp.f32 %v4408_v15 }
0x3011   :  { %v4649_v57 = vpop.xlane.xlu1 %4648 }
0x3012   :  { %v4650_v33 = vsub.f32 %v4643_v42, %v4649_v57 }
0x3014   :  { %v4651_v27 = vmul.f32 1.442695, %v4650_v33 }
0x3016   :  { %6237 = vpow2.f32 %v4651_v27 }
0x3018   :  { %v6236_v54 = vpop.eup %6235 }
0x3019   :  { %v4410_v36 = vmul.f32 %v6236_v54, %v6234_v7 }
0x301b   :  { %5788 = vmatmul.mubr.msk.f32.vlgmr.msra.gmra.mrb[54].mxu1 %vm1481_vm5, %v4410_v36  ;;  %v4411_v19 = vadd.f32 %v4410_v36, %v4092_v28 }
0x301c   :  { %5791 = vmatpush3.msra.mxu1 %v6832_v31  ;;  %5792 = vmatprep.mubr.msk.f32.mxu1 %vm6319_vm2, %v6320_v24 }
0x301d   :  { %6045 = vmatprep.subr.bf16.mxu1 %v6318_v5 }
0x3020   :  { %v6238_v0 = vpop.eup %6237 }
0x3021   :  { %v4653_v32 = vsel %vm1481_vm5, %v6238_v0, 0.0 }
0x3022   :  { %4654 = vadd.xlane.f32.xlu1 %v4653_v32 }
0x3033   :  { %6161 = vrot.lane.b32.xlu1 %v7175_v55, %s6329_s13 }
0x30af   :  { %v4655_v37 = vpop.xlane.xlu1 %4654 }
0x30b0   :  { %6239 = vrcp.f32 %v4655_v37 }
0x30b3   :  { %v6162_v31 = vpop.permute.xlu1 %6161 }
0x30b4   :  { %v6164_v29 = vunpack.i.h.bf16 %v6162_v31  ;;  %v6163_v60 = vunpack.i.l.bf16 %v6162_v31 }
0x30b6   :  { %v6046_v39 = vpack.c.bf16 %v6164_v29, %v6163_v60 }
0x30ba   :  { %v6240_v62 = vpop.eup %6239 }
0x30bb   :  { %v4657_v43 = vmul.f32 %v6240_v62, %v6238_v0 }
0x30bd   :  { %v4658_v38 = vadd.f32 %v4657_v43, %v4411_v19 }
0x30bf   :  { %v4813_v26 = vmul.f32 0.25, %v4658_v38 }
0x30c1   :  { %4987 = vst.msk [vmem:[#allocation6 + $0x8] sm:$0xff] %vm1481_vm5, %v4813_v26 }
0x30ee   :  { %v4487_v45 = vpop.f32.mrb[54].mxu1 }
0x30ef   :  { %v5789_v53 = vpop.f32.mrb[55].mxu1  ;;  %5793 = vmatmul.mubr.msk.f32.vlgmr.msra.gmra.mrb[56].mxu1 %vm217_vm3, %v4487_v45 }
0x30f0   :  { %6047 = vmatpush3.bf16.msra.mxu1 %v6046_v39  ;;  %5806 = vmatprep.mubr.msk.f32.mxu1 %vm6319_vm2, %v6320_v24 }
0x30f1   :  { %5809 = vmatprep.subr.mxu1 %v6320_v24 }
0x30f3   :  { %5807 = vmatmul.mubr.msk.f32.vlgmr.msra.gmra.mrb[58].mxu1 %vm1481_vm5, %v4657_v43 }
0x30f4   :  { %5810 = vmatpush3.msra.mxu1 %v6847_v48  ;;  %5811 = vmatprep.mubr.msk.f32.mxu1 %vm6319_vm2, %v6320_v24 }
0x30f5   :  { %6064 = vmatprep.subr.bf16.mxu1 %v6318_v5 }
0x31c2   :  { %v4560_v55 = vpop.f32.mrb[56].mxu1 }
0x31c3   :  { %v4564_v17 = vadd.f32 %v4560_v55, %v7265_v25  ;;  %v5794_v56 = vpop.f32.mrb[57].mxu1 }
0x31c6   :  { %v4734_v18 = vpop.f32.mrb[58].mxu1 }
0x31c7   :  { %v5808_v21 = vpop.f32.mrb[59].mxu1  ;;  %5812 = vmatmul.mubr.msk.f32.vlgmr.msra.gmra.mrb[60].mxu1 %vm217_vm3, %v4734_v18 }
0x31c8   :  { %6066 = vmatpush3.bf16.msra.mxu1 %v6934_v16  ;;  %5849 = vmatprep.mubr.msk.f32.mxu1 %vm6319_vm2, %v6320_v24 }
0x31c9   :  { %6067 = vmatprep.subr.bf16.mxu1 %v6318_v5 }
0x31cc   :  { %6069 = vmatpush3.bf16.msra.mxu1 %v6960_v35 }
0x31cd   :  { %6070 = vmatprep.subr.bf16.mxu1 %v6318_v5 }
0x31d0   :  { %6072 = vmatpush3.bf16.msra.mxu1 %v6970_v58 }
0x31d1   :  { %6073 = vmatprep.subr.bf16.mxu1 %v6318_v5 }
0x31d4   :  { %6075 = vmatpush3.bf16.msra.mxu1 %v6980_v1 }
0x329a   :  { %v4807_v48 = vpop.f32.mrb[60].mxu1 }
0x329b   :  { %v4811_v8 = vadd.f32 %v4807_v48, %v4564_v17  ;;  %v5813_v63 = vpop.f32.mrb[61].mxu1 }
0x329d   :  { %v4812_v16 = vadd.f32 %v4811_v8, %v6857_v11 }
0x329f   :  { %v7306_v13 = vadd.f32 %v4812_v16, %v7169_v22 }
0x32a1   :  { %v4815_v24 = vsel %vm75_vm0, %v7306_v13, 0.0 }
0x32a2   :  { %4816 = vadd.xlane.f32.xlu0 %v4815_v24 }
0x332f   :  { %v4817_v35 = vpop.xlane.xlu0 %4816 }
0x3330   :  { %v4818_v14 = vmul.f32 0.03125, %v4817_v35 }
0x3332   :  { %v4819_v58 = vsub.f32 %v7306_v13, %v4818_v14 }
0x3334   :  { %v4820_v20 = vmul.f32 %v4819_v58, %v4819_v58 }
0x3336   :  { %v4821_v5 = vsel %vm75_vm0, %v4820_v20, 0.0 }
0x3337   :  { %4822 = vadd.xlane.f32.xlu1 %v4821_v5 }
0x33c4   :  { %v4823_v1 = vpop.xlane.xlu1 %4822 }
0x33c5   :  { %v4824_v34 = vmul.f32 0.03125, %v4823_v1 }
0x33c7   :  { %v4825_v10 = vadd.f32 1e-05, %v4824_v34 }
0x33c9   :  { %6241 = vrsqrt.f32 %v4825_v10 }
0x33d3   :  { %v6242_v11 = vpop.eup %6241 }
0x33d4   :  { %v4827_v41 = vmul.f32 %v6242_v11, %v4819_v58 }
0x33d6   :  { %v4828_v22 = vmul.f32 %v4827_v41, %v6943_v30 }
0x33d8   :  { %v4829_v25 = vadd.f32 %v4828_v22, %v6947_v40 }
0x33da   :  { %5831 = vmatmul.mubr.msk.f32.vlgmr.msra.gmra.mrb[50].mxu0 %vm75_vm0, %v4829_v25 }
0x34ad   :  { %v4899_v44 = vpop.f32.mrb[50].mxu0 }
0x34ae   :  { %v4900_v50 = vadd.f32 %v4899_v44, %v6986_v4  ;;  %v5832_v6 = vpop.f32.mrb[51].mxu0 }
0x34b0   :  { %v4904_v61 = vmul.f32 0.70710677, %v4900_v50  ;;  %v4903_v9 = vmul.f32 0.5, %v4900_v50 }
0x34b2   :  { %6243 = verf.f32 %v4904_v61 }
0x34bc   :  { %v6244_v42 = vpop.eup %6243 }
0x34bd   :  { %v4906_v3 = vadd.f32 1.0, %v6244_v42 }
0x34bf   :  { %v4907_v51 = vmul.f32 %v4906_v3, %v4903_v9 }
0x34c1   :  { %5850 = vmatmul.mubr.msk.f32.vlgmr.msra.gmra.mrb[62].mxu1 %vm2526_vm6, %v4907_v51 }
0x34c2   :  { %6259 = shalt.err (!%p6256_p4)
}
0x34c3   :  { %s6260_s7 = scalar_lea.hbm %s7370_s5, 256 }
0x34c4   :  { %p6261_p5 = scmp.ne.s32.totalorder %s7370_s5, %s6260_s7  ;;  %p6264_p6 = scmp.lt.u32.totalorder %s6260_s7, %s7370_s5 }
0x34c6   :  { %p6266_p7 = pnand %p6264_p6, %p6261_p5 }
0x34c8   :  { %6269 = shalt.err (!%p6266_p7)
}
0x34c9   :  { %s6333_s15 = smov 128   ;;  %s6334_s16 = smov 8  }
0x34ca   :  { %5011 = dma.vmem_to_hbm [thread:$0]  %s5006_s26, 256, %s7370_s5, [#allocation5], %s6333_s15, %s6333_s15, %s6334_s16  }
0x34cb   :  { %s6335_s20 = smov [#allocation6]  }
0x34cc   :  { %s5017_s21 = sshll.u32 %s6335_s20, 4  ;;  %s5018_s21 = int_to_ptr.vmem [resolvable:$true] %s5017_s21 }
0x34cd   :  { %s6270_s22 = scalar_lea.vmem %s5018_s21, 256  ;;  %p6275_p9 = scmp.lt.s32.totalorder %s5018_s21, %s5018_s21 }
0x34ce   :  { %p6271_p8 = scmp.ne.s32.totalorder %s5018_s21, %s6270_s22  ;;  %p6276_p10 = scmp.lt.s32.totalorder %s6270_s22, %s6270_s22 }
0x34d0   :  { %p6277_p11 = por %p6276_p10, %p6275_p9 }
0x34d2   :  { %p6278_p12 = pnand %p6277_p11, %p6271_p8 }
0x34d4   :  { %6281 = shalt.err (!%p6278_p12)
}
0x34d5   :  { %s6282_s29 = scalar_lea.hbm %s7371_s6, 256 }
0x34d6   :  { %p6283_p13 = scmp.ne.s32.totalorder %s7371_s6, %s6282_s29  ;;  %p6286_p0 = scmp.lt.u32.totalorder %s6282_s29, %s7371_s6 }
0x34d8   :  { %p6288_p1 = pnand %p6286_p0, %p6283_p13 }
0x34da   :  { %6291 = shalt.err (!%p6288_p1)
}
0x34db   :  { %5023 = dma.vmem_to_hbm [thread:$0]  %s5018_s21, 256, %s7371_s6, [#allocation5], %s6333_s15, %s6333_s15, %s6334_s16  }
0x34dc   :  { %s6336_s17 = smov [#allocation2]  }
0x34dd   :  { %s4993_s3 = sshll.u32 %s6336_s17, 4  ;;  %s4994_s3 = int_to_ptr.vmem [resolvable:$true] %s4993_s3 }
0x34de   :  { %s6292_s9 = scalar_lea.vmem %s4994_s3, 256  ;;  %p6297_p3 = scmp.lt.s32.totalorder %s4994_s3, %s4994_s3 }
0x34df   :  { %p6293_p2 = scmp.ne.s32.totalorder %s4994_s3, %s6292_s9  ;;  %p6298_p4 = scmp.lt.s32.totalorder %s6292_s9, %s6292_s9 }
0x34e1   :  { %p6299_p5 = por %p6298_p4, %p6297_p3 }
0x34e3   :  { %p6300_p6 = pnand %p6299_p5, %p6293_p2 }
0x3594   :  { %v4977_v30 = vpop.f32.mrb[62].mxu1 }
0x3595   :  { %v4978_v40 = vadd.f32 %v4977_v30, %v7024_v23  ;;  %v5851_v4 = vpop.f32.mrb[63].mxu1 }
0x3597   :  { %v4981_v47 = vadd.f32 %v4978_v40, %v7306_v13 }
0x3599   :  { %4983 = vst.msk [vmem:[#allocation2 + $0x8] sm:$0xff] %vm75_vm0, %v4981_v47 }
0x359a   :  { %6303 = shalt.err (!%p6300_p6)
}
0x359b   :  { %s6304_s26 = scalar_lea.hbm %s7369_s4, 256 }
0x359c   :  { %p6305_p7 = scmp.ne.s32.totalorder %s7369_s4, %s6304_s26  ;;  %p6308_p8 = scmp.lt.u32.totalorder %s6304_s26, %s7369_s4 }
0x359e   :  { %p6310_p9 = pnand %p6308_p8, %p6305_p7 }
0x35a0   :  { %6313 = shalt.err (!%p6310_p9)
}
0x35a1   :  { %4999 = dma.vmem_to_hbm [thread:$0]  %s4994_s3, 256, %s7369_s4, [#allocation3], %s6333_s15, %s6333_s15, %s6334_s16  }
0x35a2   :  { %6314 = dma.done.wait [#allocation3], 256  }
0x35a3   :  { %6315 = vsyncadd [#allocation3], 4294967040 }
0x35a4   :  { %6316 = dma.done.wait [#allocation5], 512  }
0x35a5   :  { %6317 = vsyncadd [#allocation5], 4294966784 }
0x35a6   :  { %5033 = vsyncpa [#allocation3], 1 }
0x35a7   :  { %5034 = vsyncpa [#allocation5], 1 }

</bundles_post_ra>
